<compile_context>
chip_gen: v5e
topology: v5e:2x2
jax: 0.10.0
libtpu: 0.0.40
codegen_flags: <defaults>
</compile_context>

<pallas_src>
import functools

import jax
import jax.numpy as jnp
from jax.experimental import pallas as pl
from jax.experimental.pallas import tpu as pltpu


def _cbam_kernel(x_ref, mask_ref, w_exp_ref, w_proj_ref, hpack_ref, cpack_ref,
                 out_ref, h_scr, d_scr, *,
                 W, S, Bt, hidden, mid, chunk, use_res_connect):
    """One grid step = Bt images, laid out (C, Bt*S), S = H*W on the lane axis."""
    S_total = Bt * S

    # ---- 1x1 expand conv (BN folded) + bias + ReLU6 (MXU, bf16 in / f32 acc)
    xb = x_ref[0].astype(jnp.bfloat16)                           # (Cin, Bt*S)
    h = jnp.dot(w_exp_ref[...], xb, preferred_element_type=jnp.float32)
    h_scr[...] = jnp.clip(h + hpack_ref[:, 9:10], 0.0, 6.0)      # (hidden, Bt*S)

    # ---- 3x3 depthwise conv (stride 1, pad 1, BN folded) + bias + ReLU6 ----
    # Taps via lane rotations (XLU) + {0,1} boundary masks; chunked over the
    # hidden dim so h-chunk / rolled tap / accumulator stay in vregs.
    for c0 in range(0, hidden, chunk):
        hc = h_scr[c0:c0 + chunk, :]                             # (chunk, Bt*S)
        wdw = hpack_ref[c0:c0 + chunk, 0:9]                      # (chunk, 9)
        acc = hc * wdw[:, 4:5]                                   # centre tap
        for ki in range(3):
            for kj in range(3):
                k = ki * 3 + kj
                if k == 4:
                    continue
                delta = (ki - 1) * W + (kj - 1)
                tap = pltpu.roll(hc, (-delta) % S_total, 1)      # XLU lane rotate
                acc = acc + tap * mask_ref[k:k + 1, :] * wdw[:, k:k + 1]
        acc = jnp.clip(acc + hpack_ref[c0:c0 + chunk, 10:11], 0.0, 6.0)
        d_scr[c0:c0 + chunk, :] = acc.astype(d_scr.dtype)        # bf16 for MXU

    # ---- 1x1 project conv (BN folded) + bias (MXU, bf16 in / f32 acc) ------
    conv = jnp.dot(w_proj_ref[...], d_scr[...],
                   preferred_element_type=jnp.float32) + cpack_ref[:, 0:1]

    # ---- Channel attention: per-image avg/max pool -> shared DW-sep MLP ----
    avg_cols, max_cols = [], []
    for b in range(Bt):
        cb = conv[:, b * S:(b + 1) * S]
        avg_cols.append(jnp.mean(cb, axis=1, keepdims=True))
        max_cols.append(jnp.max(cb, axis=1, keepdims=True))
    pooled = jnp.concatenate(avg_cols + max_cols, axis=1)        # (Cout, 2*Bt)

    # fc1: depthwise centre tap + pointwise (VPU mul + sublane reduce, no MXU).
    t = pooled * cpack_ref[:, 1:2] + cpack_ref[:, 2:3]
    pw1_wT = cpack_ref[:, 3:3 + mid]                             # (Cout, mid)
    t1 = jnp.concatenate(
        [jnp.sum(pw1_wT[:, m:m + 1] * t, axis=0, keepdims=True)
         for m in range(mid)], axis=0)                           # (mid, 2*Bt)
    t1 = jnp.maximum(t1 + cpack_ref[0:mid, 3 + mid:4 + mid], 0.0)        # ReLU
    # fc2: depthwise centre tap + pointwise (VPU broadcast mul-add).
    t1 = t1 * cpack_ref[0:mid, 4 + mid:5 + mid] + cpack_ref[0:mid, 5 + mid:6 + mid]
    pw2_w = cpack_ref[:, 6 + mid:6 + 2 * mid]                    # (Cout, mid)
    t2 = cpack_ref[:, 6 + 2 * mid:7 + 2 * mid]                   # start = bias
    for m in range(mid):
        t2 = t2 + pw2_w[:, m:m + 1] * t1[m:m + 1, :]             # (Cout, 2*Bt)
    ca = jax.nn.sigmoid(t2[:, 0:Bt] + t2[:, Bt:2 * Bt])          # (Cout, Bt)

    # ---- Spatial attention on the 1x1 channel-attention map (scalar gate) --
    sa = cpack_ref[0:4, 7 + 2 * mid:8 + 2 * mid]                 # (4, 1)
    w_avg = sa[0:1, :] * sa[2:3, :]
    w_max = sa[1:2, :] * sa[3:4, :]
    gate = jax.nn.sigmoid(jnp.mean(ca, axis=0, keepdims=True) * w_avg +
                          jnp.max(ca, axis=0, keepdims=True) * w_max)  # (1, Bt)

    # Broadcast each image's gate to its lanes via the image-selector mask rows.
    gate_lanes = gate[:, 0:1] * mask_ref[9:10, :]
    for b in range(1, Bt):
        gate_lanes = gate_lanes + gate[:, b:b + 1] * mask_ref[9 + b:10 + b, :]

    out = conv * gate_lanes
    if use_res_connect:
        out = out + x_ref[0]                  # re-load x here (not kept live)
    out_ref[0] = out.astype(out_ref.dtype)


def inverted_residual_cbam(x_nchw, params, use_res_connect, images_per_step=None):
    x = x_nchw.astype(jnp.float32)
    B, Cin, H, W = x.shape
    S = H * W
    (w_exp, s1, b1, wdw, s2, b2, w_proj, s3, b3,
     ca_dw1_w, ca_dw1_b, ca_pw1_w, ca_pw1_b,
     ca_dw2_w, ca_dw2_b, ca_pw2_w, ca_pw2_b, sa_p) = params
    hidden = w_exp.shape[0]
    Cout = w_proj.shape[0]
    mid = ca_pw1_w.shape[0]
    assert Cout >= max(mid, 4), "parameter packing needs Cout >= max(mid, 4)"

    # Images per grid step: one big step is best on v5e/v6e (single TC).
    # On v7x pass images_per_step = B // 2 so both TensorCores get a step.
    if images_per_step is None:
        images_per_step = B
    Bt = max(1, min(int(images_per_step), B))
    while B % Bt != 0:
        Bt -= 1
    n_steps = B // Bt
    S_total = Bt * S

    # Fold BN scales into conv weights; bf16 weights for the MXU (f32 acc).
    w_exp_bf = (w_exp * s1).astype(jnp.bfloat16)          # (hidden, Cin)
    w_proj_bf = (w_proj * s3).astype(jnp.bfloat16)        # (Cout, hidden)
    wdw_f = wdw * s2                                      # (hidden, 9), f32

    # Pack the small per-channel params into two VMEM streams.
    hidden_pack = jnp.concatenate([wdw_f, b1, b2], axis=1)          # (hidden, 11)

    def pad_rows(v):
        return jnp.pad(v, ((0, Cout - v.shape[0]), (0, 0)))

    cout_pack = jnp.concatenate(
        [b3, ca_dw1_w, ca_dw1_b, ca_pw1_w.T,
         pad_rows(ca_pw1_b), pad_rows(ca_dw2_w), pad_rows(ca_dw2_b),
         ca_pw2_w, ca_pw2_b, pad_rows(sa_p.reshape(4, 1))],
        axis=1).astype(jnp.float32)                                  # (Cout, 8+2*mid)

    # {0,1} zero-padding masks per depthwise tap (tiled per image) + per-image
    # selector rows for the spatial-attention gate broadcast.
    row = jnp.arange(H, dtype=jnp.int32)[:, None]
    col = jnp.arange(W, dtype=jnp.int32)[None, :]
    rmask = [row >= 1, row >= 0, row <= H - 2]
    cmask = [col >= 1, col >= 0, col <= W - 2]
    tap_mask = jnp.stack(
        [(rmask[ki] & cmask[kj]).astype(jnp.float32).reshape(S)
         for ki in range(3) for kj in range(3)], axis=0)             # (9, S)
    tap_mask = jnp.tile(tap_mask, (1, Bt))                           # (9, Bt*S)
    img_mask = (jnp.repeat(jnp.arange(Bt), S)[None, :]
                == jnp.arange(Bt)[:, None]).astype(jnp.float32)      # (Bt, Bt*S)
    mask_all = jnp.concatenate([tap_mask, img_mask], axis=0)         # (9+Bt, Bt*S)

    # Lay out each batch group with its images concatenated along the lanes.
    x2 = (x.reshape(n_steps, Bt, Cin, S)
            .transpose(0, 2, 1, 3)
            .reshape(n_steps, Cin, S_total))

    def full(a):
        nd = a.ndim
        return pl.BlockSpec(a.shape, lambda i, nd=nd: (0,) * nd)

    chunk = next((c for c in (32, 16, 8) if hidden % c == 0), hidden)

    kernel = functools.partial(
        _cbam_kernel, W=W, S=S, Bt=Bt, hidden=hidden, mid=mid, chunk=chunk,
        use_res_connect=use_res_connect)

    def nbytes(a):
        return int(a.size) * a.dtype.itemsize

    flops = n_steps * S_total * (2 * hidden * Cin + 2 * Cout * hidden
                                 + 2 * 9 * hidden)
    cost = pl.CostEstimate(
        flops=int(flops),
        transcendentals=int(n_steps * (2 * Cout * Bt + Bt)),
        bytes_accessed=int(nbytes(x2) + B * Cout * S * 4
                           + n_steps * (nbytes(w_exp_bf) + nbytes(w_proj_bf)
                                        + nbytes(hidden_pack) + nbytes(cout_pack)
                                        + nbytes(mask_all))))

    out = pl.pallas_call(
        kernel,
        out_shape=jax.ShapeDtypeStruct((n_steps, Cout, S_total), jnp.float32),
        grid=(n_steps,),
        in_specs=[
            pl.BlockSpec((1, Cin, S_total), lambda i: (i, 0, 0)),    # x block
            full(mask_all),
            full(w_exp_bf), full(w_proj_bf),
            full(hidden_pack), full(cout_pack),
        ],
        out_specs=pl.BlockSpec((1, Cout, S_total), lambda i: (i, 0, 0)),
        scratch_shapes=[pltpu.VMEM((hidden, S_total), jnp.float32),   # h
                        pltpu.VMEM((hidden, S_total), jnp.bfloat16)], # d (MXU in)
        compiler_params=pltpu.CompilerParams(
            dimension_semantics=("parallel",)),
        cost_estimate=cost,
    )(x2, mask_all, w_exp_bf, w_proj_bf, hidden_pack, cout_pack)

    return (out.reshape(n_steps, Cout, Bt, S)
               .transpose(0, 2, 1, 3)
               .reshape(B, Cout, H, W))


def init_params(key, Cin, Cout, expand_ratio=3, ratio=16):
    """Random weights in PyTorch (out, in)-style layouts, BN folded to
    inference-mode (scale, bias)."""
    hidden = Cin * expand_ratio
    mid = max(Cout // ratio, 1)
    keys = jax.random.split(key, 16)

    def nrm(k, shape, s=0.2):
        return (s * jax.random.normal(k, shape)).astype(jnp.float32)

    def bn_fold(k, C):
        k1, k2, k3, k4 = jax.random.split(k, 4)
        gamma = 1.0 + 0.1 * jax.random.normal(k1, (C,))
        beta = 0.1 * jax.random.normal(k2, (C,))
        mean = 0.1 * jax.random.normal(k3, (C,))
        var = 0.5 + jax.random.uniform(k4, (C,))
        scale = gamma / jnp.sqrt(var + 1e-5)
        bias = beta - mean * scale
        return (scale.reshape(C, 1).astype(jnp.float32),
                bias.reshape(C, 1).astype(jnp.float32))

    # main conv path
    w_exp = nrm(keys[0], (hidden, Cin))                       # 1x1 expand
    s1, b1 = bn_fold(keys[1], hidden)
    wdw = nrm(keys[2], (hidden, 3, 3)).reshape(hidden, 9)     # 3x3 depthwise
    s2, b2 = bn_fold(keys[3], hidden)
    w_proj = nrm(keys[4], (Cout, hidden))                     # 1x1 project
    s3, b3 = bn_fold(keys[5], Cout)

    # channel attention (DepthwiseSeparableConv fc1 / fc2; centre taps only)
    ca_dw1_w = nrm(keys[6], (Cout, 3, 3))[:, 1, 1].reshape(Cout, 1)
    ca_dw1_b = nrm(keys[7], (Cout, 1), 0.1)
    ca_pw1_w = nrm(keys[8], (mid, Cout))
    ca_pw1_b = nrm(keys[9], (mid, 1), 0.1)
    ca_dw2_w = nrm(keys[10], (mid, 3, 3))[:, 1, 1].reshape(mid, 1)
    ca_dw2_b = nrm(keys[11], (mid, 1), 0.1)
    ca_pw2_w = nrm(keys[12], (Cout, mid))
    ca_pw2_b = nrm(keys[13], (Cout, 1), 0.1)

    # spatial attention: 7x7 depthwise centre taps + 1x1 pointwise, no bias
    sa_dw = nrm(keys[14], (2, 7, 7))
    sa_pw = nrm(keys[15], (1, 2))
    sa_p = jnp.array([sa_dw[0, 3, 3], sa_dw[1, 3, 3],
                      sa_pw[0, 0], sa_pw[0, 1]], dtype=jnp.float32)

    return (w_exp, s1, b1, wdw, s2, b2, w_proj, s3, b3,
            ca_dw1_w, ca_dw1_b, ca_pw1_w, ca_pw1_b,
            ca_dw2_w, ca_dw2_b, ca_pw2_w, ca_pw2_b, sa_p)


if __name__ == "__main__":
    B, Cin, H, W = 2, 16, 16, 16
    Cout, stride, expand_ratio = 16, 1, 3
    use_res_connect = (stride == 1 and Cin == Cout)

    key = jax.random.PRNGKey(0)
    kx, kp = jax.random.split(key)
    x = jax.random.normal(kx, (B, Cin, H, W), dtype=jnp.float32)   # NCHW input
    params = init_params(kp, Cin, Cout, expand_ratio=expand_ratio)

    fwd = jax.jit(lambda xx, pp: inverted_residual_cbam(xx, pp, use_res_connect))
    out = fwd(x, params)
    out = jax.block_until_ready(out)
    assert out.shape == (B, Cout, H, W)
    print("KERNEL_OK")
</pallas_src>

<mosaic_0001>
module attributes {stable_mosaic.version = 11 : i64} {
  func.func @_cbam_kernel(%arg0: i32, %arg1: memref<1x16x512xf32, #tpu.memory_space<vmem>>, %arg2: memref<11x512xf32, #tpu.memory_space<vmem>>, %arg3: memref<48x16xbf16, #tpu.memory_space<vmem>>, %arg4: memref<16x48xbf16, #tpu.memory_space<vmem>>, %arg5: memref<48x11xf32, #tpu.memory_space<vmem>>, %arg6: memref<16x10xf32, #tpu.memory_space<vmem>>, %arg7: memref<1x16x512xf32, #tpu.memory_space<vmem>>, %arg8: memref<48x512xf32, #tpu.memory_space<vmem>>, %arg9: memref<48x512xbf16, #tpu.memory_space<vmem>>) attributes {dimension_semantics = [#tpu.dimension_semantics<parallel>], iteration_bounds = array<i64: 1>, scalar_prefetch = 0 : i64, scratch_operands = 2 : i64, tpu.core_type = #tpu.core_type<tc>, window_params = [{transform_indices = @transform_0, window_bounds = array<i64: 1, 16, 512>}, {pipeline_mode = #tpu.pipeline_mode<synchronous>, transform_indices = @transform_1, window_bounds = array<i64: 11, 512>}, {pipeline_mode = #tpu.pipeline_mode<synchronous>, transform_indices = @transform_2, window_bounds = array<i64: 48, 16>}, {pipeline_mode = #tpu.pipeline_mode<synchronous>, transform_indices = @transform_3, window_bounds = array<i64: 16, 48>}, {pipeline_mode = #tpu.pipeline_mode<synchronous>, transform_indices = @transform_4, window_bounds = array<i64: 48, 11>}, {pipeline_mode = #tpu.pipeline_mode<synchronous>, transform_indices = @transform_5, window_bounds = array<i64: 16, 10>}, {transform_indices = @transform_6, window_bounds = array<i64: 1, 16, 512>}]} {
    %c0 = arith.constant 0 : index
    %c0_0 = arith.constant 0 : index
    %c0_1 = arith.constant 0 : index
    %0 = vector.load %arg1[%c0, %c0_0, %c0_1] : memref<1x16x512xf32, #tpu.memory_space<vmem>>, vector<1x16x512xf32>
    %1 = vector.shape_cast %0 : vector<1x16x512xf32> to vector<16x512xf32>
    %2 = arith.truncf %1 : vector<16x512xf32> to vector<16x512xbf16>
    %c0_2 = arith.constant 0 : index
    %c0_3 = arith.constant 0 : index
    %3 = vector.load %arg3[%c0_2, %c0_3] : memref<48x16xbf16, #tpu.memory_space<vmem>>, vector<48x16xbf16>
    %cst = arith.constant dense<0.000000e+00> : vector<48x512xf32>
    %4 = tpu.matmul %3, %2, %cst {dimension_numbers = #tpu.dot_dimension_numbers<[1], [0], [0], [1], [0, 0, 1, 1], [], []>} : vector<48x16xbf16>, vector<16x512xbf16>, vector<48x512xf32> -> vector<48x512xf32>
    %c0_4 = arith.constant 0 : index
    %c9 = arith.constant 9 : index
    %5 = vector.load %arg5[%c0_4, %c9] : memref<48x11xf32, #tpu.memory_space<vmem>>, vector<48x1xf32>
    %6 = vector.broadcast %5 : vector<48x1xf32> to vector<48x512xf32>
    %7 = arith.addf %4, %6 : vector<48x512xf32>
    %cst_5 = arith.constant 0.000000e+00 : f32
    %cst_6 = arith.constant 6.000000e+00 : f32
    %8 = vector.broadcast %cst_5 : f32 to vector<48x512xf32>
    %9 = arith.maximumf %8, %7 : vector<48x512xf32>
    %10 = vector.broadcast %cst_6 : f32 to vector<48x512xf32>
    %11 = arith.minimumf %10, %9 : vector<48x512xf32>
    %c0_7 = arith.constant 0 : index
    %c0_8 = arith.constant 0 : index
    %12 = vector.load %arg8[%c0_7, %c0_8] : memref<48x512xf32, #tpu.memory_space<vmem>>, vector<48x512xf32>
    tpu.vector_store %arg8[%c0_7, %c0_8], %11 {strides = array<i32>} : memref<48x512xf32, #tpu.memory_space<vmem>>, vector<48x512xf32>,
    %c0_9 = arith.constant 0 : index
    %c0_10 = arith.constant 0 : index
    %13 = vector.load %arg8[%c0_9, %c0_10] : memref<48x512xf32, #tpu.memory_space<vmem>>, vector<16x512xf32>
    %c0_11 = arith.constant 0 : index
    %c0_12 = arith.constant 0 : index
    %14 = vector.load %arg5[%c0_11, %c0_12] : memref<48x11xf32, #tpu.memory_space<vmem>>, vector<16x9xf32>
    %15 = vector.extract_strided_slice %14 {offsets = [0, 4], sizes = [16, 1], strides = [1, 1]} : vector<16x9xf32> to vector<16x1xf32>
    %16 = vector.broadcast %15 : vector<16x1xf32> to vector<16x512xf32>
    %17 = arith.mulf %13, %16 : vector<16x512xf32>
    %c17_i32 = arith.constant 17 : i32
    %18 = tpu.dynamic_rotate %13 by %c17_i32 dim 1 : vector<16x512xf32>, i32 -> vector<16x512xf32>
    %c0_13 = arith.constant 0 : index
    %c0_14 = arith.constant 0 : index
    %19 = vector.load %arg2[%c0_13, %c0_14] : memref<11x512xf32, #tpu.memory_space<vmem>>, vector<1x512xf32>
    %20 = vector.broadcast %19 : vector<1x512xf32> to vector<16x512xf32>
    %21 = arith.mulf %18, %20 : vector<16x512xf32>
    %22 = vector.extract_strided_slice %14 {offsets = [0, 0], sizes = [16, 1], strides = [1, 1]} : vector<16x9xf32> to vector<16x1xf32>
    %23 = vector.broadcast %22 : vector<16x1xf32> to vector<16x512xf32>
    %24 = arith.mulf %21, %23 : vector<16x512xf32>
    %25 = arith.addf %17, %24 : vector<16x512xf32>
    %c16_i32 = arith.constant 16 : i32
    %26 = tpu.dynamic_rotate %13 by %c16_i32 dim 1 : vector<16x512xf32>, i32 -> vector<16x512xf32>
    %c1 = arith.constant 1 : index
    %c0_15 = arith.constant 0 : index
    %27 = vector.load %arg2[%c1, %c0_15] : memref<11x512xf32, #tpu.memory_space<vmem>>, vector<1x512xf32>
    %28 = vector.broadcast %27 : vector<1x512xf32> to vector<16x512xf32>
    %29 = arith.mulf %26, %28 : vector<16x512xf32>
    %30 = vector.extract_strided_slice %14 {offsets = [0, 1], sizes = [16, 1], strides = [1, 1]} : vector<16x9xf32> to vector<16x1xf32>
    %31 = vector.broadcast %30 : vector<16x1xf32> to vector<16x512xf32>
    %32 = arith.mulf %29, %31 : vector<16x512xf32>
    %33 = arith.addf %25, %32 : vector<16x512xf32>
    %c15_i32 = arith.constant 15 : i32
    %34 = tpu.dynamic_rotate %13 by %c15_i32 dim 1 : vector<16x512xf32>, i32 -> vector<16x512xf32>
    %c2 = arith.constant 2 : index
    %c0_16 = arith.constant 0 : index
    %35 = vector.load %arg2[%c2, %c0_16] : memref<11x512xf32, #tpu.memory_space<vmem>>, vector<1x512xf32>
    %36 = vector.broadcast %35 : vector<1x512xf32> to vector<16x512xf32>
    %37 = arith.mulf %34, %36 : vector<16x512xf32>
    %38 = vector.extract_strided_slice %14 {offsets = [0, 2], sizes = [16, 1], strides = [1, 1]} : vector<16x9xf32> to vector<16x1xf32>
    %39 = vector.broadcast %38 : vector<16x1xf32> to vector<16x512xf32>
    %40 = arith.mulf %37, %39 : vector<16x512xf32>
    %41 = arith.addf %33, %40 : vector<16x512xf32>
    %c1_i32 = arith.constant 1 : i32
    %42 = tpu.dynamic_rotate %13 by %c1_i32 dim 1 : vector<16x512xf32>, i32 -> vector<16x512xf32>
    %c3 = arith.constant 3 : index
    %c0_17 = arith.constant 0 : index
    %43 = vector.load %arg2[%c3, %c0_17] : memref<11x512xf32, #tpu.memory_space<vmem>>, vector<1x512xf32>
    %44 = vector.broadcast %43 : vector<1x512xf32> to vector<16x512xf32>
    %45 = arith.mulf %42, %44 : vector<16x512xf32>
    %46 = vector.extract_strided_slice %14 {offsets = [0, 3], sizes = [16, 1], strides = [1, 1]} : vector<16x9xf32> to vector<16x1xf32>
    %47 = vector.broadcast %46 : vector<16x1xf32> to vector<16x512xf32>
    %48 = arith.mulf %45, %47 : vector<16x512xf32>
    %49 = arith.addf %41, %48 : vector<16x512xf32>
    %c511_i32 = arith.constant 511 : i32
    %50 = tpu.dynamic_rotate %13 by %c511_i32 dim 1 : vector<16x512xf32>, i32 -> vector<16x512xf32>
    %c5 = arith.constant 5 : index
    %c0_18 = arith.constant 0 : index
    %51 = vector.load %arg2[%c5, %c0_18] : memref<11x512xf32, #tpu.memory_space<vmem>>, vector<1x512xf32>
    %52 = vector.broadcast %51 : vector<1x512xf32> to vector<16x512xf32>
    %53 = arith.mulf %50, %52 : vector<16x512xf32>
    %54 = vector.extract_strided_slice %14 {offsets = [0, 5], sizes = [16, 1], strides = [1, 1]} : vector<16x9xf32> to vector<16x1xf32>
    %55 = vector.broadcast %54 : vector<16x1xf32> to vector<16x512xf32>
    %56 = arith.mulf %53, %55 : vector<16x512xf32>
    %57 = arith.addf %49, %56 : vector<16x512xf32>
    %c497_i32 = arith.constant 497 : i32
    %58 = tpu.dynamic_rotate %13 by %c497_i32 dim 1 : vector<16x512xf32>, i32 -> vector<16x512xf32>
    %c6 = arith.constant 6 : index
    %c0_19 = arith.constant 0 : index
    %59 = vector.load %arg2[%c6, %c0_19] : memref<11x512xf32, #tpu.memory_space<vmem>>, vector<1x512xf32>
    %60 = vector.broadcast %59 : vector<1x512xf32> to vector<16x512xf32>
    %61 = arith.mulf %58, %60 : vector<16x512xf32>
    %62 = vector.extract_strided_slice %14 {offsets = [0, 6], sizes = [16, 1], strides = [1, 1]} : vector<16x9xf32> to vector<16x1xf32>
    %63 = vector.broadcast %62 : vector<16x1xf32> to vector<16x512xf32>
    %64 = arith.mulf %61, %63 : vector<16x512xf32>
    %65 = arith.addf %57, %64 : vector<16x512xf32>
    %c496_i32 = arith.constant 496 : i32
    %66 = tpu.dynamic_rotate %13 by %c496_i32 dim 1 : vector<16x512xf32>, i32 -> vector<16x512xf32>
    %c7 = arith.constant 7 : index
    %c0_20 = arith.constant 0 : index
    %67 = vector.load %arg2[%c7, %c0_20] : memref<11x512xf32, #tpu.memory_space<vmem>>, vector<1x512xf32>
    %68 = vector.broadcast %67 : vector<1x512xf32> to vector<16x512xf32>
    %69 = arith.mulf %66, %68 : vector<16x512xf32>
    %70 = vector.extract_strided_slice %14 {offsets = [0, 7], sizes = [16, 1], strides = [1, 1]} : vector<16x9xf32> to vector<16x1xf32>
    %71 = vector.broadcast %70 : vector<16x1xf32> to vector<16x512xf32>
    %72 = arith.mulf %69, %71 : vector<16x512xf32>
    %73 = arith.addf %65, %72 : vector<16x512xf32>
    %c495_i32 = arith.constant 495 : i32
    %74 = tpu.dynamic_rotate %13 by %c495_i32 dim 1 : vector<16x512xf32>, i32 -> vector<16x512xf32>
    %c8 = arith.constant 8 : index
    %c0_21 = arith.constant 0 : index
    %75 = vector.load %arg2[%c8, %c0_21] : memref<11x512xf32, #tpu.memory_space<vmem>>, vector<1x512xf32>
    %76 = vector.broadcast %75 : vector<1x512xf32> to vector<16x512xf32>
    %77 = arith.mulf %74, %76 : vector<16x512xf32>
    %78 = vector.extract_strided_slice %14 {offsets = [0, 8], sizes = [16, 1], strides = [1, 1]} : vector<16x9xf32> to vector<16x1xf32>
    %79 = vector.broadcast %78 : vector<16x1xf32> to vector<16x512xf32>
    %80 = arith.mulf %77, %79 : vector<16x512xf32>
    %81 = arith.addf %73, %80 : vector<16x512xf32>
    %c0_22 = arith.constant 0 : index
    %c10 = arith.constant 10 : index
    %82 = vector.load %arg5[%c0_22, %c10] : memref<48x11xf32, #tpu.memory_space<vmem>>, vector<16x1xf32>
    %83 = vector.broadcast %82 : vector<16x1xf32> to vector<16x512xf32>
    %84 = arith.addf %81, %83 : vector<16x512xf32>
    %cst_23 = arith.constant 0.000000e+00 : f32
    %cst_24 = arith.constant 6.000000e+00 : f32
    %85 = vector.broadcast %cst_23 : f32 to vector<16x512xf32>
    %86 = arith.maximumf %85, %84 : vector<16x512xf32>
    %87 = vector.broadcast %cst_24 : f32 to vector<16x512xf32>
    %88 = arith.minimumf %87, %86 : vector<16x512xf32>
    %89 = arith.truncf %88 : vector<16x512xf32> to vector<16x512xbf16>
    %c0_25 = arith.constant 0 : index
    %c0_26 = arith.constant 0 : index
    %90 = vector.load %arg9[%c0_25, %c0_26] : memref<48x512xbf16, #tpu.memory_space<vmem>>, vector<16x512xbf16>
    tpu.vector_store %arg9[%c0_25, %c0_26], %89 {strides = array<i32>} : memref<48x512xbf16, #tpu.memory_space<vmem>>, vector<16x512xbf16>,
    %c16 = arith.constant 16 : index
    %c0_27 = arith.constant 0 : index
    %91 = vector.load %arg8[%c16, %c0_27] : memref<48x512xf32, #tpu.memory_space<vmem>>, vector<16x512xf32>
    %c16_28 = arith.constant 16 : index
    %c0_29 = arith.constant 0 : index
    %92 = vector.load %arg5[%c16_28, %c0_29] : memref<48x11xf32, #tpu.memory_space<vmem>>, vector<16x9xf32>
    %93 = vector.extract_strided_slice %92 {offsets = [0, 4], sizes = [16, 1], strides = [1, 1]} : vector<16x9xf32> to vector<16x1xf32>
    %94 = vector.broadcast %93 : vector<16x1xf32> to vector<16x512xf32>
    %95 = arith.mulf %91, %94 : vector<16x512xf32>
    %c17_i32_30 = arith.constant 17 : i32
    %96 = tpu.dynamic_rotate %91 by %c17_i32_30 dim 1 : vector<16x512xf32>, i32 -> vector<16x512xf32>
    %c0_31 = arith.constant 0 : index
    %c0_32 = arith.constant 0 : index
    %97 = vector.load %arg2[%c0_31, %c0_32] : memref<11x512xf32, #tpu.memory_space<vmem>>, vector<1x512xf32>
    %98 = vector.broadcast %97 : vector<1x512xf32> to vector<16x512xf32>
    %99 = arith.mulf %96, %98 : vector<16x512xf32>
    %100 = vector.extract_strided_slice %92 {offsets = [0, 0], sizes = [16, 1], strides = [1, 1]} : vector<16x9xf32> to vector<16x1xf32>
    %101 = vector.broadcast %100 : vector<16x1xf32> to vector<16x512xf32>
    %102 = arith.mulf %99, %101 : vector<16x512xf32>
    %103 = arith.addf %95, %102 : vector<16x512xf32>
    %c16_i32_33 = arith.constant 16 : i32
    %104 = tpu.dynamic_rotate %91 by %c16_i32_33 dim 1 : vector<16x512xf32>, i32 -> vector<16x512xf32>
    %c1_34 = arith.constant 1 : index
    %c0_35 = arith.constant 0 : index
    %105 = vector.load %arg2[%c1_34, %c0_35] : memref<11x512xf32, #tpu.memory_space<vmem>>, vector<1x512xf32>
    %106 = vector.broadcast %105 : vector<1x512xf32> to vector<16x512xf32>
    %107 = arith.mulf %104, %106 : vector<16x512xf32>
    %108 = vector.extract_strided_slice %92 {offsets = [0, 1], sizes = [16, 1], strides = [1, 1]} : vector<16x9xf32> to vector<16x1xf32>
    %109 = vector.broadcast %108 : vector<16x1xf32> to vector<16x512xf32>
    %110 = arith.mulf %107, %109 : vector<16x512xf32>
    %111 = arith.addf %103, %110 : vector<16x512xf32>
    %c15_i32_36 = arith.constant 15 : i32
    %112 = tpu.dynamic_rotate %91 by %c15_i32_36 dim 1 : vector<16x512xf32>, i32 -> vector<16x512xf32>
    %c2_37 = arith.constant 2 : index
    %c0_38 = arith.constant 0 : index
    %113 = vector.load %arg2[%c2_37, %c0_38] : memref<11x512xf32, #tpu.memory_space<vmem>>, vector<1x512xf32>
    %114 = vector.broadcast %113 : vector<1x512xf32> to vector<16x512xf32>
    %115 = arith.mulf %112, %114 : vector<16x512xf32>
    %116 = vector.extract_strided_slice %92 {offsets = [0, 2], sizes = [16, 1], strides = [1, 1]} : vector<16x9xf32> to vector<16x1xf32>
    %117 = vector.broadcast %116 : vector<16x1xf32> to vector<16x512xf32>
    %118 = arith.mulf %115, %117 : vector<16x512xf32>
    %119 = arith.addf %111, %118 : vector<16x512xf32>
    %c1_i32_39 = arith.constant 1 : i32
    %120 = tpu.dynamic_rotate %91 by %c1_i32_39 dim 1 : vector<16x512xf32>, i32 -> vector<16x512xf32>
    %c3_40 = arith.constant 3 : index
    %c0_41 = arith.constant 0 : index
    %121 = vector.load %arg2[%c3_40, %c0_41] : memref<11x512xf32, #tpu.memory_space<vmem>>, vector<1x512xf32>
    %122 = vector.broadcast %121 : vector<1x512xf32> to vector<16x512xf32>
    %123 = arith.mulf %120, %122 : vector<16x512xf32>
    %124 = vector.extract_strided_slice %92 {offsets = [0, 3], sizes = [16, 1], strides = [1, 1]} : vector<16x9xf32> to vector<16x1xf32>
    %125 = vector.broadcast %124 : vector<16x1xf32> to vector<16x512xf32>
    %126 = arith.mulf %123, %125 : vector<16x512xf32>
    %127 = arith.addf %119, %126 : vector<16x512xf32>
    %c511_i32_42 = arith.constant 511 : i32
    %128 = tpu.dynamic_rotate %91 by %c511_i32_42 dim 1 : vector<16x512xf32>, i32 -> vector<16x512xf32>
    %c5_43 = arith.constant 5 : index
    %c0_44 = arith.constant 0 : index
    %129 = vector.load %arg2[%c5_43, %c0_44] : memref<11x512xf32, #tpu.memory_space<vmem>>, vector<1x512xf32>
    %130 = vector.broadcast %129 : vector<1x512xf32> to vector<16x512xf32>
    %131 = arith.mulf %128, %130 : vector<16x512xf32>
    %132 = vector.extract_strided_slice %92 {offsets = [0, 5], sizes = [16, 1], strides = [1, 1]} : vector<16x9xf32> to vector<16x1xf32>
    %133 = vector.broadcast %132 : vector<16x1xf32> to vector<16x512xf32>
    %134 = arith.mulf %131, %133 : vector<16x512xf32>
    %135 = arith.addf %127, %134 : vector<16x512xf32>
    %c497_i32_45 = arith.constant 497 : i32
    %136 = tpu.dynamic_rotate %91 by %c497_i32_45 dim 1 : vector<16x512xf32>, i32 -> vector<16x512xf32>
    %c6_46 = arith.constant 6 : index
    %c0_47 = arith.constant 0 : index
    %137 = vector.load %arg2[%c6_46, %c0_47] : memref<11x512xf32, #tpu.memory_space<vmem>>, vector<1x512xf32>
    %138 = vector.broadcast %137 : vector<1x512xf32> to vector<16x512xf32>
    %139 = arith.mulf %136, %138 : vector<16x512xf32>
    %140 = vector.extract_strided_slice %92 {offsets = [0, 6], sizes = [16, 1], strides = [1, 1]} : vector<16x9xf32> to vector<16x1xf32>
    %141 = vector.broadcast %140 : vector<16x1xf32> to vector<16x512xf32>
    %142 = arith.mulf %139, %141 : vector<16x512xf32>
    %143 = arith.addf %135, %142 : vector<16x512xf32>
    %c496_i32_48 = arith.constant 496 : i32
    %144 = tpu.dynamic_rotate %91 by %c496_i32_48 dim 1 : vector<16x512xf32>, i32 -> vector<16x512xf32>
    %c7_49 = arith.constant 7 : index
    %c0_50 = arith.constant 0 : index
    %145 = vector.load %arg2[%c7_49, %c0_50] : memref<11x512xf32, #tpu.memory_space<vmem>>, vector<1x512xf32>
    %146 = vector.broadcast %145 : vector<1x512xf32> to vector<16x512xf32>
    %147 = arith.mulf %144, %146 : vector<16x512xf32>
    %148 = vector.extract_strided_slice %92 {offsets = [0, 7], sizes = [16, 1], strides = [1, 1]} : vector<16x9xf32> to vector<16x1xf32>
    %149 = vector.broadcast %148 : vector<16x1xf32> to vector<16x512xf32>
    %150 = arith.mulf %147, %149 : vector<16x512xf32>
    %151 = arith.addf %143, %150 : vector<16x512xf32>
    %c495_i32_51 = arith.constant 495 : i32
    %152 = tpu.dynamic_rotate %91 by %c495_i32_51 dim 1 : vector<16x512xf32>, i32 -> vector<16x512xf32>
    %c8_52 = arith.constant 8 : index
    %c0_53 = arith.constant 0 : index
    %153 = vector.load %arg2[%c8_52, %c0_53] : memref<11x512xf32, #tpu.memory_space<vmem>>, vector<1x512xf32>
    %154 = vector.broadcast %153 : vector<1x512xf32> to vector<16x512xf32>
    %155 = arith.mulf %152, %154 : vector<16x512xf32>
    %156 = vector.extract_strided_slice %92 {offsets = [0, 8], sizes = [16, 1], strides = [1, 1]} : vector<16x9xf32> to vector<16x1xf32>
    %157 = vector.broadcast %156 : vector<16x1xf32> to vector<16x512xf32>
    %158 = arith.mulf %155, %157 : vector<16x512xf32>
    %159 = arith.addf %151, %158 : vector<16x512xf32>
    %c16_54 = arith.constant 16 : index
    %c10_55 = arith.constant 10 : index
    %160 = vector.load %arg5[%c16_54, %c10_55] : memref<48x11xf32, #tpu.memory_space<vmem>>, vector<16x1xf32>
    %161 = vector.broadcast %160 : vector<16x1xf32> to vector<16x512xf32>
    %162 = arith.addf %159, %161 : vector<16x512xf32>
    %cst_56 = arith.constant 0.000000e+00 : f32
    %cst_57 = arith.constant 6.000000e+00 : f32
    %163 = vector.broadcast %cst_56 : f32 to vector<16x512xf32>
    %164 = arith.maximumf %163, %162 : vector<16x512xf32>
    %165 = vector.broadcast %cst_57 : f32 to vector<16x512xf32>
    %166 = arith.minimumf %165, %164 : vector<16x512xf32>
    %167 = arith.truncf %166 : vector<16x512xf32> to vector<16x512xbf16>
    %c16_58 = arith.constant 16 : index
    %c0_59 = arith.constant 0 : index
    %168 = vector.load %arg9[%c16_58, %c0_59] : memref<48x512xbf16, #tpu.memory_space<vmem>>, vector<16x512xbf16>
    tpu.vector_store %arg9[%c16_58, %c0_59], %167 {strides = array<i32>} : memref<48x512xbf16, #tpu.memory_space<vmem>>, vector<16x512xbf16>,
    %c32 = arith.constant 32 : index
    %c0_60 = arith.constant 0 : index
    %169 = vector.load %arg8[%c32, %c0_60] : memref<48x512xf32, #tpu.memory_space<vmem>>, vector<16x512xf32>
    %c32_61 = arith.constant 32 : index
    %c0_62 = arith.constant 0 : index
    %170 = vector.load %arg5[%c32_61, %c0_62] : memref<48x11xf32, #tpu.memory_space<vmem>>, vector<16x9xf32>
    %171 = vector.extract_strided_slice %170 {offsets = [0, 4], sizes = [16, 1], strides = [1, 1]} : vector<16x9xf32> to vector<16x1xf32>
    %172 = vector.broadcast %171 : vector<16x1xf32> to vector<16x512xf32>
    %173 = arith.mulf %169, %172 : vector<16x512xf32>
    %c17_i32_63 = arith.constant 17 : i32
    %174 = tpu.dynamic_rotate %169 by %c17_i32_63 dim 1 : vector<16x512xf32>, i32 -> vector<16x512xf32>
    %c0_64 = arith.constant 0 : index
    %c0_65 = arith.constant 0 : index
    %175 = vector.load %arg2[%c0_64, %c0_65] : memref<11x512xf32, #tpu.memory_space<vmem>>, vector<1x512xf32>
    %176 = vector.broadcast %175 : vector<1x512xf32> to vector<16x512xf32>
    %177 = arith.mulf %174, %176 : vector<16x512xf32>
    %178 = vector.extract_strided_slice %170 {offsets = [0, 0], sizes = [16, 1], strides = [1, 1]} : vector<16x9xf32> to vector<16x1xf32>
    %179 = vector.broadcast %178 : vector<16x1xf32> to vector<16x512xf32>
    %180 = arith.mulf %177, %179 : vector<16x512xf32>
    %181 = arith.addf %173, %180 : vector<16x512xf32>
    %c16_i32_66 = arith.constant 16 : i32
    %182 = tpu.dynamic_rotate %169 by %c16_i32_66 dim 1 : vector<16x512xf32>, i32 -> vector<16x512xf32>
    %c1_67 = arith.constant 1 : index
    %c0_68 = arith.constant 0 : index
    %183 = vector.load %arg2[%c1_67, %c0_68] : memref<11x512xf32, #tpu.memory_space<vmem>>, vector<1x512xf32>
    %184 = vector.broadcast %183 : vector<1x512xf32> to vector<16x512xf32>
    %185 = arith.mulf %182, %184 : vector<16x512xf32>
    %186 = vector.extract_strided_slice %170 {offsets = [0, 1], sizes = [16, 1], strides = [1, 1]} : vector<16x9xf32> to vector<16x1xf32>
    %187 = vector.broadcast %186 : vector<16x1xf32> to vector<16x512xf32>
    %188 = arith.mulf %185, %187 : vector<16x512xf32>
    %189 = arith.addf %181, %188 : vector<16x512xf32>
    %c15_i32_69 = arith.constant 15 : i32
    %190 = tpu.dynamic_rotate %169 by %c15_i32_69 dim 1 : vector<16x512xf32>, i32 -> vector<16x512xf32>
    %c2_70 = arith.constant 2 : index
    %c0_71 = arith.constant 0 : index
    %191 = vector.load %arg2[%c2_70, %c0_71] : memref<11x512xf32, #tpu.memory_space<vmem>>, vector<1x512xf32>
    %192 = vector.broadcast %191 : vector<1x512xf32> to vector<16x512xf32>
    %193 = arith.mulf %190, %192 : vector<16x512xf32>
    %194 = vector.extract_strided_slice %170 {offsets = [0, 2], sizes = [16, 1], strides = [1, 1]} : vector<16x9xf32> to vector<16x1xf32>
    %195 = vector.broadcast %194 : vector<16x1xf32> to vector<16x512xf32>
    %196 = arith.mulf %193, %195 : vector<16x512xf32>
    %197 = arith.addf %189, %196 : vector<16x512xf32>
    %c1_i32_72 = arith.constant 1 : i32
    %198 = tpu.dynamic_rotate %169 by %c1_i32_72 dim 1 : vector<16x512xf32>, i32 -> vector<16x512xf32>
    %c3_73 = arith.constant 3 : index
    %c0_74 = arith.constant 0 : index
    %199 = vector.load %arg2[%c3_73, %c0_74] : memref<11x512xf32, #tpu.memory_space<vmem>>, vector<1x512xf32>
    %200 = vector.broadcast %199 : vector<1x512xf32> to vector<16x512xf32>
    %201 = arith.mulf %198, %200 : vector<16x512xf32>
    %202 = vector.extract_strided_slice %170 {offsets = [0, 3], sizes = [16, 1], strides = [1, 1]} : vector<16x9xf32> to vector<16x1xf32>
    %203 = vector.broadcast %202 : vector<16x1xf32> to vector<16x512xf32>
    %204 = arith.mulf %201, %203 : vector<16x512xf32>
    %205 = arith.addf %197, %204 : vector<16x512xf32>
    %c511_i32_75 = arith.constant 511 : i32
    %206 = tpu.dynamic_rotate %169 by %c511_i32_75 dim 1 : vector<16x512xf32>, i32 -> vector<16x512xf32>
    %c5_76 = arith.constant 5 : index
    %c0_77 = arith.constant 0 : index
    %207 = vector.load %arg2[%c5_76, %c0_77] : memref<11x512xf32, #tpu.memory_space<vmem>>, vector<1x512xf32>
    %208 = vector.broadcast %207 : vector<1x512xf32> to vector<16x512xf32>
    %209 = arith.mulf %206, %208 : vector<16x512xf32>
    %210 = vector.extract_strided_slice %170 {offsets = [0, 5], sizes = [16, 1], strides = [1, 1]} : vector<16x9xf32> to vector<16x1xf32>
    %211 = vector.broadcast %210 : vector<16x1xf32> to vector<16x512xf32>
    %212 = arith.mulf %209, %211 : vector<16x512xf32>
    %213 = arith.addf %205, %212 : vector<16x512xf32>
    %c497_i32_78 = arith.constant 497 : i32
    %214 = tpu.dynamic_rotate %169 by %c497_i32_78 dim 1 : vector<16x512xf32>, i32 -> vector<16x512xf32>
    %c6_79 = arith.constant 6 : index
    %c0_80 = arith.constant 0 : index
    %215 = vector.load %arg2[%c6_79, %c0_80] : memref<11x512xf32, #tpu.memory_space<vmem>>, vector<1x512xf32>
    %216 = vector.broadcast %215 : vector<1x512xf32> to vector<16x512xf32>
    %217 = arith.mulf %214, %216 : vector<16x512xf32>
    %218 = vector.extract_strided_slice %170 {offsets = [0, 6], sizes = [16, 1], strides = [1, 1]} : vector<16x9xf32> to vector<16x1xf32>
    %219 = vector.broadcast %218 : vector<16x1xf32> to vector<16x512xf32>
    %220 = arith.mulf %217, %219 : vector<16x512xf32>
    %221 = arith.addf %213, %220 : vector<16x512xf32>
    %c496_i32_81 = arith.constant 496 : i32
    %222 = tpu.dynamic_rotate %169 by %c496_i32_81 dim 1 : vector<16x512xf32>, i32 -> vector<16x512xf32>
    %c7_82 = arith.constant 7 : index
    %c0_83 = arith.constant 0 : index
    %223 = vector.load %arg2[%c7_82, %c0_83] : memref<11x512xf32, #tpu.memory_space<vmem>>, vector<1x512xf32>
    %224 = vector.broadcast %223 : vector<1x512xf32> to vector<16x512xf32>
    %225 = arith.mulf %222, %224 : vector<16x512xf32>
    %226 = vector.extract_strided_slice %170 {offsets = [0, 7], sizes = [16, 1], strides = [1, 1]} : vector<16x9xf32> to vector<16x1xf32>
    %227 = vector.broadcast %226 : vector<16x1xf32> to vector<16x512xf32>
    %228 = arith.mulf %225, %227 : vector<16x512xf32>
    %229 = arith.addf %221, %228 : vector<16x512xf32>
    %c495_i32_84 = arith.constant 495 : i32
    %230 = tpu.dynamic_rotate %169 by %c495_i32_84 dim 1 : vector<16x512xf32>, i32 -> vector<16x512xf32>
    %c8_85 = arith.constant 8 : index
    %c0_86 = arith.constant 0 : index
    %231 = vector.load %arg2[%c8_85, %c0_86] : memref<11x512xf32, #tpu.memory_space<vmem>>, vector<1x512xf32>
    %232 = vector.broadcast %231 : vector<1x512xf32> to vector<16x512xf32>
    %233 = arith.mulf %230, %232 : vector<16x512xf32>
    %234 = vector.extract_strided_slice %170 {offsets = [0, 8], sizes = [16, 1], strides = [1, 1]} : vector<16x9xf32> to vector<16x1xf32>
    %235 = vector.broadcast %234 : vector<16x1xf32> to vector<16x512xf32>
    %236 = arith.mulf %233, %235 : vector<16x512xf32>
    %237 = arith.addf %229, %236 : vector<16x512xf32>
    %c32_87 = arith.constant 32 : index
    %c10_88 = arith.constant 10 : index
    %238 = vector.load %arg5[%c32_87, %c10_88] : memref<48x11xf32, #tpu.memory_space<vmem>>, vector<16x1xf32>
    %239 = vector.broadcast %238 : vector<16x1xf32> to vector<16x512xf32>
    %240 = arith.addf %237, %239 : vector<16x512xf32>
    %cst_89 = arith.constant 0.000000e+00 : f32
    %cst_90 = arith.constant 6.000000e+00 : f32
    %241 = vector.broadcast %cst_89 : f32 to vector<16x512xf32>
    %242 = arith.maximumf %241, %240 : vector<16x512xf32>
    %243 = vector.broadcast %cst_90 : f32 to vector<16x512xf32>
    %244 = arith.minimumf %243, %242 : vector<16x512xf32>
    %245 = arith.truncf %244 : vector<16x512xf32> to vector<16x512xbf16>
    %c32_91 = arith.constant 32 : index
    %c0_92 = arith.constant 0 : index
    %246 = vector.load %arg9[%c32_91, %c0_92] : memref<48x512xbf16, #tpu.memory_space<vmem>>, vector<16x512xbf16>
    tpu.vector_store %arg9[%c32_91, %c0_92], %245 {strides = array<i32>} : memref<48x512xbf16, #tpu.memory_space<vmem>>, vector<16x512xbf16>,
    %c0_93 = arith.constant 0 : index
    %c0_94 = arith.constant 0 : index
    %247 = vector.load %arg4[%c0_93, %c0_94] : memref<16x48xbf16, #tpu.memory_space<vmem>>, vector<16x48xbf16>
    %c0_95 = arith.constant 0 : index
    %c0_96 = arith.constant 0 : index
    %248 = vector.load %arg9[%c0_95, %c0_96] : memref<48x512xbf16, #tpu.memory_space<vmem>>, vector<48x512xbf16>
    %cst_97 = arith.constant dense<0.000000e+00> : vector<16x512xf32>
    %249 = tpu.matmul %247, %248, %cst_97 {dimension_numbers = #tpu.dot_dimension_numbers<[1], [0], [0], [1], [0, 0, 1, 1], [], []>} : vector<16x48xbf16>, vector<48x512xbf16>, vector<16x512xf32> -> vector<16x512xf32>
    %c0_98 = arith.constant 0 : index
    %c0_99 = arith.constant 0 : index
    %250 = vector.load %arg6[%c0_98, %c0_99] : memref<16x10xf32, #tpu.memory_space<vmem>>, vector<16x1xf32>
    %251 = vector.broadcast %250 : vector<16x1xf32> to vector<16x512xf32>
    %252 = arith.addf %249, %251 : vector<16x512xf32>
    %253 = vector.extract_strided_slice %252 {offsets = [0, 0], sizes = [16, 256], strides = [1, 1]} : vector<16x512xf32> to vector<16x256xf32>
    %cst_100 = arith.constant dense<0.000000e+00> : vector<16xf32>
    %254 = vector.multi_reduction <add>, %253, %cst_100 [1] : vector<16x256xf32> to vector<16xf32>
    %255 = vector.shape_cast %254 : vector<16xf32> to vector<16x1xf32>
    %cst_101 = arith.constant 2.560000e+02 : f32
    %256 = vector.broadcast %cst_101 : f32 to vector<16x1xf32>
    %257 = arith.divf %255, %256 : vector<16x1xf32>
    %cst_102 = arith.constant dense<0xFF800000> : vector<16xf32>
    %258 = vector.multi_reduction <maximumf>, %253, %cst_102 [1] : vector<16x256xf32> to vector<16xf32>
    %259 = vector.shape_cast %258 : vector<16xf32> to vector<16x1xf32>
    %260 = vector.extract_strided_slice %252 {offsets = [0, 256], sizes = [16, 256], strides = [1, 1]} : vector<16x512xf32> to vector<16x256xf32>
    %cst_103 = arith.constant dense<0.000000e+00> : vector<16xf32>
    %261 = vector.multi_reduction <add>, %260, %cst_103 [1] : vector<16x256xf32> to vector<16xf32>
    %262 = vector.shape_cast %261 : vector<16xf32> to vector<16x1xf32>
    %cst_104 = arith.constant 2.560000e+02 : f32
    %263 = vector.broadcast %cst_104 : f32 to vector<16x1xf32>
    %264 = arith.divf %262, %263 : vector<16x1xf32>
    %cst_105 = arith.constant dense<0xFF800000> : vector<16xf32>
    %265 = vector.multi_reduction <maximumf>, %260, %cst_105 [1] : vector<16x256xf32> to vector<16xf32>
    %266 = vector.shape_cast %265 : vector<16xf32> to vector<16x1xf32>
    %267 = tpu.concatenate %257, %264, %259, %266 in 1 : vector<16x1xf32>, vector<16x1xf32>, vector<16x1xf32>, vector<16x1xf32> -> vector<16x4xf32>
    %c0_106 = arith.constant 0 : index
    %c1_107 = arith.constant 1 : index
    %268 = vector.load %arg6[%c0_106, %c1_107] : memref<16x10xf32, #tpu.memory_space<vmem>>, vector<16x1xf32>
    %269 = vector.broadcast %268 : vector<16x1xf32> to vector<16x4xf32>
    %270 = arith.mulf %267, %269 : vector<16x4xf32>
    %c0_108 = arith.constant 0 : index
    %c2_109 = arith.constant 2 : index
    %271 = vector.load %arg6[%c0_108, %c2_109] : memref<16x10xf32, #tpu.memory_space<vmem>>, vector<16x1xf32>
    %272 = vector.broadcast %271 : vector<16x1xf32> to vector<16x4xf32>
    %273 = arith.addf %270, %272 : vector<16x4xf32>
    %c0_110 = arith.constant 0 : index
    %c3_111 = arith.constant 3 : index
    %274 = vector.load %arg6[%c0_110, %c3_111] : memref<16x10xf32, #tpu.memory_space<vmem>>, vector<16x1xf32>
    %275 = vector.broadcast %274 : vector<16x1xf32> to vector<16x4xf32>
    %276 = arith.mulf %275, %273 : vector<16x4xf32>
    %cst_112 = arith.constant dense<0.000000e+00> : vector<4xf32>
    %277 = vector.multi_reduction <add>, %276, %cst_112 [0] : vector<16x4xf32> to vector<4xf32>
    %278 = vector.shape_cast %277 : vector<4xf32> to vector<1x4xf32>
    %c0_113 = arith.constant 0 : index
    %c4 = arith.constant 4 : index
    %279 = vector.load %arg6[%c0_113, %c4] : memref<16x10xf32, #tpu.memory_space<vmem>>, vector<1x1xf32>
    %280 = vector.broadcast %279 : vector<1x1xf32> to vector<1x4xf32>
    %281 = arith.addf %278, %280 : vector<1x4xf32>
    %cst_114 = arith.constant 0.000000e+00 : f32
    %282 = vector.broadcast %cst_114 : f32 to vector<1x4xf32>
    %283 = arith.maximumf %281, %282 : vector<1x4xf32>
    %c0_115 = arith.constant 0 : index
    %c5_116 = arith.constant 5 : index
    %284 = vector.load %arg6[%c0_115, %c5_116] : memref<16x10xf32, #tpu.memory_space<vmem>>, vector<1x1xf32>
    %285 = vector.broadcast %284 : vector<1x1xf32> to vector<1x4xf32>
    %286 = arith.mulf %283, %285 : vector<1x4xf32>
    %c0_117 = arith.constant 0 : index
    %c6_118 = arith.constant 6 : index
    %287 = vector.load %arg6[%c0_117, %c6_118] : memref<16x10xf32, #tpu.memory_space<vmem>>, vector<1x1xf32>
    %288 = vector.broadcast %287 : vector<1x1xf32> to vector<1x4xf32>
    %289 = arith.addf %286, %288 : vector<1x4xf32>
    %c0_119 = arith.constant 0 : index
    %c7_120 = arith.constant 7 : index
    %290 = vector.load %arg6[%c0_119, %c7_120] : memref<16x10xf32, #tpu.memory_space<vmem>>, vector<16x1xf32>
    %c0_121 = arith.constant 0 : index
    %c8_122 = arith.constant 8 : index
    %291 = vector.load %arg6[%c0_121, %c8_122] : memref<16x10xf32, #tpu.memory_space<vmem>>, vector<16x1xf32>
    %292 = vector.broadcast %290 : vector<16x1xf32> to vector<16x4xf32>
    %293 = vector.broadcast %289 : vector<1x4xf32> to vector<16x4xf32>
    %294 = arith.mulf %292, %293 : vector<16x4xf32>
    %295 = vector.broadcast %291 : vector<16x1xf32> to vector<16x4xf32>
    %296 = arith.addf %295, %294 : vector<16x4xf32>
    %297 = vector.extract_strided_slice %296 {offsets = [0, 0], sizes = [16, 2], strides = [1, 1]} : vector<16x4xf32> to vector<16x2xf32>
    %298 = vector.extract_strided_slice %296 {offsets = [0, 2], sizes = [16, 2], strides = [1, 1]} : vector<16x4xf32> to vector<16x2xf32>
    %299 = arith.addf %297, %298 : vector<16x2xf32>
    %300 = arith.negf %299 : vector<16x2xf32>
    %301 = math.exp %300 : vector<16x2xf32>
    %cst_123 = arith.constant 1.000000e+00 : f32
    %302 = vector.broadcast %cst_123 : f32 to vector<16x2xf32>
    %303 = arith.addf %302, %301 : vector<16x2xf32>
    %304 = arith.divf %302, %303 : vector<16x2xf32>
    %c0_124 = arith.constant 0 : index
    %c9_125 = arith.constant 9 : index
    %305 = vector.load %arg6[%c0_124, %c9_125] : memref<16x10xf32, #tpu.memory_space<vmem>>, vector<4x1xf32>
    %306 = vector.extract_strided_slice %305 {offsets = [0, 0], sizes = [1, 1], strides = [1, 1]} : vector<4x1xf32> to vector<1x1xf32>
    %307 = vector.extract_strided_slice %305 {offsets = [2, 0], sizes = [1, 1], strides = [1, 1]} : vector<4x1xf32> to vector<1x1xf32>
    %308 = arith.mulf %306, %307 : vector<1x1xf32>
    %309 = vector.extract_strided_slice %305 {offsets = [1, 0], sizes = [1, 1], strides = [1, 1]} : vector<4x1xf32> to vector<1x1xf32>
    %310 = vector.extract_strided_slice %305 {offsets = [3, 0], sizes = [1, 1], strides = [1, 1]} : vector<4x1xf32> to vector<1x1xf32>
    %311 = arith.mulf %309, %310 : vector<1x1xf32>
    %cst_126 = arith.constant dense<0.000000e+00> : vector<2xf32>
    %312 = vector.multi_reduction <add>, %304, %cst_126 [0] : vector<16x2xf32> to vector<2xf32>
    %313 = vector.shape_cast %312 : vector<2xf32> to vector<1x2xf32>
    %cst_127 = arith.constant 1.600000e+01 : f32
    %314 = vector.broadcast %cst_127 : f32 to vector<1x2xf32>
    %315 = arith.divf %313, %314 : vector<1x2xf32>
    %316 = vector.broadcast %308 : vector<1x1xf32> to vector<1x2xf32>
    %317 = arith.mulf %315, %316 : vector<1x2xf32>
    %cst_128 = arith.constant dense<0xFF800000> : vector<2xf32>
    %318 = vector.multi_reduction <maximumf>, %304, %cst_128 [0] : vector<16x2xf32> to vector<2xf32>
    %319 = vector.shape_cast %318 : vector<2xf32> to vector<1x2xf32>
    %320 = vector.broadcast %311 : vector<1x1xf32> to vector<1x2xf32>
    %321 = arith.mulf %319, %320 : vector<1x2xf32>
    %322 = arith.addf %317, %321 : vector<1x2xf32>
    %323 = arith.negf %322 : vector<1x2xf32>
    %324 = math.exp %323 : vector<1x2xf32>
    %cst_129 = arith.constant 1.000000e+00 : f32
    %325 = vector.broadcast %cst_129 : f32 to vector<1x2xf32>
    %326 = arith.addf %325, %324 : vector<1x2xf32>
    %327 = arith.divf %325, %326 : vector<1x2xf32>
    %328 = vector.extract_strided_slice %327 {offsets = [0, 0], sizes = [1, 1], strides = [1, 1]} : vector<1x2xf32> to vector<1x1xf32>
    %c9_130 = arith.constant 9 : index
    %c0_131 = arith.constant 0 : index
    %329 = vector.load %arg2[%c9_130, %c0_131] : memref<11x512xf32, #tpu.memory_space<vmem>>, vector<1x512xf32>
    %330 = vector.broadcast %328 : vector<1x1xf32> to vector<1x512xf32>
    %331 = arith.mulf %330, %329 : vector<1x512xf32>
    %332 = vector.extract_strided_slice %327 {offsets = [0, 1], sizes = [1, 1], strides = [1, 1]} : vector<1x2xf32> to vector<1x1xf32>
    %c10_132 = arith.constant 10 : index
    %c0_133 = arith.constant 0 : index
    %333 = vector.load %arg2[%c10_132, %c0_133] : memref<11x512xf32, #tpu.memory_space<vmem>>, vector<1x512xf32>
    %334 = vector.broadcast %332 : vector<1x1xf32> to vector<1x512xf32>
    %335 = arith.mulf %334, %333 : vector<1x512xf32>
    %336 = arith.addf %331, %335 : vector<1x512xf32>
    %337 = vector.broadcast %336 : vector<1x512xf32> to vector<16x512xf32>
    %338 = arith.mulf %252, %337 : vector<16x512xf32>
    %c0_134 = arith.constant 0 : index
    %c0_135 = arith.constant 0 : index
    %c0_136 = arith.constant 0 : index
    %339 = vector.load %arg1[%c0_134, %c0_135, %c0_136] : memref<1x16x512xf32, #tpu.memory_space<vmem>>, vector<1x16x512xf32>
    %340 = vector.shape_cast %339 : vector<1x16x512xf32> to vector<16x512xf32>
    %341 = arith.addf %338, %340 : vector<16x512xf32>
    %c0_137 = arith.constant 0 : index
    %c0_138 = arith.constant 0 : index
    %c0_139 = arith.constant 0 : index
    %342 = vector.load %arg7[%c0_137, %c0_138, %c0_139] : memref<1x16x512xf32, #tpu.memory_space<vmem>>, vector<1x16x512xf32>
    %343 = vector.shape_cast %342 : vector<1x16x512xf32> to vector<16x512xf32>
    %344 = vector.shape_cast %341 : vector<16x512xf32> to vector<1x16x512xf32>
    tpu.vector_store %arg7[%c0_137, %c0_138, %c0_139], %344 {strides = array<i32>} : memref<1x16x512xf32, #tpu.memory_space<vmem>>, vector<1x16x512xf32>,
    return
  }
  func.func @transform_0(%arg0: i32) -> (i32, i32, i32) {
    %c0_i32 = arith.constant 0 : i32
    %c0_i32_0 = arith.constant 0 : i32
    %c0_i32_1 = arith.constant 0 : i32
    return %arg0, %c0_i32, %c0_i32_0 : i32, i32, i32
  }
  func.func @transform_1(%arg0: i32) -> (i32, i32) {
    %c0_i32 = arith.constant 0 : i32
    %c0_i32_0 = arith.constant 0 : i32
    %c0_i32_1 = arith.constant 0 : i32
    return %c0_i32, %c0_i32_0 : i32, i32
  }
  func.func @transform_2(%arg0: i32) -> (i32, i32) {
    %c0_i32 = arith.constant 0 : i32
    %c0_i32_0 = arith.constant 0 : i32
    %c0_i32_1 = arith.constant 0 : i32
    return %c0_i32, %c0_i32_0 : i32, i32
  }
  func.func @transform_3(%arg0: i32) -> (i32, i32) {
    %c0_i32 = arith.constant 0 : i32
    %c0_i32_0 = arith.constant 0 : i32
    %c0_i32_1 = arith.constant 0 : i32
    return %c0_i32, %c0_i32_0 : i32, i32
  }
  func.func @transform_4(%arg0: i32) -> (i32, i32) {
    %c0_i32 = arith.constant 0 : i32
    %c0_i32_0 = arith.constant 0 : i32
    %c0_i32_1 = arith.constant 0 : i32
    return %c0_i32, %c0_i32_0 : i32, i32
  }
  func.func @transform_5(%arg0: i32) -> (i32, i32) {
    %c0_i32 = arith.constant 0 : i32
    %c0_i32_0 = arith.constant 0 : i32
    %c0_i32_1 = arith.constant 0 : i32
    return %c0_i32, %c0_i32_0 : i32, i32
  }
  func.func @transform_6(%arg0: i32) -> (i32, i32, i32) {
    %c0_i32 = arith.constant 0 : i32
    %c0_i32_0 = arith.constant 0 : i32
    %c0_i32_1 = arith.constant 0 : i32
    return %arg0, %c0_i32, %c0_i32_0 : i32, i32, i32
  }
}

</mosaic_0001>

<bundles_post_ra>
// kernel: _lambda_.1
= control target key start
LH: loop header
LB: loop body
LE: loop exit
PB: predicated region body
PF: predicated region fallthrough
CT: control target
= control target key end

     0   :  { %v5771_v3 = vmov 9   ;;  %vm93_vm0 = vcmask 130048   ;;  %v5786_v21 = vmov 0   ;;  %v5788_v22 = vmov 4   ;;  %s2791_s7 = smov 16   ;;  %s2792_s8 = smov 17   ;;  %s5764_s0 = inlined_call_operand.vmem [shape: f32[1,16,512], index: 0, kind: input, shape index: {}]   ;;  %s5765_s2 = inlined_call_operand.vmem [shape: bf16[48,16], index: 2, kind: input, shape index: {}]   ;;  %s5766_s4 = inlined_call_operand.vmem [shape: f32[48,11], index: 4, kind: input, shape index: {}]   ;;  %s5767_s1 = inlined_call_operand.vmem [shape: f32[11,512], index: 1, kind: input, shape index: {}]   ;;  %s5768_s5 = inlined_call_operand.vmem [shape: f32[16,10], index: 5, kind: input, shape index: {}]   ;;  %s5769_s3 = inlined_call_operand.vmem [shape: bf16[16,48], index: 3, kind: input, shape index: {}]   ;;  %s5770_s6 = inlined_call_operand.vmem [shape: f32[1,16,512], index: 6, kind: output, shape index: {}]  }
   0x1   :  { %v24_v0 = vld [vmem:[%s5764_s0] sm:$0xff]  ;;  %v25_v2 = vld [vmem:[%s5764_s0 + $0x8] sm:$0xff]  ;;  %2686 = vset.pattern.permute.xlu0 %v5771_v3  ;;  %2687 = vset.pattern.permute.xlu1 %v5771_v3  ;;  %v26_v6 = vld [vmem:[%s5764_s0 + $0x10] sm:$0xff]  ;;  %v5784_v23 = vmov 1   ;;  %v5782_v24 = vmov 2   ;;  %v5778_v26 = vmov 3  }
   0x2   :  { %v28_v1 = vld [vmem:[%s5764_s0 + $0x20] sm:$0xff]  ;;  %v29_v5 = vld [vmem:[%s5764_s0 + $0x28] sm:$0xff]  ;;  %v30_v7 = vld [vmem:[%s5764_s0 + $0x30] sm:$0xff]  ;;  %2688 = vset.pattern.permute.xlu2 %v5771_v3  ;;  %v5776_v27 = vmov 5   ;;  %s2793_s9 = smov 127   ;;  %s2794_s10 = smov 1  }
   0x3   :  { %v32_v4 = vpack.c.bf16 %v28_v1, %v24_v0  ;;  %v33_v8 = vpack.c.bf16 %v29_v5, %v25_v2  ;;  %v34_v9 = vpack.c.bf16 %v30_v7, %v26_v6  ;;  %v27_v10 = vld [vmem:[%s5764_s0 + $0x18] sm:$0xff]  ;;  %v2648_v12 = vld [vmem:[%s5765_s2] sm:$0xff]  ;;  %v2878_v15 = vld [vmem:[%s5766_s4 + $0x10] sm:$0xff]  ;;  %s2795_s11 = smov 113   ;;  %s2798_s12 = smov 112   ;;  %vm2167_vm9 = vcmask 392192  }
   0x4   :  { %v31_v11 = vld [vmem:[%s5764_s0 + $0x38] sm:$0xff]  ;;  %v2873_v14 = vld [vmem:[%s5766_s4] sm:$0xff]  ;;  %60 = vperm.xlu1 %2687, %v2878_v15   ;;  %v2892_v17 = vld [vmem:[%s5766_s4 + $0x8] sm:$0xff]  ;;  %s2799_s13 = smov 111   ;;  %vm2262_vm11 = vcmask 7168   ;;  %vm2265_vm12 = vcmask 15360  }
   0x5   :  { %110 = vmatpush.bf16.msra.mxu0 %v32_v4  ;;  %v35_v13 = vpack.c.bf16 %v31_v11, %v27_v10  ;;  %134 = vmatpush.bf16.msra.mxu1 %v33_v8  ;;  %v46_v16 = vld [vmem:[%s5766_s4 + $0x20] sm:$0xff]  ;;  %v2897_v18 = vld [vmem:[%s5766_s4 + $0x18] sm:$0xff]  ;;  %v47_v19 = vld [vmem:[%s5766_s4 + $0x28] sm:$0xff]  ;;  %vm2268_vm13 = vcmask 23552   ;;  %vm2301_vm14 = vcmask 31744  }
   0x6   :  { %158 = vmatpush.bf16.msra.mxu2 %v34_v9  ;;  %50 = vperm.xlu0 %2686, %v2873_v14   ;;  %5954 = vst [vmem:[#allocation4_spill] sm:$0xff] %v2897_v18  ;;  %v2649_v20 = vld [vmem:[%s5765_s2 + $0x8] sm:$0xff]  ;;  %v2650_v25 = vld [vmem:[%s5765_s2 + $0x10] sm:$0xff]  ;;  %s2790_s2 = smov 15  }
   0x7   :  { %182 = vmatpush.bf16.msra.mxu3 %v35_v13  ;;  %70 = vperm.xlu2 %2688, %v46_v16   ;;  %v5774_v13 = vmov 6  }
   0x8   :  { %2554 = vmatmul.msk.bf16.vlgmr.msra.gmra.mxu0 %vm93_vm0, %v2648_v12  ;;  %2557 = vmatmul.msk.bf16.vlgmr.msra.gmra.mxu1 %vm93_vm0, %v2648_v12 }
   0x9   :  { %2560 = vmatmul.msk.bf16.vlgmr.msra.gmra.mxu2 %vm93_vm0, %v2648_v12 }
   0xa   :  { %2563 = vmatmul.msk.bf16.vlgmr.msra.gmra.mxu3 %vm93_vm0, %v2648_v12 }
   0xc   :  { %65 = vperm.xlu1 %2687, %v2897_v18  }
   0xe   :  { %55 = vperm.xlu0 %2686, %v2892_v17  }
   0xf   :  { %75 = vperm.xlu2 %2688, %v47_v19  }
  0x14   :  { %2689 = vset.pattern.permute.xlu1 %v5788_v22 }
  0x15   :  { %288 = vperm.xlu1 %2689, %v2892_v17  }
  0x16   :  { %2691 = vset.pattern.permute.xlu0 %v5786_v21 }
  0x17   :  { %2690 = vset.pattern.permute.xlu2 %v5786_v21  ;;  %349 = vperm.xlu0 %2691, %v2892_v17  }
  0x18   :  { %2555 = vmatmul.msk.bf16.gmra.mxu0 %vm93_vm0, %v2649_v20  ;;  %2558 = vmatmul.msk.bf16.gmra.mxu1 %vm93_vm0, %v2649_v20 }
  0x19   :  { %2561 = vmatmul.msk.bf16.gmra.mxu2 %vm93_vm0, %v2649_v20  ;;  %345 = vperm.xlu2 %2690, %v2873_v14  }
  0x1a   :  { %2564 = vmatmul.msk.bf16.gmra.mxu3 %vm93_vm0, %v2649_v20 }
  0x1d   :  { %2692 = vset.pattern.permute.xlu1 %v5784_v23 }
  0x1e   :  { %413 = vperm.xlu1 %2692, %v2873_v14  }
  0x1f   :  { %2695 = vset.pattern.permute.xlu0 %v5782_v24 }
  0x20   :  { %485 = vperm.xlu0 %2695, %v2892_v17  }
  0x21   :  { %2693 = vset.pattern.permute.xlu2 %v5784_v23 }
  0x22   :  { %417 = vperm.xlu2 %2693, %v2892_v17  }
  0x26   :  { %2696 = vset.pattern.permute.xlu1 %v5778_v26 }
  0x27   :  { %549 = vperm.xlu1 %2696, %v2873_v14  }
  0x28   :  { %2556 = vmatmul.msk.bf16.gmra.mxu0 %vm93_vm0, %v2650_v25  ;;  %2559 = vmatmul.msk.bf16.gmra.mxu1 %vm93_vm0, %v2650_v25 }
  0x29   :  { %2562 = vmatmul.msk.bf16.gmra.mxu2 %vm93_vm0, %v2650_v25  ;;  %2699 = vset.pattern.permute.xlu0 %v5776_v27 }
  0x2a   :  { %2565 = vmatmul.msk.bf16.gmra.mxu3 %vm93_vm0, %v2650_v25  ;;  %2694 = vset.pattern.permute.xlu2 %v5782_v24  ;;  %v5772_v25 = vmov 7  }
  0x2b   :  { %481 = vperm.xlu2 %2694, %v2873_v14   ;;  %621 = vperm.xlu0 %2699, %v2892_v17  }
  0x2f   :  { %2700 = vset.pattern.permute.xlu1 %v5774_v13 }
  0x33   :  { %2697 = vset.pattern.permute.xlu2 %v5778_v26  ;;  %2703 = vset.pattern.permute.xlu0 %v5772_v25 }
  0x34   :  { %553 = vperm.xlu2 %2697, %v2892_v17  }
  0x3c   :  { %2698 = vset.pattern.permute.xlu2 %v5776_v27 }
  0x3d   :  { %617 = vperm.xlu2 %2698, %v2873_v14  }
  0x45   :  { %2701 = vset.pattern.permute.xlu2 %v5774_v13 }
  0x61   :  { %v2964_v44 = vpop.permute.xlu2 %70 }
  0x62   :  { %5955 = vst [vmem:[#allocation5_spill] sm:$0xff] %v2964_v44 }
  0x69   :  { %v2974_v46 = vpop.permute.xlu2 %75 }
  0x6a   :  { %5956 = vst [vmem:[#allocation6_spill] sm:$0xff] %v2974_v46 }
  0x73   :  { %v2988_v50 = vpop.permute.xlu2 %345 }
  0x76   :  { %v3016_v59 = vpop.permute.xlu1 %60 }
  0x78   :  { %v51_v28 = vpop.permute.xlu0 %50 }
  0x7c   :  { %v2998_v56 = vpop.permute.xlu2 %417 }
  0x7d   :  { %5958 = vst [vmem:[#allocation8_spill] sm:$0xff] %v2998_v56 }
  0x7e   :  { %v3026_v4 = vpop.permute.xlu1 %65 }
  0x80   :  { %v56_v48 = vpop.permute.xlu0 %55 }
  0x85   :  { %v112_v29 = vpop.f32.mrf.mxu0  ;;  %v136_v31 = vpop.f32.mrf.mxu1 }
  0x86   :  { %v113_v30 = vadd.f32 %v112_v29, %v51_v28  ;;  %v137_v34 = vadd.f32 %v136_v31, %v51_v28  ;;  %v3008_v58 = vpop.permute.xlu2 %481 }
  0x87   :  { %v3042_v9 = vpop.permute.xlu1 %288 }
  0x88   :  { %v199_v32 = vmax.f32 %v113_v30, 0.0  ;;  %v200_v35 = vmax.f32 %v137_v34, 0.0  ;;  %5964 = vst [vmem:[#allocation14_spill] sm:$0xff] %v3042_v9 }
  0x89   :  { %v3040_v8 = vpop.permute.xlu0 %349 }
  0x8a   :  { %v2940_v33 = vmin.f32 %v199_v32, 6.0  ;;  %v2948_v37 = vmin.f32 %v200_v35, 6.0  ;;  %5963 = vst [vmem:[#allocation13_spill] sm:$0xff] %v3040_v8  ;;  %v3317_v8 = vld [vmem:[%s5767_s1 + $0x5] ss:$8 sm:$0xf] }
  0x8c   :  { %436 = vrot.lane.b32.xlu0 %v2940_v33, %s2790_s2  ;;  %368 = vrot.lane.b32.xlu1 %v2940_v33, %s2791_s7  ;;  %v160_v40 = vpop.f32.mrf.mxu2 }
  0x8d   :  { %299 = vrot.lane.b32.xlu2 %v2940_v33, %s2792_s8  ;;  %v184_v36 = vpop.f32.mrf.mxu3  ;;  %v161_v41 = vadd.f32 %v160_v40, %v51_v28  ;;  %v114_v47 = vpop.f32.mrf.mxu0 }
  0x8e   :  { %v185_v38 = vadd.f32 %v184_v36, %v51_v28  ;;  %v115_v49 = vadd.f32 %v114_v47, %v56_v48  ;;  %v138_v52 = vpop.f32.mrf.mxu1  ;;  %v3018_v0 = vpop.permute.xlu2 %553 }
  0x8f   :  { %v201_v43 = vmax.f32 %v161_v41, 0.0  ;;  %v139_v53 = vadd.f32 %v138_v52, %v56_v48  ;;  %5960 = vst [vmem:[#allocation10_spill] sm:$0xff] %v3018_v0 }
  0x90   :  { %v202_v39 = vmax.f32 %v185_v38, 0.0  ;;  %v203_v51 = vmax.f32 %v115_v49, 0.0  ;;  %v3052_v11 = vpop.permute.xlu1 %413 }
  0x91   :  { %v2966_v45 = vmin.f32 %v201_v43, 6.0  ;;  %v204_v55 = vmax.f32 %v139_v53, 0.0 }
  0x92   :  { %v2956_v42 = vmin.f32 %v202_v39, 6.0  ;;  %v2990_v54 = vmin.f32 %v203_v51, 6.0  ;;  %v3054_v12 = vpop.permute.xlu0 %485 }
  0x93   :  { %v3000_v57 = vmin.f32 %v204_v55, 6.0  ;;  %5965 = vst [vmem:[#allocation15_spill] sm:$0xff] %v3054_v12  ;;  %v5780_v55 = vmov 8  }
  0x94   :  { %572 = vrot.lane.b32.xlu0 %v2940_v33, %s2793_s9  ;;  %372 = vrot.lane.b32.xlu1 %v2948_v37, %s2791_s7  ;;  %5957 = vst [vmem:[#allocation7_spill] sm:$0xff] %v2990_v54  ;;  %v162_v61 = vpop.f32.mrf.mxu2 }
  0x95   :  { %303 = vrot.lane.b32.xlu2 %v2948_v37, %s2792_s8  ;;  %5959 = vst [vmem:[#allocation9_spill] sm:$0xff] %v3000_v57  ;;  %v186_v60 = vpop.f32.mrf.mxu3  ;;  %v163_v63 = vadd.f32 %v162_v61, %v56_v48  ;;  %v117_v51 = vpop.f32.mrf.mxu0 }
  0x96   :  { %v187_v62 = vadd.f32 %v186_v60, %v56_v48  ;;  %v118_v46 = vadd.f32 %v117_v51, %v3016_v59 }
  0x97   :  { %v205_v2 = vmax.f32 %v163_v63, 0.0  ;;  %v3038_v7 = vpop.permute.xlu2 %617 }
  0x98   :  { %v206_v1 = vmax.f32 %v187_v62, 0.0 }
  0x99   :  { %v3030_v6 = vmin.f32 %v205_v2, 6.0  ;;  %v3070_v19 = vpop.permute.xlu1 %549 }
  0x9a   :  { %v3028_v5 = vmin.f32 %v206_v1, 6.0 }
  0x9b   :  { %5962 = vst [vmem:[#allocation12_spill] sm:$0xff] %v3030_v6 }
  0x9c   :  { %311 = vrot.lane.b32.xlu0 %v2956_v42, %s2792_s8  ;;  %504 = vrot.lane.b32.xlu1 %v2940_v33, %s2794_s10  ;;  %5961 = vst [vmem:[#allocation11_spill] sm:$0xff] %v3028_v5 }
  0x9d   :  { %440 = vrot.lane.b32.xlu2 %v2948_v37, %s2790_s2  ;;  %v3072_v20 = vpop.permute.xlu0 %621  ;;  %v119_v61 = vpop.f32.mrf.mxu0 }
  0x9e   :  { %5966 = vst [vmem:[#allocation16_spill] sm:$0xff] %v3072_v20  ;;  %v120_v62 = vadd.f32 %v119_v61, %v3026_v4  ;;  %v165_v61 = vpop.f32.mrf.mxu2 }
  0x9f   :  { %v166_v13 = vadd.f32 %v165_v61, %v3016_v59 }
  0xa0   :  { %v211_v2 = vmax.f32 %v120_v62, 0.0 }
  0xa2   :  { %v3164_v27 = vmin.f32 %v211_v2, 6.0 }
  0xa4   :  { %376 = vrot.lane.b32.xlu0 %v2966_v45, %s2791_s7  ;;  %508 = vrot.lane.b32.xlu1 %v2948_v37, %s2794_s10 }
  0xa5   :  { %576 = vrot.lane.b32.xlu2 %v2948_v37, %s2793_s9 }
  0xac   :  { %448 = vrot.lane.b32.xlu0 %v2956_v42, %s2790_s2  ;;  %307 = vrot.lane.b32.xlu1 %v2966_v45, %s2792_s8 }
  0xad   :  { %380 = vrot.lane.b32.xlu2 %v2956_v42, %s2791_s7 }
  0xb4   :  { %512 = vrot.lane.b32.xlu0 %v2966_v45, %s2794_s10  ;;  %444 = vrot.lane.b32.xlu1 %v2966_v45, %s2790_s2 }
  0xb5   :  { %516 = vrot.lane.b32.xlu2 %v2956_v42, %s2794_s10 }
  0xbc   :  { %584 = vrot.lane.b32.xlu0 %v2956_v42, %s2793_s9  ;;  %580 = vrot.lane.b32.xlu1 %v2966_v45, %s2793_s9 }
  0xbd   :  { %370 = vrot.lane.b32.xlu2 %v2990_v54, %s2791_s7 }
  0xc4   :  { %305 = vrot.lane.b32.xlu0 %v3000_v57, %s2792_s8  ;;  %301 = vrot.lane.b32.xlu1 %v2990_v54, %s2792_s8 }
  0xc5   :  { %374 = vrot.lane.b32.xlu2 %v3000_v57, %s2791_s7 }
  0xcc   :  { %442 = vrot.lane.b32.xlu0 %v3000_v57, %s2790_s2  ;;  %438 = vrot.lane.b32.xlu1 %v2990_v54, %s2790_s2 }
  0xcd   :  { %506 = vrot.lane.b32.xlu2 %v2990_v54, %s2794_s10 }
  0xd4   :  { %578 = vrot.lane.b32.xlu0 %v3000_v57, %s2793_s9  ;;  %574 = vrot.lane.b32.xlu1 %v2990_v54, %s2793_s9 }
  0xd5   :  { %510 = vrot.lane.b32.xlu2 %v3000_v57, %s2794_s10 }
  0xdc   :  { %382 = vrot.lane.b32.xlu0 %v3028_v5, %s2791_s7  ;;  %313 = vrot.lane.b32.xlu1 %v3028_v5, %s2792_s8 }
  0xdd   :  { %309 = vrot.lane.b32.xlu2 %v3030_v6, %s2792_s8 }
  0xe4   :  { %518 = vrot.lane.b32.xlu0 %v3028_v5, %s2794_s10  ;;  %378 = vrot.lane.b32.xlu1 %v3030_v6, %s2791_s7 }
  0xe5   :  { %446 = vrot.lane.b32.xlu2 %v3030_v6, %s2790_s2 }
  0xe7   :  { %v3050_v10 = vpop.permute.xlu2 %299 }
  0xec   :  { %648 = vrot.lane.b32.xlu0 %v2966_v45, %s2795_s11  ;;  %450 = vrot.lane.b32.xlu1 %v3028_v5, %s2790_s2 }
  0xed   :  { %582 = vrot.lane.b32.xlu2 %v3030_v6, %s2793_s9 }
  0xef   :  { %v3064_v16 = vpop.permute.xlu2 %303 }
  0xf4   :  { %654 = vrot.lane.b32.xlu0 %v3028_v5, %s2795_s11  ;;  %514 = vrot.lane.b32.xlu1 %v3030_v6, %s2794_s10 }
  0xf5   :  { %642 = vrot.lane.b32.xlu2 %v2990_v54, %s2795_s11 }
  0xf7   :  { %v3077_v28 = vpop.permute.xlu2 %440 }
  0xfc   :  { %708 = vrot.lane.b32.xlu0 %v2940_v33, %s2798_s12  ;;  %586 = vrot.lane.b32.xlu1 %v3028_v5, %s2793_s9 }
  0xfd   :  { %646 = vrot.lane.b32.xlu2 %v3000_v57, %s2795_s11 }
  0xfe   :  { %v3085_v29 = vpop.permute.xlu0 %436  ;;  %v3087_v30 = vpop.permute.xlu1 %368 }
  0xff   :  { %v3089_v31 = vpop.permute.xlu2 %576 }
 0x104   :  { %714 = vrot.lane.b32.xlu0 %v3000_v57, %s2798_s12  ;;  %640 = vrot.lane.b32.xlu1 %v2940_v33, %s2795_s11 }
 0x105   :  { %652 = vrot.lane.b32.xlu2 %v2956_v42, %s2795_s11 }
 0x106   :  { %v3097_v32 = vpop.permute.xlu0 %572  ;;  %v3099_v34 = vpop.permute.xlu1 %372 }
 0x107   :  { %v3101_v35 = vpop.permute.xlu2 %380 }
 0x10c   :  { %720 = vrot.lane.b32.xlu0 %v2956_v42, %s2798_s12  ;;  %644 = vrot.lane.b32.xlu1 %v2948_v37, %s2795_s11 }
 0x10d   :  { %689 = vperm.xlu2 %2701, %v2892_v17  }
 0x10e   :  { %v3108_v36 = vpop.permute.xlu0 %311  ;;  %v3110_v38 = vpop.permute.xlu1 %504 }
 0x10f   :  { %v3112_v39 = vpop.permute.xlu2 %516 }
 0x114   :  { %757 = vperm.xlu0 %2703, %v2892_v17   ;;  %650 = vrot.lane.b32.xlu1 %v3030_v6, %s2795_s11 }
 0x115   :  { %712 = vrot.lane.b32.xlu2 %v2948_v37, %s2798_s12 }
 0x116   :  { %v3119_v40 = vpop.permute.xlu0 %376  ;;  %v3121_v41 = vpop.permute.xlu1 %508  ;;  %2702 = vset.pattern.permute.xlu2 %v5772_v25 }
 0x117   :  { %v3124_v43 = vpop.permute.xlu2 %370  ;;  %v189_v25 = vpop.f32.mrf.mxu3 }
 0x118   :  { %5967 = vst [vmem:[#allocation17_spill] sm:$0xff] %v3124_v43 }
 0x11c   :  { %2704 = vset.pattern.permute.xlu0 %v5788_v22  ;;  %685 = vperm.xlu1 %2700, %v2873_v14  }
 0x11d   :  { %718 = vrot.lane.b32.xlu2 %v3030_v6, %s2798_s12  ;;  %283 = vperm.xlu0 %2704, %v2873_v14  }
 0x11e   :  { %v3131_v47 = vpop.permute.xlu0 %448  ;;  %v3133_v48 = vpop.permute.xlu1 %307 }
 0x11f   :  { %v3135_v49 = vpop.permute.xlu2 %374  ;;  %v191_v23 = vpop.f32.mrf.mxu3 }
 0x120   :  { %5968 = vst [vmem:[#allocation18_spill] sm:$0xff] %v3135_v49  ;;  %v192_v2 = vadd.f32 %v191_v23, %v3026_v4  ;;  %v6002_v49 = vperm.slane %v3317_v8, 0 }
 0x124   :  { %710 = vrot.lane.b32.xlu1 %v2990_v54, %s2798_s12 }
 0x125   :  { %753 = vperm.xlu2 %2702, %v2873_v14   ;;  %784 = vrot.lane.b32.xlu0 %v2966_v45, %s2799_s13 }
 0x126   :  { %v3142_v52 = vpop.permute.xlu0 %512  ;;  %v3144_v53 = vpop.permute.xlu1 %444  ;;  %2705 = vset.pattern.permute.xlu1 %v5780_v55 }
 0x127   :  { %v3147_v60 = vpop.permute.xlu2 %506 }
 0x128   :  { %5969 = vst [vmem:[#allocation19_spill] sm:$0xff] %v3147_v60 }
 0x12c   :  { %716 = vrot.lane.b32.xlu1 %v2966_v45, %s2798_s12 }
 0x12d   :  { %778 = vrot.lane.b32.xlu2 %v2990_v54, %s2799_s13  ;;  %790 = vrot.lane.b32.xlu0 %v3028_v5, %s2799_s13 }
 0x12e   :  { %v3156_v63 = vpop.permute.xlu0 %584  ;;  %v3158_v1 = vpop.permute.xlu1 %580  ;;  %2706 = vset.pattern.permute.xlu2 %v5780_v55  ;;  %v209_v55 = vmax.f32 %v166_v13, 0.0  ;;  %v214_v13 = vmax.f32 %v192_v2, 0.0  ;;  %v207_v2 = vmax.f32 %v118_v46, 0.0 }
 0x12f   :  { %v3161_v3 = vpop.permute.xlu2 %510 }
 0x130   :  { %5970 = vst [vmem:[#allocation20_spill] sm:$0xff] %v3161_v3  ;;  %v3178_v61 = vmin.f32 %v209_v55, 6.0  ;;  %v141_v55 = vpop.f32.mrf.mxu1  ;;  %v3194_v23 = vmin.f32 %v214_v13, 6.0  ;;  %v5981_v13 = vmov 4  }
 0x132   :  { %5974 = vst [vmem:[#allocation24_spill] sm:$0xff] %v3178_v61 }
 0x134   :  { %722 = vrot.lane.b32.xlu1 %v3028_v5, %s2798_s12  ;;  %v3207_v5 = vmin.f32 %v207_v2, 6.0  ;;  %v190_v2 = vadd.f32 %v189_v25, %v3016_v59 }
 0x135   :  { %782 = vrot.lane.b32.xlu2 %v3000_v57, %s2799_s13  ;;  %914 = vrot.lane.b32.xlu0 %v3164_v27, %s2792_s8  ;;  %v167_v57 = vpop.f32.mrf.mxu2 }
 0x136   :  { %v3172_v26 = vpop.permute.xlu0 %305  ;;  %v3174_v62 = vpop.permute.xlu1 %301 }
 0x137   :  { %5971 = vst [vmem:[#allocation21_spill] sm:$0xff] %v3172_v26  ;;  %v3176_v24 = vpop.permute.xlu2 %309 }
 0x138   :  { %5972 = vst [vmem:[#allocation22_spill] sm:$0xff] %v3174_v62 }
 0x139   :  { %5973 = vst [vmem:[#allocation23_spill] sm:$0xff] %v3176_v24 }
 0x13c   :  { %776 = vrot.lane.b32.xlu1 %v2940_v33, %s2799_s13 }
 0x13d   :  { %788 = vrot.lane.b32.xlu2 %v2956_v42, %s2799_s13  ;;  %920 = vrot.lane.b32.xlu0 %v3178_v61, %s2792_s8 }
 0x13e   :  { %v3187_v21 = vpop.permute.xlu0 %442  ;;  %v3189_v22 = vpop.permute.xlu1 %438 }
 0x13f   :  { %5975 = vst [vmem:[#allocation25_spill] sm:$0xff] %v3187_v21  ;;  %v3191_v44 = vpop.permute.xlu2 %446 }
 0x140   :  { %5976 = vst [vmem:[#allocation26_spill] sm:$0xff] %v3189_v22 }
 0x141   :  { %5977 = vst [vmem:[#allocation27_spill] sm:$0xff] %v3191_v44  ;;  %v143_v44 = vpop.f32.mrf.mxu1 }
 0x142   :  { %v144_v51 = vadd.f32 %v143_v44, %v3026_v4 }
 0x144   :  { %780 = vrot.lane.b32.xlu1 %v2948_v37, %s2799_s13 }
 0x145   :  { %825 = vperm.xlu2 %2706, %v2892_v17   ;;  %926 = vrot.lane.b32.xlu0 %v3194_v23, %s2792_s8 }
 0x146   :  { %v3201_v20 = vpop.permute.xlu0 %578  ;;  %v3203_v0 = vpop.permute.xlu1 %574 }
 0x147   :  { %5978 = vst [vmem:[#allocation28_spill] sm:$0xff] %v3201_v20  ;;  %v3205_v12 = vpop.permute.xlu2 %582 }
 0x148   :  { %5979 = vst [vmem:[#allocation29_spill] sm:$0xff] %v3203_v0 }
 0x149   :  { %5980 = vst [vmem:[#allocation30_spill] sm:$0xff] %v3205_v12  ;;  %v212_v12 = vmax.f32 %v144_v51, 0.0 }
 0x14b   :  { %v3223_v44 = vmin.f32 %v212_v12, 6.0  ;;  %v5805_v12 = vmov 10  }
 0x14c   :  { %786 = vrot.lane.b32.xlu1 %v3030_v6, %s2799_s13  ;;  %v210_v6 = vmax.f32 %v190_v2, 0.0 }
 0x14d   :  { %2708 = vset.pattern.permute.xlu2 %v5981_v13  ;;  %978 = vrot.lane.b32.xlu0 %v3207_v5, %s2791_s7 }
 0x14e   :  { %896 = vperm.xlu2 %2708, %v2878_v15   ;;  %v3216_v20 = vpop.permute.xlu0 %382  ;;  %v3218_v46 = vpop.permute.xlu1 %313  ;;  %v3237_v25 = vmin.f32 %v210_v6, 6.0  ;;  %v142_v6 = vadd.f32 %v141_v55, %v3016_v59  ;;  %v168_v59 = vadd.f32 %v167_v57, %v3026_v4  ;;  %v315_v55 = vlaneseq  ;;  %v3286_v4 = vld [vmem:[%s5767_s1] ss:$8 sm:$0xf] }
 0x14f   :  { %5982 = vst [vmem:[#allocation31_spill] sm:$0xff] %v3216_v20  ;;  %v3220_v0 = vpop.permute.xlu2 %642  ;;  %v3337_v20 = vld [vmem:[%s5767_s1 + $0x3] ss:$8 sm:$0xf] }
 0x150   :  { %5983 = vst [vmem:[#allocation32_spill] sm:$0xff] %v3218_v46 }
 0x151   :  { %5984 = vst [vmem:[#allocation33_spill] sm:$0xff] %v3220_v0  ;;  %v5988_v0 = vmov 0  }
 0x152   :  { %5989 = vst [vmem:[#allocation37_spill] sm:$0xff] %v3237_v25 }
 0x154   :  { %821 = vperm.xlu1 %2705, %v2873_v14  }
 0x155   :  { %984 = vrot.lane.b32.xlu0 %v3223_v44, %s2791_s7 }
 0x156   :  { %912 = vrot.lane.b32.xlu2 %v3207_v5, %s2792_s8  ;;  %v3230_v56 = vpop.permute.xlu0 %518  ;;  %v3232_v21 = vpop.permute.xlu1 %378 }
 0x157   :  { %5985 = vst [vmem:[#allocation34_spill] sm:$0xff] %v3230_v56  ;;  %v3234_v51 = vpop.permute.xlu2 %646  ;;  %2711 = vset.pattern.permute.xlu2 %v5988_v0 }
 0x158   :  { %5986 = vst [vmem:[#allocation35_spill] sm:$0xff] %v3232_v21  ;;  %v208_v21 = vmax.f32 %v142_v6, 0.0  ;;  %v3279_v6 = vand.u32 127, %v315_v55 }
 0x159   :  { %5987 = vst [vmem:[#allocation36_spill] sm:$0xff] %v3234_v51 }
 0x15a   :  { %v3264_v9 = vmin.f32 %v208_v21, 6.0  ;;  %v213_v21 = vmax.f32 %v168_v59, 0.0  ;;  %vm317_vm1 = vcmp.lt.s32.totalorder %v3279_v6, 17  ;;  %vm452_vm2 = vcmp.lt.s32.totalorder %v3279_v6, 15 }
 0x15b   :  { %v322_v54 = vsel %vm317_vm1, %v3050_v10, %v3064_v16  ;;  %vm588_vm3 = vcmp.lt.s32.totalorder %v3279_v6, 127  ;;  %vm384_vm4 = vcmp.lt.s32.totalorder %v3279_v6, 16  ;;  %vm520_vm5 = vcmp.lt.s32.totalorder %v3279_v6, 1 }
 0x15c   :  { %2707 = vset.pattern.permute.xlu1 %v5805_v12  ;;  %5994 = vst [vmem:[#allocation42_spill] sm:$0xff] %v3264_v9  ;;  %v3281_v57 = vmin.f32 %v213_v21, 6.0  ;;  %v3322_v21 = vld [vmem:[%s5767_s1 + $0x1] ss:$8 sm:$0xf]  ;;  %v387_v26 = vsel %vm384_vm4, %v3099_v34, %v3119_v40  ;;  %vm656_vm6 = vcmp.lt.s32.totalorder %v3279_v6, 113 }
 0x15d   :  { %990 = vrot.lane.b32.xlu0 %v3237_v25, %s2791_s7  ;;  %849 = vperm.xlu1 %2707, %v2892_v17   ;;  %v6003_v46 = vperm.slane %v3322_v21, 1  ;;  %vm724_vm7 = vcmp.lt.s32.totalorder %v3279_v6, 112  ;;  %vm792_vm8 = vcmp.lt.s32.totalorder %v3279_v6, 111 }
 0x15e   :  { %918 = vrot.lane.b32.xlu2 %v3223_v44, %s2792_s8  ;;  %v3245_v14 = vpop.permute.xlu0 %648  ;;  %v3247_v2 = vpop.permute.xlu1 %450  ;;  %5996 = vst [vmem:[#allocation44_spill] sm:$0xff] %v3281_v57 }
 0x15f   :  { %5990 = vst [vmem:[#allocation38_spill] sm:$0xff] %v3247_v2  ;;  %v3249_v51 = vpop.permute.xlu2 %652 }
 0x165   :  { %1052 = vrot.lane.b32.xlu0 %v3178_v61, %s2790_s2  ;;  %2709 = vset.pattern.permute.xlu1 %v5981_v13 }
 0x166   :  { %924 = vrot.lane.b32.xlu2 %v3237_v25, %s2792_s8  ;;  %v3257_v17 = vpop.permute.xlu0 %654  ;;  %901 = vperm.xlu1 %2709, %v2897_v18   ;;  %v3260_v12 = vpop.permute.xlu1 %514 }
 0x167   :  { %5991 = vst [vmem:[#allocation39_spill] sm:$0xff] %v3257_v17  ;;  %v3262_v56 = vpop.permute.xlu2 %689 }
 0x168   :  { %5992 = vst [vmem:[#allocation40_spill] sm:$0xff] %v3260_v12  ;;  %v5999_v12 = vmov 1  }
 0x169   :  { %5993 = vst [vmem:[#allocation41_spill] sm:$0xff] %v3262_v56 }
 0x16d   :  { %1058 = vrot.lane.b32.xlu0 %v3194_v23, %s2790_s2 }
 0x16e   :  { %959 = vperm.xlu2 %2711, %v2897_v18   ;;  %v3270_v13 = vpop.permute.xlu0 %708  ;;  %916 = vrot.lane.b32.xlu1 %v3264_v9, %s2792_s8  ;;  %v3274_v17 = vpop.permute.xlu1 %586 }
 0x16f   :  { %5995 = vst [vmem:[#allocation43_spill] sm:$0xff] %v3274_v17  ;;  %v3276_v56 = vpop.permute.xlu2 %712  ;;  %2710 = vset.pattern.permute.xlu1 %v5988_v0  ;;  %v3292_v17 = vld [vmem:[%s5767_s1 + $0x2] ss:$8 sm:$0xf] }
 0x170   :  { %v6001_v60 = vperm.slane %v3292_v17, 1 }
 0x175   :  { %1110 = vrot.lane.b32.xlu0 %v3207_v5, %s2794_s10 }
 0x176   :  { %982 = vrot.lane.b32.xlu2 %v3264_v9, %s2791_s7  ;;  %v3298_v59 = vpop.permute.xlu0 %714  ;;  %922 = vrot.lane.b32.xlu1 %v3281_v57, %s2792_s8  ;;  %v3302_v55 = vpop.permute.xlu1 %640  ;;  %v593_v9 = vsel %vm588_vm3, %v3097_v32, %v3089_v31 }
 0x177   :  { %5997 = vst [vmem:[#allocation45_spill] sm:$0xff] %v3298_v59  ;;  %v3306_v0 = vpop.permute.xlu2 %718  ;;  %2712 = vset.pattern.permute.xlu2 %v5999_v12  ;;  %v457_v12 = vsel %vm452_vm2, %v3085_v29, %v3077_v28  ;;  %v6000_v59 = vperm.slane %v3286_v4, 1 }
 0x178   :  { %5998 = vst [vmem:[#allocation46_spill] sm:$0xff] %v3306_v0  ;;  %v473_v3 = vmul.f32 %v6001_v60, %v457_v12 }
 0x179   :  { %v337_v0 = vmul.f32 %v6000_v59, %v322_v54  ;;  %v389_v54 = vsel %vm384_vm4, %v3087_v30, %v3099_v34  ;;  %v6006_v59 = vperm.slane %v3337_v20, 0 }
 0x17a   :  { %v405_v24 = vmul.f32 %v6003_v46, %v389_v54  ;;  %v3379_v18 = vmul.f32 %v3008_v58, %v473_v3  ;;  %v6004_v46 = vperm.slane %v3322_v21, 0  ;;  %v6005_v3 = vperm.slane %v3286_v4, 0 }
 0x17b   :  { %v3362_v2 = vmul.f32 %v2988_v50, %v337_v0  ;;  %v391_v0 = vsel %vm384_vm4, %v3101_v35, %v3087_v30  ;;  %v527_v30 = vsel %vm520_vm5, %v3112_v39, %v3110_v38 }
 0x17c   :  { %v404_v54 = vmul.f32 %v6004_v46, %v391_v0  ;;  %v3406_v62 = vmul.f32 %v3052_v11, %v405_v24  ;;  %v385_v0 = vsel %vm384_vm4, %v3119_v40, %v3101_v35  ;;  %v6007_v35 = vperm.slane %v3322_v21, 2 }
 0x17d   :  { %1116 = vrot.lane.b32.xlu0 %v3223_v44, %s2794_s10  ;;  %v6012_v24 = vmov 2   ;;  %v6015_v46 = vperm.slane %v3286_v4, 2 }
 0x17e   :  { %988 = vrot.lane.b32.xlu2 %v3281_v57, %s2791_s7  ;;  %v3356_v60 = vpop.permute.xlu0 %720  ;;  %955 = vperm.xlu1 %2710, %v2878_v15   ;;  %v3359_v12 = vpop.permute.xlu1 %644  ;;  %v608_v57 = vmul.f32 %v6002_v49, %v593_v9  ;;  %v324_v9 = vsel %vm317_vm1, %v3108_v36, %v3050_v10  ;;  %v540_v49 = vmul.f32 %v6006_v59, %v527_v30 }
 0x17f   :  { %v3367_v43 = vpop.permute.xlu2 %753  ;;  %v336_v34 = vmul.f32 %v6005_v3, %v324_v9  ;;  %v406_v40 = vmul.f32 %v6007_v35, %v387_v26  ;;  %v459_v9 = vsel %vm452_vm2, %v3131_v47, %v3085_v29  ;;  %v320_v59 = vsel %vm317_vm1, %v3064_v16, %v3133_v48 }
 0x180   :  { %v3403_v22 = vmul.f32 %v3038_v7, %v608_v57  ;;  %v525_v57 = vsel %vm520_vm5, %v3110_v38, %v3121_v41  ;;  %v6010_v3 = vperm.slane %v3322_v21, 3  ;;  %v318_v29 = vsel %vm317_vm1, %v3133_v48, %v3108_v36 }
 0x181   :  { %v523_v16 = vsel %vm520_vm5, %v3121_v41, %v3142_v52  ;;  %v455_v36 = vsel %vm452_vm2, %v3077_v28, %v3144_v53  ;;  %v591_v41 = vsel %vm588_vm3, %v3089_v31, %v3158_v1  ;;  %v6013_v48 = vperm.slane %v3337_v20, 1 }
 0x182   :  { %v407_v35 = vmul.f32 %v6010_v3, %v385_v0  ;;  %v453_v0 = vsel %vm452_vm2, %v3144_v53, %v3131_v47  ;;  %v6014_v47 = vperm.slane %v3292_v17, 0  ;;  %v338_v10 = vmul.f32 %v6015_v46, %v320_v59 }
 0x183   :  { %v589_v28 = vsel %vm588_vm3, %v3158_v1, %v3156_v63  ;;  %v6016_v53 = vperm.slane %v3286_v4, 3  ;;  %v6017_v31 = vperm.slane %v3337_v20, 2  ;;  %v6020_v46 = vperm.slane %v3292_v17, 3 }
 0x184   :  { %v472_v3 = vmul.f32 %v6014_v47, %v459_v9  ;;  %v6019_v9 = vperm.slane %v3292_v17, 2  ;;  %v6022_v1 = vperm.slane %v3317_v8, 1 }
 0x185   :  { %1122 = vrot.lane.b32.xlu0 %v3237_v25, %s2794_s10  ;;  %v475_v59 = vmul.f32 %v6020_v46, %v453_v0 }
 0x186   :  { %1021 = vperm.xlu2 %2712, %v2878_v15   ;;  %v3436_v30 = vpop.permute.xlu0 %757  ;;  %980 = vrot.lane.b32.xlu1 %v3164_v27, %s2791_s7  ;;  %v3440_v26 = vpop.permute.xlu1 %650  ;;  %v521_v15 = vsel %vm520_vm5, %v3142_v52, %v3112_v39  ;;  %v595_v39 = vsel %vm588_vm3, %v3156_v63, %v3097_v32  ;;  %v541_v52 = vmul.f32 %v6013_v48, %v525_v57  ;;  %v6018_v57 = vperm.slane %v3337_v20, 3 }
 0x187   :  { %6008 = vst [vmem:[#allocation47_spill] sm:$0xff] %v3436_v30  ;;  %v3456_v38 = vpop.permute.xlu2 %778  ;;  %2713 = vset.pattern.permute.xlu1 %v6012_v24  ;;  %v420_v32 = vmul.f32 %v3052_v11, %v404_v54  ;;  %v542_v30 = vmul.f32 %v6017_v31, %v523_v16  ;;  %v474_v47 = vmul.f32 %v6019_v9, %v455_v36 }
 0x188   :  { %6009 = vst [vmem:[#allocation48_spill] sm:$0xff] %v3440_v26  ;;  %v543_v48 = vmul.f32 %v6018_v57, %v521_v15  ;;  %v6021_v26 = vperm.slane %v3317_v8, 3  ;;  %v609_v54 = vmul.f32 %v6022_v1, %v591_v41  ;;  %v422_v16 = vmul.f32 %v3052_v11, %v406_v40 }
 0x189   :  { %6011 = vst [vmem:[#allocation49_spill] sm:$0xff] %v3456_v38  ;;  %v339_v38 = vmul.f32 %v6016_v53, %v318_v29  ;;  %v352_v29 = vmul.f32 %v2988_v50, %v336_v34  ;;  %v3502_v53 = vmul.f32 %v3070_v19, %v540_v49  ;;  %v6023_v15 = vperm.slane %v3317_v8, 2 }
 0x18a   :  { %v611_v63 = vmul.f32 %v6021_v26, %v595_v39  ;;  %v423_v36 = vmul.f32 %v3052_v11, %v407_v35  ;;  %v557_v0 = vmul.f32 %v3070_v19, %v541_v52  ;;  %v488_v57 = vmul.f32 %v3008_v58, %v472_v3  ;;  %v3519_v39 = vld [vmem:[%s5767_s1 + $0x6] ss:$8 sm:$0xf]  ;;  %v3540_v52 = vld [vmem:[%s5767_s1 + $0x7] ss:$8 sm:$0xf] }
 0x18b   :  { %v610_v31 = vmul.f32 %v6023_v15, %v589_v28  ;;  %v354_v26 = vmul.f32 %v2988_v50, %v338_v10  ;;  %v355_v34 = vmul.f32 %v2988_v50, %v339_v38  ;;  %v558_v49 = vmul.f32 %v3070_v19, %v542_v30 }
 0x18c   :  { %v559_v40 = vmul.f32 %v3070_v19, %v543_v48  ;;  %v490_v10 = vmul.f32 %v3008_v58, %v474_v47  ;;  %v491_v50 = vmul.f32 %v3008_v58, %v475_v59  ;;  %v3530_v38 = vmul.f32 %v3038_v7, %v611_v63 }
 0x18d   :  { %1184 = vrot.lane.b32.xlu0 %v3178_v61, %s2793_s9  ;;  %v625_v19 = vmul.f32 %v3038_v7, %v609_v54  ;;  %v626_v41 = vmul.f32 %v3038_v7, %v610_v31  ;;  %v5847_v48 = vperm.slane %v3519_v39, 0  ;;  %v5843_v9 = vperm.slane %v3519_v39, 2 }
 0x18e   :  { %1046 = vrot.lane.b32.xlu2 %v3164_v27, %s2790_s2  ;;  %986 = vrot.lane.b32.xlu1 %v3178_v61, %s2791_s7  ;;  %v3525_v11 = vpop.permute.xlu1 %685  ;;  %v663_v15 = vsel %vm656_vm6, %v3249_v51, %v3302_v55  ;;  %v661_v31 = vsel %vm656_vm6, %v3302_v55, %v3359_v12 }
 0x18f   :  { %v3533_v30 = vpop.permute.xlu2 %782  ;;  %v284_v35 = vpop.permute.xlu0 %283  ;;  %2714 = vset.pattern.permute.xlu2 %v6012_v24  ;;  %v6073_v24 = vperm.slane %v3337_v20, 3 }
 0x190   :  { %v291_v3 = vmul.f32 %v284_v35, %v2940_v33  ;;  %v292_v58 = vmul.f32 %v284_v35, %v2948_v37  ;;  %v293_v28 = vmul.f32 %v284_v35, %v2966_v45  ;;  %v294_v47 = vmul.f32 %v284_v35, %v2956_v42 }
 0x191   :  { %v657_v33 = vsel %vm656_vm6, %v3245_v14, %v3249_v51  ;;  %v5841_v37 = vperm.slane %v3540_v52, 0  ;;  %v5844_v45 = vperm.slane %v3519_v39, 1  ;;  %v659_v42 = vsel %vm656_vm6, %v3359_v12, %v3245_v14 }
 0x192   :  { %v360_v7 = vadd.f32 %v352_v29, %v291_v3  ;;  %v361_v46 = vadd.f32 %v3362_v2, %v292_v58  ;;  %v362_v59 = vadd.f32 %v354_v26, %v293_v28  ;;  %v363_v63 = vadd.f32 %v355_v34, %v294_v47 }
 0x193   :  { %v729_v29 = vsel %vm724_vm7, %v3270_v13, %v3276_v56  ;;  %v678_v55 = vmul.f32 %v5843_v9, %v657_v33  ;;  %v5842_v12 = vperm.slane %v3540_v52, 3  ;;  %v731_v35 = vsel %vm724_vm7, %v3356_v60, %v3270_v13 }
 0x194   :  { %v428_v1 = vadd.f32 %v420_v32, %v360_v7  ;;  %v429_v54 = vadd.f32 %v3406_v62, %v361_v46  ;;  %v430_v2 = vadd.f32 %v422_v16, %v362_v59  ;;  %v431_v14 = vadd.f32 %v423_v36, %v363_v63 }
 0x195   :  { %1190 = vrot.lane.b32.xlu0 %v3194_v23, %s2793_s9  ;;  %v5846_v62 = vperm.slane %v3519_v39, 3  ;;  %v677_v36 = vmul.f32 %v5844_v45, %v659_v42  ;;  %v694_v46 = vmul.f32 %v3525_v11, %v678_v55  ;;  %v747_v13 = vmul.f32 %v5842_v12, %v731_v35 }
 0x196   :  { %v496_v32 = vadd.f32 %v488_v57, %v428_v1  ;;  %v497_v16 = vadd.f32 %v3379_v18, %v429_v54  ;;  %v498_v26 = vadd.f32 %v490_v10, %v430_v2  ;;  %1050 = vrot.lane.b32.xlu2 %v3223_v44, %s2790_s2  ;;  %992 = vrot.lane.b32.xlu1 %v3194_v23, %s2791_s7  ;;  %v3582_v51 = vpop.permute.xlu1 %710  ;;  %v6055_v45 = vperm.slane %v3286_v4, 3 }
 0x197   :  { %v499_v57 = vadd.f32 %v491_v50, %v431_v14  ;;  %v3589_v34 = vpop.permute.xlu2 %788  ;;  %v3591_v18 = vpop.permute.xlu0 %784  ;;  %v744_v10 = vmul.f32 %v5841_v37, %v729_v29  ;;  %v679_v28 = vmul.f32 %v5846_v62, %v663_v15  ;;  %v676_v50 = vmul.f32 %v5847_v48, %v661_v31  ;;  %v6052_v37 = vld [vmem:[#allocation8_spill] sm:$0xff] }
 0x198   :  { %v565_v3 = vadd.f32 %v557_v0, %v497_v16  ;;  %v566_v58 = vadd.f32 %v558_v49, %v498_v26  ;;  %v693_v47 = vmul.f32 %v3525_v11, %v677_v36  ;;  %v564_v7 = vadd.f32 %v3502_v53, %v496_v32  ;;  %v6024_v16 = vld [vmem:[#allocation21_spill] sm:$0xff]  ;;  %v6025_v26 = vld [vmem:[#allocation22_spill] sm:$0xff] }
 0x199   :  { %v567_v63 = vadd.f32 %v559_v40, %v499_v57  ;;  %v692_v0 = vmul.f32 %v3525_v11, %v676_v50  ;;  %v5840_v49 = vperm.slane %v3540_v52, 2  ;;  %v695_v1 = vmul.f32 %v3525_v11, %v679_v28  ;;  %v6026_v57 = vld [vmem:[#allocation23_spill] sm:$0xff]  ;;  %v6028_v50 = vld [vmem:[#allocation18_spill] sm:$0xff] }
 0x19a   :  { %v633_v59 = vadd.f32 %v625_v19, %v565_v3  ;;  %v634_v33 = vadd.f32 %v626_v41, %v566_v58  ;;  %v632_v42 = vadd.f32 %v3403_v22, %v564_v7  ;;  %v760_v29 = vmul.f32 %v3367_v43, %v744_v10  ;;  %v6027_v10 = vld [vmem:[#allocation32_spill] sm:$0xff] }
 0x19b   :  { %v635_v53 = vadd.f32 %v3530_v38, %v567_v63  ;;  %v5845_v19 = vperm.slane %v3540_v52, 1  ;;  %v763_v41 = vmul.f32 %v3367_v43, %v747_v13  ;;  %v323_v55 = vsel %vm317_vm1, %v6025_v26, %v6024_v16 }
 0x19c   :  { %v701_v54 = vadd.f32 %v693_v47, %v633_v59  ;;  %v702_v2 = vadd.f32 %v694_v46, %v634_v33  ;;  %v700_v40 = vadd.f32 %v692_v0, %v632_v42  ;;  %v325_v35 = vsel %vm317_vm1, %v6027_v10, %v6025_v26  ;;  %v6029_v47 = vld [vmem:[#allocation17_spill] sm:$0xff] }
 0x19d   :  { %1242 = vrot.lane.b32.xlu0 %v3207_v5, %s2795_s11  ;;  %v703_v11 = vadd.f32 %v695_v1, %v635_v53  ;;  %v390_v7 = vsel %vm384_vm4, %v6029_v47, %v6028_v50  ;;  %v6030_v46 = vperm.slane %v3286_v4, 1  ;;  %v6031_v33 = vperm.slane %v3286_v4, 2  ;;  %v6034_v53 = vld [vmem:[#allocation42_spill] sm:$0xff] }
 0x19e   :  { %1056 = vrot.lane.b32.xlu2 %v3237_v25, %s2790_s2  ;;  %1044 = vrot.lane.b32.xlu1 %v3207_v5, %s2790_s2  ;;  %v717_v22 = vpop.permute.xlu1 %716  ;;  %v3632_v32 = vadd.f32 %v760_v29, %v700_v40  ;;  %v6032_v13 = vperm.slane %v3286_v4, 0  ;;  %v6035_v40 = vperm.slane %v3322_v21, 1 }
 0x19f   :  { %v725_v38 = vsel %vm724_vm7, %v717_v22, %v3356_v60  ;;  %v727_v15 = vsel %vm724_vm7, %v3276_v56, %v717_v22  ;;  %v3628_v31 = vpop.permute.xlu2 %825  ;;  %v3630_v14 = vpop.permute.xlu0 %790  ;;  %v321_v56 = vsel %vm317_vm1, %v6024_v16, %v6026_v57  ;;  %v3650_v3 = vadd.f32 %v763_v41, %v703_v11  ;;  %v6036_v11 = vld [vmem:[#allocation20_spill] sm:$0xff]  ;;  %v6037_v41 = vld [vmem:[#allocation19_spill] sm:$0xff]  ;;  %v6040_v16 = vld [vmem:[#allocation38_spill] sm:$0xff] }
 0x1a0   :  { %v745_v36 = vmul.f32 %v5845_v19, %v727_v15  ;;  %v746_v60 = vmul.f32 %v5840_v49, %v725_v38  ;;  %v341_v59 = vmul.f32 %v6030_v46, %v323_v55  ;;  %v342_v63 = vmul.f32 %v6031_v33, %v321_v56  ;;  %v6039_v15 = vld [vmem:[#allocation26_spill] sm:$0xff]  ;;  %v6046_v33 = vld [vmem:[#allocation9_spill] sm:$0xff] }
 0x1a1   :  { %v340_v0 = vmul.f32 %v6032_v13, %v325_v35  ;;  %v409_v22 = vmul.f32 %v6035_v40, %v390_v7  ;;  %v460_v26 = vsel %vm452_vm2, %v6040_v16, %v6039_v15  ;;  %v319_v35 = vsel %vm317_vm1, %v6026_v57, %v6027_v10  ;;  %v6045_v7 = vld [vmem:[#allocation14_spill] sm:$0xff]  ;;  %v6048_v40 = vld [vmem:[#allocation25_spill] sm:$0xff] }
 0x1a2   :  { %v761_v58 = vmul.f32 %v3367_v43, %v745_v36  ;;  %v762_v28 = vmul.f32 %v3367_v43, %v746_v60  ;;  %v6033_v43 = vld [vmem:[#allocation4_spill] sm:$0xff]  ;;  %v6042_v36 = vld [vmem:[#allocation13_spill] sm:$0xff]  ;;  %v296_v13 = vmul.f32 %v6045_v7, %v6046_v33  ;;  %v6049_v57 = vperm.slane %v3322_v21, 0 }
 0x1a3   :  { %v357_v60 = vmul.f32 %v6042_v36, %v341_v59  ;;  %v358_v56 = vmul.f32 %v6042_v36, %v342_v63  ;;  %v458_v63 = vsel %vm452_vm2, %v6039_v15, %v6048_v40  ;;  %v6051_v33 = vperm.slane %v3292_v17, 0 }
 0x1a4   :  { %v3664_v42 = vadd.f32 %v761_v58, %v701_v54  ;;  %v3666_v1 = vadd.f32 %v762_v28, %v702_v2  ;;  %v526_v54 = vsel %vm520_vm5, %v6037_v41, %v6036_v11  ;;  %v6038_v2 = vld [vmem:[#allocation31_spill] sm:$0xff]  ;;  %v356_v58 = vmul.f32 %v6042_v36, %v340_v0 }
 0x1a5   :  { %1248 = vrot.lane.b32.xlu0 %v3223_v44, %s2795_s11  ;;  %v392_v38 = vsel %vm384_vm4, %v6038_v2, %v6029_v47  ;;  %v6044_v47 = vld [vmem:[#allocation7_spill] sm:$0xff]  ;;  %v425_v12 = vmul.f32 %v6052_v37, %v409_v22  ;;  %v6053_v15 = vperm.slane %v3337_v20, 1  ;;  %v365_v19 = vadd.f32 %v357_v60, %v296_v13  ;;  %v6064_v13 = vld [vmem:[#allocation28_spill] sm:$0xff] }
 0x1a6   :  { %1091 = vperm.xlu2 %2714, %v6033_v43   ;;  %1048 = vrot.lane.b32.xlu1 %v6034_v53, %s2790_s2  ;;  %v3673_v29 = vpop.permute.xlu1 %722  ;;  %v295_v46 = vmul.f32 %v6045_v7, %v6044_v47  ;;  %v6047_v43 = vld [vmem:[#allocation12_spill] sm:$0xff]  ;;  %v408_v10 = vmul.f32 %v6049_v57, %v392_v38  ;;  %v6050_v0 = vld [vmem:[#allocation35_spill] sm:$0xff]  ;;  %v6057_v22 = vperm.slane %v3292_v17, 1 }
 0x1a7   :  { %v3689_v55 = vpop.permute.xlu0 %914  ;;  %v297_v59 = vmul.f32 %v6045_v7, %v6047_v43  ;;  %v386_v49 = vsel %vm384_vm4, %v6050_v0, %v6038_v2  ;;  %v388_v47 = vsel %vm384_vm4, %v6028_v50, %v6050_v0  ;;  %v476_v43 = vmul.f32 %v6051_v33, %v460_v26  ;;  %v6054_v38 = vld [vmem:[#allocation11_spill] sm:$0xff] }
 0x1a8   :  { %6041 = vst [vmem:[#allocation21_spill] sm:$0xff] %v3689_v55  ;;  %v3698_v28 = vpop.permute.xlu2 %896  ;;  %v3725_v9 = vmul.f32 %v6053_v15, %v526_v54  ;;  %v298_v57 = vmul.f32 %v6045_v7, %v6054_v38  ;;  %v343_v2 = vmul.f32 %v6055_v45, %v319_v35  ;;  %v364_v48 = vadd.f32 %v356_v58, %v295_v46  ;;  %v6056_v50 = vld [vmem:[#allocation27_spill] sm:$0xff]  ;;  %v6058_v54 = vld [vmem:[#allocation34_spill] sm:$0xff]  ;;  %v6062_v58 = vld [vmem:[#allocation40_spill] sm:$0xff] }
 0x1a9   :  { %6043 = vst [vmem:[#allocation22_spill] sm:$0xff] %v3698_v28  ;;  %v366_v62 = vadd.f32 %v358_v56, %v297_v59  ;;  %v454_v26 = vsel %vm452_vm2, %v6056_v50, %v6040_v16  ;;  %v477_v0 = vmul.f32 %v6057_v22, %v458_v63  ;;  %v528_v33 = vsel %vm520_vm5, %v6058_v54, %v6037_v41  ;;  %v6061_v16 = vld [vmem:[#allocation15_spill] sm:$0xff]  ;;  %v6063_v41 = vld [vmem:[#allocation44_spill] sm:$0xff]  ;;  %v6065_v59 = vld [vmem:[#allocation29_spill] sm:$0xff] }
 0x1aa   :  { %v6059_v7 = vperm.slane %v3322_v21, 2  ;;  %v6060_v45 = vperm.slane %v3322_v21, 3  ;;  %v424_v56 = vmul.f32 %v6052_v37, %v408_v10  ;;  %v492_v35 = vmul.f32 %v6061_v16, %v476_v43  ;;  %v6069_v22 = vld [vmem:[#allocation30_spill] sm:$0xff] }
 0x1ab   :  { %v522_v46 = vsel %vm520_vm5, %v6062_v58, %v6058_v54  ;;  %v594_v63 = vsel %vm588_vm3, %v6065_v59, %v6064_v13  ;;  %v359_v10 = vmul.f32 %v6042_v36, %v343_v2  ;;  %v6068_v38 = vmov 3  }
 0x1ac   :  { %v410_v4 = vmul.f32 %v6059_v7, %v388_v47  ;;  %v411_v60 = vmul.f32 %v6060_v45, %v386_v49  ;;  %v456_v49 = vsel %vm452_vm2, %v6048_v40, %v6056_v50  ;;  %v6066_v47 = vperm.slane %v3292_v17, 3  ;;  %v6071_v45 = vld [vmem:[#allocation43_spill] sm:$0xff] }
 0x1ad   :  { %1254 = vrot.lane.b32.xlu0 %v3237_v25, %s2795_s11  ;;  %v592_v54 = vsel %vm588_vm3, %v6064_v13, %v6069_v22  ;;  %v6070_v40 = vperm.slane %v3337_v20, 0  ;;  %v432_v7 = vadd.f32 %v424_v56, %v364_v48  ;;  %v596_v36 = vsel %vm588_vm3, %v6071_v45, %v6065_v59 }
 0x1ae   :  { %1114 = vrot.lane.b32.xlu2 %v6034_v53, %s2794_s10  ;;  %1054 = vrot.lane.b32.xlu1 %v6063_v41, %s2790_s2  ;;  %v3757_v21 = vpop.permute.xlu1 %776  ;;  %v479_v43 = vmul.f32 %v6066_v47, %v454_v26  ;;  %v426_v26 = vmul.f32 %v6052_v37, %v410_v4  ;;  %v427_v47 = vmul.f32 %v6052_v37, %v411_v60 }
 0x1af   :  { %v3770_v15 = vpop.permute.xlu0 %920  ;;  %2715 = vset.pattern.permute.xlu2 %v6068_v38  ;;  %v544_v50 = vmul.f32 %v6070_v40, %v528_v33  ;;  %v524_v13 = vsel %vm520_vm5, %v6036_v11, %v6062_v58  ;;  %v547_v33 = vmul.f32 %v6073_v24, %v522_v46  ;;  %v433_v48 = vadd.f32 %v425_v12, %v365_v19 }
 0x1b0   :  { %6067 = vst [vmem:[#allocation23_spill] sm:$0xff] %v3770_v15  ;;  %v3783_v2 = vpop.permute.xlu2 %912  ;;  %v493_v56 = vmul.f32 %v6061_v16, %v477_v0  ;;  %v6074_v40 = vperm.slane %v3292_v17, 2  ;;  %v500_v15 = vadd.f32 %v492_v35, %v432_v7  ;;  %v367_v55 = vadd.f32 %v359_v10, %v298_v57  ;;  %v6078_v17 = vld [vmem:[#allocation10_spill] sm:$0xff]  ;;  %v6080_v10 = vld [vmem:[#allocation36_spill] sm:$0xff] }
 0x1b1   :  { %6072 = vst [vmem:[#allocation32_spill] sm:$0xff] %v3783_v2  ;;  %v495_v4 = vmul.f32 %v6061_v16, %v479_v43  ;;  %v590_v37 = vsel %vm588_vm3, %v6069_v22, %v6071_v45  ;;  %v6075_v11 = vperm.slane %v3317_v8, 3  ;;  %v6076_v24 = vperm.slane %v3317_v8, 0  ;;  %v6081_v43 = vld [vmem:[#allocation33_spill] sm:$0xff] }
 0x1b2   :  { %v478_v59 = vmul.f32 %v6074_v40, %v456_v49  ;;  %v6077_v19 = vperm.slane %v3317_v8, 1  ;;  %v560_v58 = vmul.f32 %v6078_v17, %v544_v50  ;;  %v6079_v57 = vperm.slane %v3337_v20, 2 }
 0x1b3   :  { %v615_v60 = vmul.f32 %v6075_v11, %v596_v36  ;;  %v612_v12 = vmul.f32 %v6076_v24, %v594_v63  ;;  %v434_v46 = vadd.f32 %v426_v26, %v366_v62  ;;  %v435_v49 = vadd.f32 %v427_v47, %v367_v55  ;;  %v3828_v55 = vld [vmem:[%s5766_s4 + $0x10] sm:$0xff]  ;;  %v6084_v26 = vld [vmem:[#allocation16_spill] sm:$0xff] }
 0x1b4   :  { %v613_v0 = vmul.f32 %v6077_v19, %v592_v54  ;;  %v546_v35 = vmul.f32 %v6079_v57, %v524_v13  ;;  %v662_v22 = vsel %vm656_vm6, %v6081_v43, %v6080_v10  ;;  %v563_v7 = vmul.f32 %v6078_v17, %v547_v33  ;;  %v6082_v54 = vld [vmem:[#allocation39_spill] sm:$0xff] }
 0x1b5   :  { %1316 = vrot.lane.b32.xlu0 %v3178_v61, %s2798_s12  ;;  %v568_v63 = vadd.f32 %v560_v58, %v500_v15  ;;  %v664_v50 = vsel %vm656_vm6, %v6082_v54, %v6081_v43  ;;  %v6083_v20 = vperm.slane %v3317_v8, 2  ;;  %v501_v15 = vadd.f32 %v493_v56, %v433_v48 }
 0x1b6   :  { %1120 = vrot.lane.b32.xlu2 %v6063_v41, %s2794_s10  ;;  %1087 = vperm.xlu1 %2713, %v3828_v55   ;;  %v781_v45 = vpop.permute.xlu1 %780  ;;  %v503_v36 = vadd.f32 %v495_v4, %v435_v49  ;;  %v631_v47 = vmul.f32 %v6084_v26, %v615_v60  ;;  %v494_v8 = vmul.f32 %v6061_v16, %v478_v59  ;;  %v6085_v40 = vperm.slane %v3519_v39, 0  ;;  %v6087_v16 = vld [vmem:[#allocation41_spill] sm:$0xff] }
 0x1b7   :  { %v614_v62 = vmul.f32 %v6083_v20, %v590_v37  ;;  %v3832_v13 = vpop.permute.xlu0 %926  ;;  %v628_v33 = vmul.f32 %v6084_v26, %v612_v12  ;;  %v562_v11 = vmul.f32 %v6078_v17, %v546_v35  ;;  %v561_v19 = vmul.f32 %v6078_v17, %v3725_v9  ;;  %v6088_v35 = vld [vmem:[#allocation46_spill] sm:$0xff]  ;;  %v6090_v17 = vld [vmem:[#allocation48_spill] sm:$0xff] }
 0x1b8   :  { %v680_v37 = vmul.f32 %v6085_v40, %v662_v22  ;;  %v3839_v24 = vpop.permute.xlu2 %918  ;;  %v629_v48 = vmul.f32 %v6084_v26, %v613_v0  ;;  %v6086_v56 = vperm.slane %v3519_v39, 3  ;;  %v571_v60 = vadd.f32 %v563_v7, %v503_v36  ;;  %v6089_v22 = vld [vmem:[#allocation45_spill] sm:$0xff] }
 0x1b9   :  { %v502_v58 = vadd.f32 %v494_v8, %v434_v46  ;;  %v630_v12 = vmul.f32 %v6084_v26, %v614_v62  ;;  %v636_v57 = vadd.f32 %v628_v33, %v568_v63  ;;  %v569_v49 = vadd.f32 %v561_v19, %v501_v15  ;;  %v3855_v9 = vld [vmem:[%s5767_s1 + $0x20] ss:$8 sm:$0xf] }
 0x1ba   :  { %v683_v4 = vmul.f32 %v6086_v56, %v664_v50  ;;  %v696_v59 = vmul.f32 %v6087_v16, %v680_v37  ;;  %v639_v43 = vadd.f32 %v631_v47, %v571_v60  ;;  %v728_v20 = vsel %vm724_vm7, %v6089_v22, %v6088_v35  ;;  %v6096_v56 = vld [vmem:[#allocation47_spill] sm:$0xff]  ;;  %v6097_v60 = vld [vmem:[#allocation49_spill] sm:$0xff] }
 0x1bb   :  { %v570_v0 = vadd.f32 %v562_v11, %v502_v58  ;;  %v658_v46 = vsel %vm656_vm6, %v6090_v17, %v6082_v54  ;;  %v660_v7 = vsel %vm656_vm6, %v6080_v10, %v6090_v17  ;;  %v637_v63 = vadd.f32 %v629_v48, %v569_v49 }
 0x1bc   :  { %v699_v50 = vmul.f32 %v6087_v16, %v683_v4  ;;  %v6091_v15 = vperm.slane %v3540_v52, 1  ;;  %v804_v26 = vperm.slane %v3855_v9, 0  ;;  %v3872_v54 = vadd.f32 %v696_v59, %v636_v57 }
 0x1bd   :  { %1322 = vrot.lane.b32.xlu0 %v3194_v23, %s2798_s12  ;;  %v638_v62 = vadd.f32 %v630_v12, %v570_v0  ;;  %v6092_v47 = vperm.slane %v3519_v39, 1  ;;  %v6093_v33 = vperm.slane %v3519_v39, 2  ;;  %v732_v11 = vsel %vm724_vm7, %v3673_v29, %v3582_v51 }
 0x1be   :  { %v749_v36 = vmul.f32 %v6091_v15, %v728_v20  ;;  %1153 = vperm.xlu2 %2715, %v3828_v55   ;;  %1112 = vrot.lane.b32.xlu1 %v3164_v27, %s2794_s10  ;;  %v787_v10 = vpop.permute.xlu1 %786  ;;  %v707_v37 = vadd.f32 %v699_v50, %v639_v43  ;;  %v6095_v48 = vmov 5   ;;  %v798_v58 = vsel %vm792_vm8, %v6097_v60, %v3533_v30 }
 0x1bf   :  { %v681_v8 = vmul.f32 %v6092_v47, %v660_v7  ;;  %v682_v40 = vmul.f32 %v6093_v33, %v658_v46  ;;  %v3885_v19 = vpop.permute.xlu0 %978  ;;  %2716 = vset.pattern.permute.xlu1 %v6095_v48  ;;  %v806_v39 = vperm.slane %v3855_v9, 2  ;;  %v807_v59 = vperm.slane %v3855_v9, 3 }
 0x1c0   :  { %6094 = vst [vmem:[#allocation18_spill] sm:$0xff] %v3885_v19  ;;  %v765_v4 = vmul.f32 %v6096_v56, %v749_v36  ;;  %v3895_v12 = vpop.permute.xlu2 %924  ;;  %v730_v57 = vsel %vm724_vm7, %v3582_v51, %v6089_v22  ;;  %v793_v49 = vsel %vm792_vm8, %v3591_v18, %v3589_v34  ;;  %v726_v43 = vsel %vm724_vm7, %v6088_v35, %v3673_v29 }
 0x1c1   :  { %6098 = vst [vmem:[#allocation17_spill] sm:$0xff] %v3895_v12  ;;  %v805_v20 = vperm.slane %v3855_v9, 1  ;;  %v6099_v0 = vperm.slane %v3540_v52, 3  ;;  %v799_v51 = vsel %vm792_vm8, %v3589_v34, %v3757_v21  ;;  %v795_v22 = vsel %vm792_vm8, %v781_v45, %v3591_v18 }
 0x1c2   :  { %v797_v46 = vsel %vm792_vm8, %v3757_v21, %v781_v45  ;;  %v697_v29 = vmul.f32 %v6087_v16, %v681_v8  ;;  %v698_v35 = vmul.f32 %v6087_v16, %v682_v40  ;;  %v794_v9 = vsel %vm792_vm8, %v787_v10, %v3630_v14 }
 0x1c3   :  { %v751_v17 = vmul.f32 %v6099_v0, %v732_v11  ;;  %v796_v34 = vsel %vm792_vm8, %v3533_v30, %v787_v10  ;;  %v816_v7 = vmul.f32 %v804_v26, %v798_v58  ;;  %v6100_v50 = vperm.slane %v3540_v52, 0  ;;  %v3940_v30 = vpop.f32.mrf.mxu2 }
 0x1c4   :  { %v814_v15 = vmul.f32 %v806_v39, %v793_v49  ;;  %v6101_v36 = vperm.slane %v3540_v52, 2  ;;  %v800_v45 = vsel %vm792_vm8, %v3630_v14, %v6097_v60  ;;  %v815_v16 = vmul.f32 %v807_v59, %v799_v51 }
 0x1c5   :  { %v748_v18 = vmul.f32 %v6100_v50, %v730_v57  ;;  %v812_v47 = vmul.f32 %v804_v26, %v797_v46  ;;  %v813_v8 = vmul.f32 %v805_v20, %v795_v22  ;;  %1374 = vrot.lane.b32.xlu0 %v3207_v5, %s2799_s13  ;;  %v767_v10 = vmul.f32 %v6096_v56, %v751_v17 }
 0x1c6   :  { %v750_v21 = vmul.f32 %v6101_v36, %v726_v43  ;;  %v817_v33 = vmul.f32 %v805_v20, %v796_v34  ;;  %v818_v40 = vmul.f32 %v806_v39, %v794_v9  ;;  %1178 = vrot.lane.b32.xlu2 %v3164_v27, %s2793_s9  ;;  %1118 = vrot.lane.b32.xlu1 %v3178_v61, %s2794_s10  ;;  %v822_v52 = vpop.permute.xlu1 %821 }
 0x1c7   :  { %v828_v14 = vmul.f32 %v822_v52, %v812_v47  ;;  %v829_v11 = vmul.f32 %v822_v52, %v813_v8  ;;  %v830_v26 = vmul.f32 %v822_v52, %v814_v15  ;;  %v831_v60 = vmul.f32 %v822_v52, %v815_v16  ;;  %v3947_v58 = vpop.permute.xlu0 %984  ;;  %2717 = vset.pattern.permute.xlu2 %v6095_v48  ;;  %v6107_v16 = vld [vmem:[#allocation6_spill] sm:$0xff] }
 0x1c8   :  { %v705_v57 = vadd.f32 %v697_v29, %v637_v63  ;;  %v706_v49 = vadd.f32 %v698_v35, %v638_v62  ;;  %v764_v43 = vmul.f32 %v6096_v56, %v748_v18  ;;  %v766_v39 = vmul.f32 %v6096_v56, %v750_v21  ;;  %v3952_v20 = vpop.permute.xlu2 %959 }
 0x1c9   :  { %v832_v0 = vmul.f32 %v3628_v31, %v816_v7  ;;  %v819_v17 = vmul.f32 %v807_v59, %v800_v45  ;;  %v3956_v51 = vadd.f32 %v828_v14, %v3632_v32  ;;  %v3959_v22 = vadd.f32 %v829_v11, %v3664_v42 }
 0x1ca   :  { %v833_v46 = vmul.f32 %v3628_v31, %v817_v33  ;;  %v834_v63 = vmul.f32 %v3628_v31, %v818_v40  ;;  %v3964_v62 = vadd.f32 %v830_v26, %v3666_v1  ;;  %v3967_v56 = vadd.f32 %v831_v60, %v3650_v3 }
 0x1cb   :  { %6102 = vst [vmem:[#allocation4_spill] sm:$0xff] %v3956_v51  ;;  %v775_v29 = vadd.f32 %v767_v10, %v707_v37  ;;  %v772_v35 = vadd.f32 %v764_v43, %v3872_v54  ;;  %v774_v59 = vadd.f32 %v766_v39, %v706_v49  ;;  %v773_v9 = vadd.f32 %v765_v4, %v705_v57  ;;  %v172_v7 = vpop.f32.mrf.mxu2  ;;  %v146_v43 = vpop.f32.mrf.mxu1  ;;  %v6109_v39 = vld [vmem:[#allocation5_spill] sm:$0xff] }
 0x1cc   :  { %6103 = vst [vmem:[#allocation20_spill] sm:$0xff] %v3959_v22  ;;  %v835_v32 = vmul.f32 %v3628_v31, %v819_v17  ;;  %v173_v47 = vadd.f32 %v172_v7, %v6107_v16  ;;  %v4115_v22 = vld [vmem:[%s5766_s4 + $0x28] sm:$0xff] }
 0x1cd   :  { %6104 = vst [vmem:[#allocation19_spill] sm:$0xff] %v3964_v62  ;;  %1380 = vrot.lane.b32.xlu0 %v3223_v44, %s2799_s13  ;;  %v841_v42 = vadd.f32 %v833_v46, %v773_v9  ;;  %v842_v34 = vadd.f32 %v834_v63, %v774_v59  ;;  %v840_v3 = vadd.f32 %v832_v0, %v772_v35  ;;  %v4002_v46 = vld [vmem:[%s5766_s4 + $0x18] sm:$0xff] }
 0x1ce   :  { %6105 = vst [vmem:[#allocation31_spill] sm:$0xff] %v3967_v56  ;;  %1182 = vrot.lane.b32.xlu2 %v3223_v44, %s2793_s9  ;;  %1124 = vrot.lane.b32.xlu1 %v3194_v23, %s2794_s10  ;;  %v843_v54 = vadd.f32 %v835_v32, %v775_v29  ;;  %v221_v11 = vmax.f32 %v173_v47, 0.0  ;;  %v147_v0 = vadd.f32 %v146_v43, %v6109_v39  ;;  %v6117_v47 = vmov 1  }
 0x1cf   :  { %v3977_v1 = vpop.permute.xlu0 %990  ;;  %v850_v37 = vpop.permute.xlu1 %849  ;;  %6110 = vst [vmem:[#allocation13_spill] sm:$0xff] %v4002_v46 }
 0x1d0   :  { %v856_v4 = vadd.f32 %v850_v37, %v840_v3  ;;  %v857_v50 = vadd.f32 %v850_v37, %v841_v42  ;;  %v858_v31 = vadd.f32 %v850_v37, %v842_v34  ;;  %v3979_v18 = vpop.permute.xlu2 %982  ;;  %v859_v15 = vadd.f32 %v850_v37, %v843_v54 }
 0x1d1   :  { %6106 = vst [vmem:[#allocation26_spill] sm:$0xff] %v3979_v18  ;;  %v3995_v17 = vmin.f32 %v221_v11, 6.0  ;;  %v216_v63 = vmax.f32 %v147_v0, 0.0  ;;  %v6113_v42 = vmov 6  }
 0x1d2   :  { %v864_v36 = vmax.f32 %v856_v4, 0.0  ;;  %v865_v21 = vmax.f32 %v857_v50, 0.0  ;;  %v866_v45 = vmax.f32 %v858_v31, 0.0  ;;  %v867_v8 = vmax.f32 %v859_v15, 0.0  ;;  %v4042_v4 = vld [vmem:[%s5766_s4 + $0x20] sm:$0xff] }
 0x1d3   :  { %v4013_v9 = vmin.f32 %v216_v63, 6.0  ;;  %6115 = vst [vmem:[#allocation12_spill] sm:$0xff] %v4042_v4  ;;  %v6116_v31 = vmov 7  }
 0x1d4   :  { %v872_v10 = vmin.f32 %v864_v36, 6.0  ;;  %v873_v33 = vmin.f32 %v865_v21, 6.0  ;;  %v874_v40 = vmin.f32 %v866_v45, 6.0  ;;  %v875_v52 = vmin.f32 %v867_v8, 6.0  ;;  %v148_v21 = vpop.f32.mrf.mxu1 }
 0x1d5   :  { %1386 = vrot.lane.b32.xlu0 %v3237_v25, %s2799_s13  ;;  %v149_v45 = vadd.f32 %v148_v21, %v6107_v16 }
 0x1d6   :  { %v878_v14 = vpack.c.bf16 %v873_v33, %v872_v10  ;;  %1188 = vrot.lane.b32.xlu2 %v3237_v25, %s2793_s9  ;;  %1176 = vrot.lane.b32.xlu1 %v3207_v5, %s2793_s9  ;;  %v879_v26 = vpack.c.bf16 %v875_v52, %v874_v40  ;;  %v194_v52 = vpop.f32.mrf.mxu3 }
 0x1d7   :  { %v3988_v60 = vpop.permute.xlu0 %1052  ;;  %v220_v10 = vmax.f32 %v149_v45, 0.0  ;;  %v4089_v45 = vld [vmem:[%s5767_s1 + $0x3] ss:$8 sm:$0xf] }
 0x1d8   :  { %6108 = vst [vmem:[#allocation38_spill] sm:$0xff] %v3988_v60  ;;  %v3990_v57 = vpop.permute.xlu2 %988  ;;  %v3992_v49 = vpop.permute.xlu1 %901  ;;  %v4253_v60 = vld [vmem:[%s5767_s1 + $0x2] ss:$8 sm:$0xf] }
 0x1d9   :  { %882 = vst [vmem:[#allocation3 + $0x10] sm:$0xff] %v878_v14  ;;  %v195_v14 = vadd.f32 %v194_v52, %v6109_v39  ;;  %v4070_v11 = vmin.f32 %v220_v10, 6.0  ;;  %v5853_v10 = vperm.slane %v4089_v45, 2 }
 0x1da   :  { %883 = vst [vmem:[#allocation3 + $0x18] sm:$0xff] %v879_v26 }
 0x1db   :  { %6120 = vst [vmem:[#allocation8_spill] sm:$0xff] %v4070_v11  ;;  %v218_v43 = vmax.f32 %v195_v14, 0.0 }
 0x1dd   :  { %1518 = vrot.lane.b32.xlu0 %v3995_v17, %s2792_s8  ;;  %v4084_v21 = vmin.f32 %v218_v43, 6.0 }
 0x1de   :  { %1223 = vperm.xlu2 %2717, %v4002_v46   ;;  %1180 = vrot.lane.b32.xlu1 %v6034_v53, %s2793_s9 }
 0x1df   :  { %v4007_v29 = vpop.permute.xlu0 %1058  ;;  %6123 = vst [vmem:[#allocation34_spill] sm:$0xff] %v4084_v21 }
 0x1e0   :  { %v4009_v35 = vpop.permute.xlu2 %1021  ;;  %v4011_v59 = vpop.permute.xlu1 %916 }
 0x1e1   :  { %6111 = vst [vmem:[#allocation7_spill] sm:$0xff] %v4011_v59 }
 0x1e5   :  { %1578 = vrot.lane.b32.xlu0 %v4013_v9, %s2791_s7 }
 0x1e6   :  { %1246 = vrot.lane.b32.xlu2 %v6034_v53, %s2795_s11  ;;  %1186 = vrot.lane.b32.xlu1 %v6063_v41, %s2793_s9 }
 0x1e7   :  { %v4021_v32 = vpop.permute.xlu0 %1110  ;;  %2718 = vset.pattern.permute.xlu2 %v6113_v42 }
 0x1e8   :  { %6112 = vst [vmem:[#allocation14_spill] sm:$0xff] %v4021_v32  ;;  %v4024_v34 = vpop.permute.xlu2 %1046  ;;  %v4026_v3 = vpop.permute.xlu1 %922 }
 0x1ed   :  { %1584 = vrot.lane.b32.xlu0 %v3995_v17, %s2791_s7 }
 0x1ee   :  { %1252 = vrot.lane.b32.xlu2 %v6063_v41, %s2795_s11  ;;  %1219 = vperm.xlu1 %2716, %v3828_v55  }
 0x1ef   :  { %v4033_v37 = vpop.permute.xlu0 %1116 }
 0x1f0   :  { %v4035_v54 = vpop.permute.xlu2 %1050  ;;  %v4037_v7 = vpop.permute.xlu1 %955 }
 0x1f1   :  { %6114 = vst [vmem:[#allocation9_spill] sm:$0xff] %v4037_v7 }
 0x1f5   :  { %1492 = vperm.xlu0 %2704, %v4042_v4  }
 0x1f6   :  { %1285 = vperm.xlu2 %2718, %v3828_v55   ;;  %1244 = vrot.lane.b32.xlu1 %v3164_v27, %s2795_s11 }
 0x1f7   :  { %v4048_v50 = vpop.permute.xlu0 %1122  ;;  %2719 = vset.pattern.permute.xlu1 %v6116_v31 }
 0x1f8   :  { %v4051_v15 = vpop.permute.xlu2 %1056  ;;  %v4053_v36 = vpop.permute.xlu1 %980 }
 0x1fd   :  { %2723 = vset.pattern.permute.xlu0 %v6117_v47 }
 0x1fe   :  { %1310 = vrot.lane.b32.xlu2 %v3164_v27, %s2798_s12  ;;  %1025 = vperm.xlu0 %2723, %v4002_v46  }
 0x1ff   :  { %1250 = vrot.lane.b32.xlu1 %v3178_v61, %s2795_s11  ;;  %v4062_v8 = vpop.permute.xlu0 %1184  ;;  %2720 = vset.pattern.permute.xlu2 %v6116_v31 }
 0x200   :  { %6118 = vst [vmem:[#allocation25_spill] sm:$0xff] %v4062_v8  ;;  %v4065_v33 = vpop.permute.xlu2 %1091  ;;  %v4067_v40 = vpop.permute.xlu1 %986 }
 0x201   :  { %6119 = vst [vmem:[#allocation35_spill] sm:$0xff] %v4067_v40  ;;  %v4260_v40 = vld [vmem:[%s5767_s1 + $0x7] ss:$8 sm:$0xf] }
 0x206   :  { %1314 = vrot.lane.b32.xlu2 %v3223_v44, %s2798_s12  ;;  %1646 = vrot.lane.b32.xlu0 %v4070_v11, %s2790_s2 }
 0x207   :  { %1256 = vrot.lane.b32.xlu1 %v3194_v23, %s2795_s11  ;;  %v4078_v26 = vpop.permute.xlu0 %1190 }
 0x208   :  { %6121 = vst [vmem:[#allocation11_spill] sm:$0xff] %v4078_v26  ;;  %v4080_v0 = vpop.permute.xlu2 %1114  ;;  %v4082_v63 = vpop.permute.xlu1 %992 }
 0x209   :  { %6122 = vst [vmem:[#allocation27_spill] sm:$0xff] %v4080_v0  ;;  %v6133_v0 = vmov 8  }
 0x20e   :  { %1320 = vrot.lane.b32.xlu2 %v3237_v25, %s2798_s12  ;;  %1652 = vrot.lane.b32.xlu0 %v4084_v21, %s2790_s2 }
 0x20f   :  { %1308 = vrot.lane.b32.xlu1 %v3207_v5, %s2798_s12  ;;  %v4098_v52 = vpop.permute.xlu0 %1242 }
 0x210   :  { %6124 = vst [vmem:[#allocation15_spill] sm:$0xff] %v4098_v52  ;;  %v4100_v14 = vpop.permute.xlu2 %1120  ;;  %v4102_v43 = vpop.permute.xlu1 %1044 }
 0x211   :  { %6125 = vst [vmem:[#allocation40_spill] sm:$0xff] %v4100_v14  ;;  %v1129_v56 = vsel %vm520_vm5, %v4033_v37, %v4100_v14 }
 0x212   :  { %6126 = vst [vmem:[#allocation44_spill] sm:$0xff] %v4102_v43  ;;  %v4110_v62 = vmul.f32 %v5853_v10, %v1129_v56  ;;  %v171_v56 = vadd.f32 %v3940_v30, %v6109_v39  ;;  %v196_v30 = vpop.f32.mrf.mxu3 }
 0x214   :  { %6127 = vst [vmem:[#allocation28_spill] sm:$0xff] %v4110_v62 }
 0x216   :  { %1355 = vperm.xlu2 %2720, %v4002_v46   ;;  %1621 = vperm.xlu0 %2723, %v4115_v22  }
 0x217   :  { %1312 = vrot.lane.b32.xlu1 %v6034_v53, %s2798_s12  ;;  %v4121_v51 = vpop.permute.xlu0 %1248 }
 0x218   :  { %6128 = vst [vmem:[#allocation29_spill] sm:$0xff] %v4121_v51  ;;  %v4123_v31 = vpop.permute.xlu2 %1153  ;;  %v4125_v48 = vpop.permute.xlu1 %1048 }
 0x219   :  { %6129 = vst [vmem:[#allocation30_spill] sm:$0xff] %v4123_v31 }
 0x21a   :  { %6130 = vst [vmem:[#allocation43_spill] sm:$0xff] %v4125_v48  ;;  %v217_v48 = vmax.f32 %v171_v56, 0.0 }
 0x21c   :  { %v4142_v18 = vmin.f32 %v217_v48, 6.0 }
 0x21e   :  { %1378 = vrot.lane.b32.xlu2 %v6034_v53, %s2799_s13  ;;  %2728 = vset.pattern.permute.xlu0 %v6068_v38  ;;  %v197_v53 = vadd.f32 %v196_v30, %v6107_v16  ;;  %v122_v38 = vpop.f32.mrf.mxu0 }
 0x21f   :  { %1318 = vrot.lane.b32.xlu1 %v6063_v41, %s2798_s12  ;;  %1157 = vperm.xlu0 %2728, %v4002_v46   ;;  %v4135_v10 = vpop.permute.xlu0 %1254  ;;  %v123_v48 = vadd.f32 %v122_v38, %v6109_v39 }
 0x220   :  { %6131 = vst [vmem:[#allocation10_spill] sm:$0xff] %v4135_v10  ;;  %v4137_v51 = vpop.permute.xlu2 %1178  ;;  %v4139_v8 = vpop.permute.xlu1 %1054  ;;  %2721 = vset.pattern.permute.xlu2 %v6133_v0  ;;  %v222_v56 = vmax.f32 %v197_v53, 0.0  ;;  %v6140_v53 = vmov 10  }
 0x221   :  { %6132 = vst [vmem:[#allocation36_spill] sm:$0xff] %v4137_v51  ;;  %v215_v38 = vmax.f32 %v123_v48, 0.0 }
 0x222   :  { %v4157_v14 = vmin.f32 %v222_v56, 6.0 }
 0x223   :  { %v4180_v51 = vmin.f32 %v215_v38, 6.0 }
 0x226   :  { %1384 = vrot.lane.b32.xlu2 %v6063_v41, %s2799_s13  ;;  %v124_v56 = vpop.f32.mrf.mxu0 }
 0x227   :  { %1351 = vperm.xlu1 %2719, %v3828_v55   ;;  %1714 = vrot.lane.b32.xlu0 %v4142_v18, %s2794_s10  ;;  %v4150_v59 = vpop.permute.xlu0 %1316  ;;  %v125_v25 = vadd.f32 %v124_v56, %v6107_v16 }
 0x228   :  { %6134 = vst [vmem:[#allocation33_spill] sm:$0xff] %v4150_v59  ;;  %v4152_v62 = vpop.permute.xlu2 %1182  ;;  %v4154_v0 = vpop.permute.xlu1 %1087  ;;  %v5869_v59 = vperm.slane %v4089_v45, 1 }
 0x229   :  { %6135 = vst [vmem:[#allocation39_spill] sm:$0xff] %v4152_v62  ;;  %v219_v38 = vmax.f32 %v125_v25, 0.0 }
 0x22a   :  { %6136 = vst [vmem:[#allocation16_spill] sm:$0xff] %v4154_v0 }
 0x22e   :  { %1417 = vperm.xlu2 %2721, %v3828_v55  }
 0x22f   :  { %1376 = vrot.lane.b32.xlu1 %v3164_v27, %s2799_s13  ;;  %1720 = vrot.lane.b32.xlu0 %v4157_v14, %s2794_s10  ;;  %v4164_v30 = vpop.permute.xlu0 %1322 }
 0x230   :  { %6137 = vst [vmem:[#allocation41_spill] sm:$0xff] %v4164_v30  ;;  %v4167_v10 = vpop.permute.xlu2 %1188  ;;  %v4169_v62 = vpop.permute.xlu1 %1112  ;;  %2722 = vset.pattern.permute.xlu1 %v6140_v53 }
 0x231   :  { %6138 = vst [vmem:[#allocation46_spill] sm:$0xff] %v4167_v10  ;;  %v1131_v39 = vsel %vm520_vm5, %v4169_v62, %v4033_v37  ;;  %v6155_v10 = vmov 4  }
 0x232   :  { %6139 = vst [vmem:[#allocation45_spill] sm:$0xff] %v4169_v62  ;;  %v4178_v26 = vmul.f32 %v5869_v59, %v1131_v39  ;;  %v6145_v39 = vmov 0   ;;  %v4196_v59 = vmin.f32 %v219_v38, 6.0  ;;  %v4241_v62 = vld [vmem:[%s5767_s1 + $0x1] ss:$8 sm:$0xf] }
 0x234   :  { %6141 = vst [vmem:[#allocation48_spill] sm:$0xff] %v4178_v26  ;;  %v4224_v26 = vld [vmem:[%s5767_s1] ss:$8 sm:$0xf] }
 0x235   :  { %6146 = vst [vmem:[#allocation5_spill] sm:$0xff] %v4196_v59 }
 0x236   :  { %1512 = vrot.lane.b32.xlu2 %v4013_v9, %s2792_s8 }
 0x237   :  { %1382 = vrot.lane.b32.xlu1 %v3178_v61, %s2799_s13  ;;  %1574 = vrot.lane.b32.xlu0 %v4180_v51, %s2791_s7  ;;  %v4189_v48 = vpop.permute.xlu0 %1374 }
 0x238   :  { %6142 = vst [vmem:[#allocation47_spill] sm:$0xff] %v4189_v48  ;;  %v4191_v37 = vpop.permute.xlu2 %1223  ;;  %v4193_v53 = vpop.permute.xlu1 %1118  ;;  %2725 = vset.pattern.permute.xlu2 %v6145_v39 }
 0x239   :  { %6143 = vst [vmem:[#allocation49_spill] sm:$0xff] %v4191_v37  ;;  %v934_v37 = vsel %vm317_vm1, %v3895_v12, %v3783_v2 }
 0x23a   :  { %6144 = vst [vmem:[#allocation6_spill] sm:$0xff] %v4193_v53 }
 0x23e   :  { %1516 = vrot.lane.b32.xlu2 %v4142_v18, %s2792_s8 }
 0x23f   :  { %1388 = vrot.lane.b32.xlu1 %v3194_v23, %s2799_s13  ;;  %1774 = vrot.lane.b32.xlu0 %v4196_v59, %s2793_s9  ;;  %v4204_v16 = vpop.permute.xlu0 %1380 }
 0x240   :  { %6147 = vst [vmem:[#allocation50_spill] sm:$0xff] %v4204_v16  ;;  %v4206_v56 = vpop.permute.xlu2 %1246  ;;  %v4208_v61 = vpop.permute.xlu1 %1124 }
 0x241   :  { %6148 = vst [vmem:[#allocation51_spill] sm:$0xff] %v4206_v56 }
 0x242   :  { %6149 = vst [vmem:[#allocation52_spill] sm:$0xff] %v4208_v61 }
 0x246   :  { %1522 = vrot.lane.b32.xlu2 %v4157_v14, %s2792_s8 }
 0x247   :  { %1441 = vperm.xlu1 %2722, %v3828_v55   ;;  %1784 = vrot.lane.b32.xlu0 %v4084_v21, %s2793_s9  ;;  %v4215_v25 = vpop.permute.xlu0 %1386  ;;  %v5883_v55 = vperm.slane %v4224_v26, 0 }
 0x248   :  { %6150 = vst [vmem:[#allocation53_spill] sm:$0xff] %v4215_v25  ;;  %v4217_v38 = vpop.permute.xlu2 %1252  ;;  %v4219_v48 = vpop.permute.xlu1 %1176 }
 0x249   :  { %6151 = vst [vmem:[#allocation54_spill] sm:$0xff] %v4217_v38  ;;  %v946_v53 = vmul.f32 %v5883_v55, %v934_v37  ;;  %v1066_v37 = vsel %vm452_vm2, %v4051_v15, %v4102_v43  ;;  %v904_v55 = vmul.f32 %v3698_v28, %v3207_v5 }
 0x24a   :  { %6152 = vst [vmem:[#allocation55_spill] sm:$0xff] %v4219_v48 }
 0x24b   :  { %v962_v16 = vmul.f32 %v4037_v7, %v946_v53  ;;  %v5892_v53 = vperm.slane %v4253_v60, 0  ;;  %v6156_v7 = vperm.slane %v4241_v62, 0 }
 0x24d   :  { %v970_v38 = vadd.f32 %v962_v16, %v904_v55  ;;  %v1132_v55 = vsel %vm520_vm5, %v4048_v50, %v4021_v32  ;;  %v1262_v32 = vsel %vm656_vm6, %v4098_v52, %v4206_v56  ;;  %v6161_v56 = vld [vmem:[#allocation21_spill] sm:$0xff] }
 0x24e   :  { %1582 = vrot.lane.b32.xlu2 %v4142_v18, %s2791_s7 }
 0x24f   :  { %1514 = vrot.lane.b32.xlu1 %v4070_v11, %s2792_s8  ;;  %1753 = vperm.xlu0 %2728, %v4115_v22   ;;  %v4236_v25 = vpop.permute.xlu0 %1518 }
 0x250   :  { %6153 = vst [vmem:[#allocation56_spill] sm:$0xff] %v4236_v25  ;;  %v4243_v61 = vpop.permute.xlu2 %1285  ;;  %v4245_v2 = vpop.permute.xlu1 %1180  ;;  %2724 = vset.pattern.permute.xlu1 %v6155_v10  ;;  %v1000_v10 = vsel %vm384_vm4, %v3977_v1, %v3885_v19  ;;  %v1078_v19 = vmul.f32 %v5892_v53, %v1066_v37  ;;  %v6158_v37 = vperm.slane %v4260_v40, 3 }
 0x251   :  { %6154 = vst [vmem:[#allocation57_spill] sm:$0xff] %v4245_v2  ;;  %v1012_v12 = vmul.f32 %v6156_v7, %v1000_v10  ;;  %v1196_v7 = vsel %vm588_vm3, %v4219_v48, %v4245_v2  ;;  %v935_v48 = vsel %vm317_vm1, %v3832_v13, %v6161_v56 }
 0x252   :  { %v1094_v10 = vmul.f32 %v4154_v0, %v1078_v19  ;;  %v4310_v19 = vld [vmem:[%s5767_s1 + $0x5] ss:$8 sm:$0xf] }
 0x253   :  { %v1028_v25 = vmul.f32 %v4009_v35, %v1012_v12  ;;  %v4305_v12 = vld [vmem:[%s5767_s1 + $0x6] ss:$8 sm:$0xf] }
 0x256   :  { %1588 = vrot.lane.b32.xlu2 %v4157_v14, %s2791_s7 }
 0x257   :  { %1520 = vrot.lane.b32.xlu1 %v4084_v21, %s2792_s8  ;;  %2732 = vset.pattern.permute.xlu0 %v6113_v42  ;;  %v4283_v5 = vpop.permute.xlu0 %1578  ;;  %v1036_v42 = vadd.f32 %v1028_v25, %v970_v38  ;;  %v5899_v25 = vperm.slane %v4310_v19, 0 }
 0x258   :  { %6157 = vst [vmem:[#allocation58_spill] sm:$0xff] %v4283_v5  ;;  %v1311_v43 = vpop.permute.xlu2 %1310  ;;  %1289 = vperm.xlu0 %2732, %v4002_v46   ;;  %v4286_v28 = vpop.permute.xlu1 %1186  ;;  %v6159_v5 = vperm.slane %v4089_v45, 0 }
 0x259   :  { %v1331_v16 = vsel %vm724_vm7, %v4164_v30, %v1311_v43  ;;  %v1102_v38 = vadd.f32 %v1094_v10, %v1036_v42  ;;  %v5908_v30 = vperm.slane %v4260_v40, 0  ;;  %v1210_v2 = vmul.f32 %v5899_v25, %v1196_v7 }
 0x25a   :  { %v4300_v53 = vmul.f32 %v6158_v37, %v1331_v16  ;;  %v1144_v16 = vmul.f32 %v6159_v5, %v1132_v55  ;;  %v5906_v37 = vperm.slane %v4305_v12, 0 }
 0x25c   :  { %v1160_v46 = vmul.f32 %v4123_v31, %v1144_v16  ;;  %v1276_v55 = vmul.f32 %v5906_v37, %v1262_v32  ;;  %v5907_v31 = vperm.slane %v4224_v26, 1  ;;  %v5914_v37 = vperm.slane %v4253_v60, 1 }
 0x25e   :  { %1551 = vperm.xlu2 %2725, %v4042_v4   ;;  %v1168_v7 = vadd.f32 %v1160_v46, %v1102_v38  ;;  %v1292_v52 = vmul.f32 %v4243_v61, %v1276_v55  ;;  %v933_v46 = vsel %vm317_vm1, %v6161_v56, %v3839_v24  ;;  %v5912_v56 = vperm.slane %v4224_v26, 3 }
 0x25f   :  { %1580 = vrot.lane.b32.xlu1 %v4070_v11, %s2791_s7  ;;  %v4331_v42 = vpop.permute.xlu0 %1584  ;;  %v997_v55 = vsel %vm384_vm4, %v3947_v58, %v3990_v57 }
 0x260   :  { %6160 = vst [vmem:[#allocation59_spill] sm:$0xff] %v4331_v42  ;;  %v4333_v5 = vpop.permute.xlu2 %1314  ;;  %1846 = vrot.lane.b32.xlu0 %v4142_v18, %s2795_s11  ;;  %v4337_v10 = vpop.permute.xlu1 %1219 }
 0x261   :  { %v1329_v16 = vsel %vm724_vm7, %v1311_v43, %v4333_v5  ;;  %v1226_v25 = vmul.f32 %v4337_v10, %v1210_v2  ;;  %v6162_v2 = vperm.slane %v4224_v26, 0 }
 0x262   :  { %v1346_v42 = vmul.f32 %v5908_v30, %v1329_v16  ;;  %v951_v16 = vmul.f32 %v5907_v31, %v933_v46  ;;  %v909_v31 = vmul.f32 %v3992_v49, %v3223_v44  ;;  %v1067_v44 = vsel %vm452_vm2, %v4007_v29, %v4024_v34 }
 0x263   :  { %v1234_v32 = vadd.f32 %v1226_v25, %v1168_v7  ;;  %v950_v38 = vmul.f32 %v6162_v2, %v935_v48  ;;  %v929_v25 = vsel %vm317_vm1, %v4026_v3, %v3832_v13  ;;  %v908_v13 = vmul.f32 %v3992_v49, %v3164_v27 }
 0x264   :  { %v5911_v7 = vperm.slane %v4224_v26, 2  ;;  %v967_v46 = vmul.f32 %v3952_v20, %v951_v16  ;;  %v953_v30 = vmul.f32 %v5912_v56, %v929_v25  ;;  %v911_v16 = vmul.f32 %v3992_v49, %v3194_v23 }
 0x265   :  { %v4357_v43 = vadd.f32 %v1292_v52, %v1234_v32  ;;  %v931_v52 = vsel %vm317_vm1, %v3839_v24, %v4026_v3  ;;  %v966_v32 = vmul.f32 %v3952_v20, %v950_v38  ;;  %v910_v38 = vmul.f32 %v3992_v49, %v6063_v41 }
 0x266   :  { %1644 = vrot.lane.b32.xlu2 %v4013_v9, %s2790_s2  ;;  %v952_v27 = vmul.f32 %v5911_v7, %v931_v52  ;;  %v5915_v2 = vperm.slane %v4253_v60, 3  ;;  %v999_v25 = vsel %vm384_vm4, %v4053_v36, %v3947_v58  ;;  %v1001_v41 = vsel %vm384_vm4, %v4082_v63, %v4053_v36 }
 0x267   :  { %1586 = vrot.lane.b32.xlu1 %v4084_v21, %s2791_s7  ;;  %v4376_v48 = vpop.permute.xlu0 %1492  ;;  %2727 = vset.pattern.permute.xlu2 %v6117_v47  ;;  %v6165_v47 = vperm.slane %v4241_v62, 2  ;;  %v1065_v23 = vsel %vm452_vm2, %v4024_v34, %v4035_v54  ;;  %v995_v49 = vsel %vm384_vm4, %v3990_v57, %v4082_v63  ;;  %v1061_v58 = vsel %vm452_vm2, %v4139_v8, %v4007_v29 }
 0x268   :  { %6163 = vst [vmem:[#allocation21_spill] sm:$0xff] %v4376_v48  ;;  %v4387_v24 = vpop.permute.xlu2 %1320  ;;  %1852 = vrot.lane.b32.xlu0 %v4157_v14, %s2795_s11  ;;  %v4391_v3 = vpop.permute.xlu1 %1244  ;;  %v1063_v36 = vsel %vm452_vm2, %v4035_v54, %v4139_v8  ;;  %v968_v52 = vmul.f32 %v3952_v20, %v952_v27  ;;  %v1007_v34 = vperm.slane %v4241_v62, 3  ;;  %v6166_v57 = vperm.slane %v4253_v60, 0 }
 0x269   :  { %6164 = vst [vmem:[#allocation60_spill] sm:$0xff] %v4391_v3  ;;  %v1018_v3 = vmul.f32 %v6165_v47, %v997_v55  ;;  %v974_v47 = vadd.f32 %v966_v32, %v908_v13  ;;  %v969_v55 = vmul.f32 %v3952_v20, %v953_v30  ;;  %v5913_v13 = vperm.slane %v4253_v60, 2 }
 0x26a   :  { %v1082_v63 = vmul.f32 %v6166_v57, %v1067_v44  ;;  %v6167_v29 = vperm.slane %v4241_v62, 1  ;;  %v6168_v7 = vperm.slane %v4241_v62, 0  ;;  %v975_v8 = vadd.f32 %v967_v46, %v909_v31 }
 0x26b   :  { %v1083_v20 = vmul.f32 %v5914_v37, %v1065_v23  ;;  %v1019_v30 = vmul.f32 %v1007_v34, %v995_v49  ;;  %v1084_v27 = vmul.f32 %v5913_v13, %v1063_v36  ;;  %v1085_v56 = vmul.f32 %v5915_v2, %v1061_v58 }
 0x26c   :  { %v1017_v32 = vmul.f32 %v6167_v29, %v999_v25  ;;  %v1016_v54 = vmul.f32 %v6168_v7, %v1001_v41  ;;  %v976_v49 = vadd.f32 %v968_v52, %v910_v38  ;;  %v977_v36 = vadd.f32 %v969_v55, %v911_v16  ;;  %v4505_v55 = vld [vmem:[%s5767_s1 + $0x20] ss:$8 sm:$0xf] }
 0x26d   :  { %v1098_v29 = vmul.f32 %v4065_v33, %v1082_v63  ;;  %v1099_v13 = vmul.f32 %v4065_v33, %v1083_v20  ;;  %v6176_v63 = vld [vmem:[#allocation17_spill] sm:$0xff]  ;;  %v5935_v48 = vperm.slane %v4310_v19, 1 }
 0x26e   :  { %1650 = vrot.lane.b32.xlu2 %v3995_v17, %s2790_s2 }
 0x26f   :  { %1497 = vperm.xlu1 %2724, %v4115_v22  }
 0x270   :  { %v4457_v44 = vpop.permute.xlu2 %1355  ;;  %1706 = vrot.lane.b32.xlu0 %v4180_v51, %s2794_s10  ;;  %v1026_v25 = vpop.permute.xlu0 %1025 }
 0x271   :  { %v4462_v7 = vmul.f32 %v4457_v44, %v1346_v42  ;;  %v4466_v31 = vmul.f32 %v4457_v44, %v4300_v53  ;;  %v1032_v46 = vmul.f32 %v1026_v25, %v1016_v54  ;;  %v1033_v41 = vmul.f32 %v1026_v25, %v1017_v32  ;;  %v4468_v23 = vpop.permute.xlu1 %1250 }
 0x272   :  { %6171 = vst [vmem:[#allocation63_spill] sm:$0xff] %v4468_v23  ;;  %v1034_v58 = vmul.f32 %v1026_v25, %v1018_v3  ;;  %v1035_v57 = vmul.f32 %v1026_v25, %v1019_v30  ;;  %v1100_v42 = vmul.f32 %v4065_v33, %v1084_v27  ;;  %v6178_v30 = vld [vmem:[#allocation35_spill] sm:$0xff]  ;;  %v6179_v25 = vmov 2   ;;  %v6202_v23 = vld [vmem:[#allocation40_spill] sm:$0xff] }
 0x273   :  { %6169 = vst [vmem:[#allocation61_spill] sm:$0xff] %v4462_v7  ;;  %v1040_v37 = vadd.f32 %v1032_v46, %v974_v47  ;;  %v1041_v2 = vadd.f32 %v1033_v41, %v975_v8  ;;  %v1101_v7 = vmul.f32 %v4065_v33, %v1085_v56  ;;  %v6177_v8 = vld [vmem:[#allocation23_spill] sm:$0xff]  ;;  %v994_v27 = vsel %vm384_vm4, %v6178_v30, %v3977_v1  ;;  %v6182_v46 = vld [vmem:[#allocation50_spill] sm:$0xff] }
 0x274   :  { %6170 = vst [vmem:[#allocation62_spill] sm:$0xff] %v4466_v31  ;;  %v1042_v53 = vadd.f32 %v1034_v58, %v976_v49  ;;  %v1043_v31 = vadd.f32 %v1035_v57, %v977_v36  ;;  %v928_v20 = vsel %vm317_vm1, %v6177_v8, %v6176_v63  ;;  %v6183_v1 = vperm.slane %v4224_v26, 3 }
 0x275   :  { %v4474_v54 = vadd.f32 %v1098_v29, %v1040_v37  ;;  %v4476_v32 = vadd.f32 %v1099_v13, %v1041_v2  ;;  %v5916_v37 = vperm.slane %v4305_v12, 2  ;;  %v6174_v2 = vld [vmem:[#allocation54_spill] sm:$0xff]  ;;  %v5918_v13 = vperm.slane %v4505_v55, 1 }
 0x276   :  { %1617 = vperm.xlu2 %2727, %v4042_v4   ;;  %v4479_v3 = vadd.f32 %v1100_v42, %v1042_v53  ;;  %v4481_v38 = vadd.f32 %v1101_v7, %v1043_v31  ;;  %v949_v36 = vmul.f32 %v6183_v1, %v928_v20  ;;  %v1015_v58 = vmul.f32 %v1007_v34, %v994_v27  ;;  %v6185_v29 = vld [vmem:[#allocation38_spill] sm:$0xff]  ;;  %v6188_v20 = vld [vmem:[#allocation37_spill] sm:$0xff] }
 0x277   :  { %2726 = vset.pattern.permute.xlu1 %v6145_v39  ;;  %v1060_v42 = vsel %vm452_vm2, %v6185_v29, %v4051_v15  ;;  %v1139_v53 = vperm.slane %v4089_v45, 3  ;;  %v6189_v34 = vld [vmem:[#allocation22_spill] sm:$0xff] }
 0x278   :  { %1555 = vperm.xlu1 %2726, %v4115_v22   ;;  %v4485_v16 = vpop.permute.xlu2 %1378  ;;  %1906 = vrot.lane.b32.xlu0 %v4196_v59, %s2798_s12  ;;  %v4489_v33 = vpop.permute.xlu0 %1646  ;;  %v907_v27 = vmul.f32 %v6189_v34, %v6188_v20 }
 0x279   :  { %6172 = vst [vmem:[#allocation64_spill] sm:$0xff] %v4489_v33  ;;  %v4492_v56 = vpop.permute.xlu1 %1256  ;;  %v6199_v33 = vld [vmem:[#allocation55_spill] sm:$0xff] }
 0x27a   :  { %6173 = vst [vmem:[#allocation65_spill] sm:$0xff] %v4492_v56  ;;  %v1259_v47 = vsel %vm656_vm6, %v6174_v2, %v4492_v56  ;;  %v6197_v56 = vld [vmem:[#allocation30_spill] sm:$0xff] }
 0x27b   :  { %v4500_v52 = vmul.f32 %v5916_v37, %v1259_v47  ;;  %v6186_v47 = vld [vmem:[#allocation9_spill] sm:$0xff]  ;;  %v6187_v37 = vld [vmem:[#allocation6_spill] sm:$0xff] }
 0x27c   :  { %v965_v63 = vmul.f32 %v6186_v47, %v949_v36  ;;  %v1126_v39 = vsel %vm520_vm5, %v6187_v37, %v4048_v50  ;;  %v1205_v36 = vperm.slane %v4310_v19, 3 }
 0x27d   :  { %6175 = vst [vmem:[#allocation66_spill] sm:$0xff] %v4500_v52  ;;  %v1147_v15 = vmul.f32 %v1139_v53, %v1126_v39  ;;  %v6194_v39 = vld [vmem:[#allocation39_spill] sm:$0xff]  ;;  %v6196_v52 = vld [vmem:[#allocation10_spill] sm:$0xff] }
 0x27e   :  { %1510 = vrot.lane.b32.xlu2 %v4196_v59, %s2792_s8  ;;  %v6200_v59 = vld [vmem:[#allocation46_spill] sm:$0xff] }
 0x27f   :  { %2730 = vset.pattern.permute.xlu2 %v6179_v25  ;;  %v1163_v2 = vmul.f32 %v6197_v56, %v1147_v15  ;;  %v1198_v4 = vsel %vm588_vm3, %v6200_v59, %v6199_v33  ;;  %v6204_v33 = vperm.slane %v4305_v12, 3 }
 0x280   :  { %1648 = vrot.lane.b32.xlu1 %v4142_v18, %s2790_s2  ;;  %v4521_v7 = vpop.permute.xlu2 %1384  ;;  %1916 = vrot.lane.b32.xlu0 %v4084_v21, %s2798_s12  ;;  %v4525_v31 = vpop.permute.xlu0 %1652  ;;  %v1213_v56 = vmul.f32 %v1205_v36, %v1198_v4 }
 0x281   :  { %6180 = vst [vmem:[#allocation17_spill] sm:$0xff] %v4521_v7  ;;  %v1393_v41 = vsel %vm792_vm8, %v6182_v46, %v4521_v7  ;;  %v4531_v49 = vpop.permute.xlu1 %1308  ;;  %2729 = vset.pattern.permute.xlu1 %v6179_v25  ;;  %v6198_v7 = vperm.slane %v4310_v19, 0 }
 0x282   :  { %6181 = vst [vmem:[#allocation23_spill] sm:$0xff] %v4525_v31  ;;  %v4538_v57 = vmul.f32 %v5918_v13, %v1393_v41  ;;  %v6190_v41 = vperm.slane %v4253_v60, 3  ;;  %v1031_v13 = vmul.f32 %v4009_v35, %v1015_v58  ;;  %v973_v31 = vadd.f32 %v965_v63, %v907_v27  ;;  %v6193_v58 = vld [vmem:[#allocation11_spill] sm:$0xff] }
 0x283   :  { %v1229_v4 = vmul.f32 %v4337_v10, %v1213_v56 }
 0x284   :  { %6184 = vst [vmem:[#allocation35_spill] sm:$0xff] %v4538_v57  ;;  %v1081_v1 = vmul.f32 %v6190_v41, %v1060_v42  ;;  %v6192_v42 = vld [vmem:[#allocation36_spill] sm:$0xff] }
 0x285   :  { %v1199_v41 = vsel %vm588_vm3, %v6193_v58, %v6192_v42  ;;  %v1197_v63 = vsel %vm588_vm3, %v6192_v42, %v6194_v39 }
 0x286   :  { %1712 = vrot.lane.b32.xlu2 %v4070_v11, %s2794_s10  ;;  %v1097_v57 = vmul.f32 %v4154_v0, %v1081_v1  ;;  %v1039_v1 = vadd.f32 %v1031_v13, %v973_v31  ;;  %v6195_v11 = vld [vmem:[#allocation15_spill] sm:$0xff]  ;;  %v1217_v42 = vmul.f32 %v1205_v36, %v1199_v41  ;;  %v1214_v13 = vmul.f32 %v6198_v7, %v1197_v63 }
 0x287   :  { %v1264_v25 = vsel %vm656_vm6, %v6196_v52, %v6195_v11  ;;  %v6203_v11 = vld [vmem:[#allocation45_spill] sm:$0xff]  ;;  %v1193_v7 = vsel %vm588_vm3, %v4286_v28, %v6193_v58  ;;  %v5936_v63 = vperm.slane %v4310_v19, 2  ;;  %v6206_v52 = vperm.slane %v4089_v45, 0 }
 0x288   :  { %1654 = vrot.lane.b32.xlu1 %v4157_v14, %s2790_s2  ;;  %v4561_v50 = vpop.permute.xlu2 %1417  ;;  %1885 = vperm.xlu0 %2732, %v4115_v22   ;;  %v4564_v20 = vpop.permute.xlu0 %1621  ;;  %v1105_v31 = vadd.f32 %v1097_v57, %v1039_v1  ;;  %v1279_v41 = vmul.f32 %v6204_v33, %v1264_v25 }
 0x289   :  { %6191 = vst [vmem:[#allocation50_spill] sm:$0xff] %v4564_v20  ;;  %v4574_v27 = vpop.permute.xlu1 %1312  ;;  %v1195_v20 = vsel %vm588_vm3, %v6194_v39, %v4286_v28  ;;  %v6201_v39 = vld [vmem:[#allocation52_spill] sm:$0xff]  ;;  %v1216_v25 = vmul.f32 %v5936_v63, %v1193_v7 }
 0x28a   :  { %v1127_v0 = vsel %vm520_vm5, %v6202_v23, %v6201_v39  ;;  %v1133_v15 = vsel %vm520_vm5, %v6201_v39, %v6203_v11  ;;  %v1215_v57 = vmul.f32 %v5935_v48, %v1195_v20  ;;  %v6205_v23 = vld [vmem:[#allocation49_spill] sm:$0xff]  ;;  %v1171_v11 = vadd.f32 %v1163_v2, %v1105_v31 }
 0x28b   :  { %v1230_v1 = vmul.f32 %v6205_v23, %v1214_v13  ;;  %v1233_v39 = vmul.f32 %v6205_v23, %v1217_v42  ;;  %v1148_v28 = vmul.f32 %v6206_v52, %v1133_v15  ;;  %v1151_v58 = vmul.f32 %v1139_v53, %v1127_v0  ;;  %v6209_v53 = vld [vmem:[#allocation13_spill] sm:$0xff] }
 0x28c   :  { %v6208_v48 = vmov 8   ;;  %v1231_v42 = vmul.f32 %v6205_v23, %v1215_v57  ;;  %v1336_v2 = vperm.slane %v4260_v40, 2  ;;  %v1335_v0 = vperm.slane %v4260_v40, 1  ;;  %v6210_v13 = vld [vmem:[#allocation41_spill] sm:$0xff]  ;;  %v6211_v57 = vld [vmem:[#allocation48_spill] sm:$0xff] }
 0x28e   :  { %1718 = vrot.lane.b32.xlu2 %v4084_v21, %s2794_s10 }
 0x290   :  { %1508 = vrot.lane.b32.xlu1 %v4180_v51, %s2792_s8  ;;  %v4621_v33 = vpop.permute.xlu2 %1512  ;;  %2736 = vset.pattern.permute.xlu0 %v6208_v48  ;;  %v6212_v48 = vld [vmem:[#allocation28_spill] sm:$0xff] }
 0x291   :  { %6207 = vst [vmem:[#allocation38_spill] sm:$0xff] %v4621_v33  ;;  %v1319_v52 = vpop.permute.xlu1 %1318  ;;  %1421 = vperm.xlu0 %2736, %v6209_v53   ;;  %v1158_v36 = vpop.permute.xlu0 %1157  ;;  %v1232_v33 = vmul.f32 %v6205_v23, %v1216_v25  ;;  %v1400_v23 = vperm.slane %v4505_v55, 0  ;;  %v1330_v25 = vsel %vm724_vm7, %v4387_v24, %v4531_v49 }
 0x292   :  { %v1325_v31 = vsel %vm724_vm7, %v1319_v52, %v6210_v13  ;;  %v1327_v15 = vsel %vm724_vm7, %v4333_v5, %v1319_v52  ;;  %v1164_v7 = vmul.f32 %v1158_v36, %v1148_v28  ;;  %v1165_v63 = vmul.f32 %v1158_v36, %v6211_v57 }
 0x293   :  { %v1347_v56 = vmul.f32 %v1335_v0, %v1327_v15  ;;  %v1348_v20 = vmul.f32 %v1336_v2, %v1325_v31  ;;  %v1166_v53 = vmul.f32 %v1158_v36, %v6212_v48  ;;  %v1167_v21 = vmul.f32 %v1158_v36, %v1151_v58 }
 0x294   :  { %v1328_v13 = vsel %vm724_vm7, %v4531_v49, %v4574_v27  ;;  %v1172_v5 = vadd.f32 %v1164_v7, %v4474_v54  ;;  %v1173_v28 = vadd.f32 %v1165_v63, %v4476_v32  ;;  %v1237_v63 = vadd.f32 %v1229_v4, %v1171_v11 }
 0x295   :  { %v4649_v52 = vmul.f32 %v4457_v44, %v1347_v56  ;;  %v4652_v15 = vmul.f32 %v4457_v44, %v1348_v20  ;;  %v1174_v48 = vadd.f32 %v1166_v53, %v4479_v3  ;;  %v1175_v58 = vadd.f32 %v1167_v21, %v4481_v38  ;;  %v6213_v44 = vld [vmem:[#allocation47_spill] sm:$0xff]  ;;  %v6214_v20 = vld [vmem:[#allocation53_spill] sm:$0xff]  ;;  %v6218_v53 = vld [vmem:[#allocation32_spill] sm:$0xff] }
 0x296   :  { %1687 = vperm.xlu2 %2730, %v4115_v22   ;;  %v4662_v54 = vadd.f32 %v1230_v1, %v1172_v5  ;;  %v4664_v32 = vadd.f32 %v1231_v42, %v1173_v28  ;;  %v1394_v3 = vsel %vm792_vm8, %v6213_v44, %v4485_v16  ;;  %v1396_v49 = vsel %vm792_vm8, %v6214_v20, %v6213_v44  ;;  %v6217_v56 = vld [vmem:[#allocation7_spill] sm:$0xff] }
 0x297   :  { %v4670_v21 = vadd.f32 %v1232_v33, %v1174_v48  ;;  %v4672_v38 = vadd.f32 %v1233_v39, %v1175_v58  ;;  %v6215_v1 = vperm.slane %v4260_v40, 0  ;;  %v1295_v42 = vmul.f32 %v4243_v61, %v1279_v41 }
 0x298   :  { %1710 = vrot.lane.b32.xlu1 %v4013_v9, %s2794_s10  ;;  %v4682_v11 = vpop.permute.xlu2 %1516  ;;  %v6216_v33 = vperm.slane %v4260_v40, 3  ;;  %v1408_v7 = vmul.f32 %v1400_v23, %v1394_v3  ;;  %v6219_v41 = vperm.slane %v4505_v55, 3 }
 0x299   :  { %v1342_v36 = vmul.f32 %v6215_v1, %v1328_v13  ;;  %v4687_v39 = vpop.permute.xlu1 %1351  ;;  %1978 = vrot.lane.b32.xlu0 %v4142_v18, %s2799_s13  ;;  %v4691_v31 = vpop.permute.xlu0 %1714  ;;  %v932_v13 = vsel %vm317_vm1, %v6218_v53, %v6217_v56  ;;  %v1303_v28 = vadd.f32 %v1295_v42, %v1237_v63  ;;  %v930_v1 = vsel %vm317_vm1, %v6217_v56, %v6177_v8 }
 0x29a   :  { %v1345_v4 = vmul.f32 %v6216_v33, %v1330_v25  ;;  %v1411_v5 = vmul.f32 %v6219_v41, %v1396_v49  ;;  %v1424_v58 = vmul.f32 %v4561_v50, %v1408_v7  ;;  %v6221_v49 = vld [vmem:[#allocation26_spill] sm:$0xff]  ;;  %v6222_v42 = vmov 3  }
 0x29b   :  { %v1358_v57 = vmul.f32 %v4687_v39, %v1342_v36  ;;  %v6220_v36 = vperm.slane %v4224_v26, 1  ;;  %v996_v63 = vsel %vm384_vm4, %v6221_v49, %v6178_v30  ;;  %v6224_v56 = vperm.slane %v4224_v26, 2 }
 0x29c   :  { %v1361_v48 = vmul.f32 %v4687_v39, %v1345_v4  ;;  %v1427_v44 = vmul.f32 %v4561_v50, %v1411_v5  ;;  %v6226_v5 = vld [vmem:[#allocation43_spill] sm:$0xff] }
 0x29d   :  { %v1366_v25 = vadd.f32 %v1358_v57, %v4357_v43  ;;  %v947_v33 = vmul.f32 %v6220_v36, %v932_v13  ;;  %v6223_v57 = vld [vmem:[#allocation18_spill] sm:$0xff]  ;;  %v948_v53 = vmul.f32 %v6224_v56, %v930_v1  ;;  %v6225_v13 = vperm.slane %v4241_v62, 2 }
 0x29e   :  { %v1369_v3 = vadd.f32 %v1361_v48, %v1303_v28  ;;  %1772 = vrot.lane.b32.xlu2 %v4180_v51, %s2793_s9  ;;  %v998_v30 = vsel %vm384_vm4, %v6223_v57, %v6221_v49  ;;  %v6227_v28 = vld [vmem:[#allocation44_spill] sm:$0xff]  ;;  %v1062_v26 = vsel %vm452_vm2, %v6226_v5, %v6185_v29  ;;  %v6229_v49 = vperm.slane %v4241_v62, 1 }
 0x29f   :  { %v4716_v43 = vadd.f32 %v1424_v58, %v1366_v25  ;;  %2731 = vset.pattern.permute.xlu2 %v6222_v42  ;;  %v963_v7 = vmul.f32 %v6186_v47, %v947_v33  ;;  %v1014_v41 = vmul.f32 %v6225_v13, %v996_v63  ;;  %v1064_v48 = vsel %vm452_vm2, %v6227_v28, %v6226_v5  ;;  %v6231_v28 = vld [vmem:[#allocation27_spill] sm:$0xff]  ;;  %v6232_v5 = vld [vmem:[#allocation24_spill] sm:$0xff] }
 0x2a0   :  { %v4719_v4 = vadd.f32 %v1427_v44, %v1369_v3  ;;  %1716 = vrot.lane.b32.xlu1 %v3995_v17, %s2794_s10  ;;  %v4724_v8 = vpop.permute.xlu2 %1522  ;;  %v6228_v44 = vld [vmem:[#allocation42_spill] sm:$0xff]  ;;  %v964_v36 = vmul.f32 %v6186_v47, %v948_v53  ;;  %v1013_v63 = vmul.f32 %v6229_v49, %v998_v30  ;;  %v6230_v56 = vperm.slane %v4253_v60, 1  ;;  %v6235_v53 = vld [vmem:[#allocation16_spill] sm:$0xff]  ;;  %v6238_v49 = vld [vmem:[#allocation57_spill] sm:$0xff] }
 0x2a1   :  { %v4738_v58 = vpop.permute.xlu1 %1376  ;;  %1984 = vrot.lane.b32.xlu0 %v4157_v14, %s2799_s13  ;;  %v4742_v25 = vpop.permute.xlu0 %1720  ;;  %v905_v3 = vmul.f32 %v6189_v34, %v6228_v44  ;;  %v1128_v29 = vsel %vm520_vm5, %v6231_v28, %v6187_v37  ;;  %v906_v44 = vmul.f32 %v6189_v34, %v6232_v5  ;;  %v6233_v47 = vld [vmem:[#allocation14_spill] sm:$0xff] }
 0x2a2   :  { %v1395_v1 = vsel %vm792_vm8, %v4738_v58, %v6182_v46  ;;  %v1079_v13 = vmul.f32 %v6230_v56, %v1064_v48  ;;  %v1030_v46 = vmul.f32 %v4009_v35, %v1014_v41  ;;  %v1130_v62 = vsel %vm520_vm5, %v6233_v47, %v6231_v28 }
 0x2a3   :  { %v4755_v33 = vmul.f32 %v1400_v23, %v1395_v1  ;;  %v971_v57 = vadd.f32 %v963_v7, %v905_v3  ;;  %v6234_v23 = vperm.slane %v4253_v60, 2  ;;  %v1029_v30 = vmul.f32 %v4009_v35, %v1013_v63  ;;  %v6237_v1 = vld [vmem:[#allocation25_spill] sm:$0xff] }
 0x2a4   :  { %v1095_v48 = vmul.f32 %v6235_v53, %v1079_v13  ;;  %v972_v37 = vadd.f32 %v964_v36, %v906_v44  ;;  %v6236_v41 = vperm.slane %v4089_v45, 2  ;;  %v1194_v56 = vsel %vm588_vm3, %v6238_v49, %v6237_v1  ;;  %v6240_v36 = vld [vmem:[#allocation63_spill] sm:$0xff] }
 0x2a5   :  { %v1080_v7 = vmul.f32 %v6234_v23, %v1062_v26  ;;  %v6239_v60 = vperm.slane %v4089_v45, 1  ;;  %v1037_v35 = vadd.f32 %v1029_v30, %v971_v57  ;;  %v1192_v63 = vsel %vm588_vm3, %v6237_v1, %v6200_v59  ;;  %v6241_v13 = vld [vmem:[#allocation51_spill] sm:$0xff]  ;;  %v6243_v45 = vld [vmem:[#allocation10_spill] sm:$0xff] }
 0x2a6   :  { %1782 = vrot.lane.b32.xlu2 %v3995_v17, %s2793_s9  ;;  %v1146_v3 = vmul.f32 %v6236_v41, %v1128_v29  ;;  %v1260_v28 = vsel %vm656_vm6, %v6241_v13, %v6240_v36  ;;  %v6242_v29 = vld [vmem:[#allocation12_spill] sm:$0xff]  ;;  %v1038_v44 = vadd.f32 %v1030_v46, %v972_v37  ;;  %v1269_v47 = vperm.slane %v4305_v12, 1  ;;  %v6244_v23 = vld [vmem:[#allocation30_spill] sm:$0xff]  ;;  %v6247_v13 = vld [vmem:[#allocation33_spill] sm:$0xff] }
 0x2a7   :  { %v1096_v34 = vmul.f32 %v6235_v53, %v1080_v7  ;;  %v1145_v26 = vmul.f32 %v6239_v60, %v1130_v62  ;;  %v1258_v57 = vsel %vm656_vm6, %v6240_v36, %v6243_v45  ;;  %v1103_v30 = vadd.f32 %v1095_v48, %v1037_v35 }
 0x2a8   :  { %1683 = vperm.xlu1 %2729, %v6242_v29   ;;  %v4796_v5 = vpop.permute.xlu2 %1582  ;;  %v6245_v53 = vperm.slane %v4310_v19, 1  ;;  %v6246_v46 = vperm.slane %v4310_v19, 2  ;;  %v1162_v49 = vmul.f32 %v6244_v23, %v1146_v3  ;;  %v1277_v60 = vmul.f32 %v1269_v47, %v1260_v28 }
 0x2a9   :  { %v1383_v62 = vpop.permute.xlu1 %1382  ;;  %1842 = vrot.lane.b32.xlu0 %v4013_v9, %s2795_s11  ;;  %v4805_v59 = vpop.permute.xlu0 %1574  ;;  %v1161_v7 = vmul.f32 %v6244_v23, %v1145_v26  ;;  %v1104_v1 = vadd.f32 %v1096_v34, %v1038_v44  ;;  %v1324_v26 = vsel %vm724_vm7, %v6247_v13, %v4387_v24  ;;  %v6248_v48 = vperm.slane %v4305_v12, 2  ;;  %v6250_v23 = vld [vmem:[#allocation5_spill] sm:$0xff] }
 0x2aa   :  { %v1211_v41 = vmul.f32 %v6245_v53, %v1194_v56  ;;  %v1212_v37 = vmul.f32 %v6246_v46, %v1192_v63  ;;  %v1402_v56 = vperm.slane %v4505_v55, 2  ;;  %v1326_v34 = vsel %vm724_vm7, %v4574_v27, %v6247_v13  ;;  %v6253_v46 = vld [vmem:[#allocation17_spill] sm:$0xff] }
 0x2ab   :  { %v1278_v35 = vmul.f32 %v6248_v48, %v1258_v57  ;;  %v1390_v3 = vsel %vm792_vm8, %v1383_v62, %v6214_v20  ;;  %v1392_v24 = vsel %vm792_vm8, %v4485_v16, %v1383_v62  ;;  %v1170_v63 = vadd.f32 %v1162_v49, %v1104_v1  ;;  %v4844_v20 = vld [vmem:[%s5767_s1] ss:$8 sm:$0xf] }
 0x2ac   :  { %v1227_v36 = vmul.f32 %v4337_v10, %v1211_v41  ;;  %v1228_v19 = vmul.f32 %v4337_v10, %v1212_v37  ;;  %v1344_v28 = vmul.f32 %v1336_v2, %v1324_v26  ;;  %v1169_v10 = vadd.f32 %v1161_v7, %v1103_v30  ;;  %v6254_v26 = vld [vmem:[#allocation38_spill] sm:$0xff] }
 0x2ad   :  { %v1293_v44 = vmul.f32 %v4243_v61, %v1277_v60  ;;  %v1294_v45 = vmul.f32 %v4243_v61, %v1278_v35  ;;  %v1343_v27 = vmul.f32 %v1335_v0, %v1326_v34  ;;  %v6249_v16 = vperm.slane %v4505_v55, 1 }
 0x2ae   :  { %1749 = vperm.xlu2 %2731, %v6242_v29   ;;  %v1410_v62 = vmul.f32 %v1402_v56, %v1390_v3  ;;  %v1235_v7 = vadd.f32 %v1227_v36, %v1169_v10  ;;  %v1236_v30 = vadd.f32 %v1228_v19, %v1170_v63  ;;  %v6252_v0 = vmov 5   ;;  %v6255_v63 = vld [vmem:[#allocation21_spill] sm:$0xff] }
 0x2af   :  { %v1409_v57 = vmul.f32 %v6249_v16, %v1392_v24  ;;  %v1359_v53 = vmul.f32 %v4687_v39, %v1343_v27  ;;  %v1360_v41 = vmul.f32 %v4687_v39, %v1344_v28  ;;  %v5940_v60 = vperm.slane %v4844_v20, 2 }
 0x2b0   :  { %1576 = vrot.lane.b32.xlu1 %v6250_v23, %s2791_s7  ;;  %v4850_v2 = vpop.permute.xlu2 %1588  ;;  %v1301_v49 = vadd.f32 %v1293_v44, %v1235_v7  ;;  %v1302_v13 = vadd.f32 %v1294_v45, %v1236_v30  ;;  %v1526_v39 = vsel %vm317_vm1, %v6254_v26, %v4682_v11  ;;  %v1426_v35 = vmul.f32 %v4561_v50, %v1410_v62  ;;  %v2779_v7 = vld [vmem:[%s5766_s4] sm:$0xff] }
 0x2b1   :  { %v1389_v61 = vpop.permute.xlu1 %1388  ;;  %2017 = vperm.xlu0 %2736, %v4115_v22   ;;  %v4853_v40 = vpop.permute.xlu0 %1774  ;;  %2733 = vset.pattern.permute.xlu1 %v6252_v0  ;;  %v1425_v48 = vmul.f32 %v4561_v50, %v1409_v57  ;;  %v1502_v50 = vmul.f32 %v6255_v63, %v4142_v18  ;;  %v6256_v44 = vmov 10  }
 0x2b2   :  { %6251 = vst [vmem:[#allocation9_spill] sm:$0xff] %v4853_v40  ;;  %v1391_v37 = vsel %vm792_vm8, %v6253_v46, %v1389_v61  ;;  %v4864_v1 = vsel %vm792_vm8, %v1389_v61, %v4738_v58  ;;  %v1367_v19 = vadd.f32 %v1359_v53, %v1301_v49  ;;  %v1368_v34 = vadd.f32 %v1360_v41, %v1302_v13 }
 0x2b3   :  { %v4867_v36 = vmul.f32 %v1402_v56, %v1391_v37  ;;  %v1544_v58 = vmul.f32 %v5940_v60, %v1526_v39 }
 0x2b4   :  { %v1433_v56 = vadd.f32 %v1425_v48, %v1367_v19  ;;  %v1434_v3 = vadd.f32 %v1426_v35, %v1368_v34  ;;  %v6258_v34 = vld [vmem:[#allocation54_spill] sm:$0xff] }
 0x2b6   :  { %1642 = vrot.lane.b32.xlu2 %v6250_v23, %s2790_s2 }
 0x2b7   :  { %2734 = vset.pattern.permute.xlu2 %v6252_v0 }
 0x2b8   :  { %1780 = vrot.lane.b32.xlu1 %v4142_v18, %s2793_s9  ;;  %v4882_v24 = vpop.permute.xlu2 %1551 }
 0x2b9   :  { %v1560_v28 = vmul.f32 %v4882_v24, %v1544_v58  ;;  %v1442_v10 = vpop.permute.xlu1 %1441  ;;  %2740 = vset.pattern.permute.xlu0 %v6256_v44  ;;  %v4888_v45 = vpop.permute.xlu0 %1784  ;;  %v6259_v58 = vld [vmem:[#allocation29_spill] sm:$0xff] }
 0x2ba   :  { %6257 = vst [vmem:[#allocation6_spill] sm:$0xff] %v4888_v45  ;;  %v1448_v27 = vadd.f32 %v1442_v10, %v4716_v43  ;;  %v1449_v16 = vadd.f32 %v1442_v10, %v1433_v56  ;;  %v1450_v57 = vadd.f32 %v1442_v10, %v1434_v3  ;;  %v1451_v62 = vadd.f32 %v1442_v10, %v4719_v4  ;;  %v6260_v3 = vld [vmem:[#allocation60_spill] sm:$0xff] }
 0x2bb   :  { %845 = vperm.xlu0 %2740, %v2779_v7   ;;  %v4895_v30 = vadd.f32 %v1560_v28, %v1502_v50  ;;  %v1261_v56 = vsel %vm656_vm6, %v6259_v58, %v6258_v34  ;;  %v1263_v50 = vsel %vm656_vm6, %v6260_v3, %v6259_v58  ;;  %v6261_v28 = vld [vmem:[#allocation65_spill] sm:$0xff] }
 0x2bc   :  { %v1456_v61 = vmax.f32 %v1448_v27, 0.0  ;;  %v1457_v53 = vmax.f32 %v1449_v16, 0.0  ;;  %v1458_v41 = vmax.f32 %v1450_v57, 0.0  ;;  %v1459_v46 = vmax.f32 %v1451_v62, 0.0  ;;  %v6262_v27 = vld [vmem:[#allocation34_spill] sm:$0xff] }
 0x2bd   :  { %v1265_v10 = vsel %vm656_vm6, %v6261_v28, %v6260_v3  ;;  %v1281_v16 = vmul.f32 %v1269_v47, %v1261_v56  ;;  %v6263_v62 = vperm.slane %v4305_v12, 0  ;;  %v6267_v3 = vld [vmem:[#allocation66_spill] sm:$0xff]  ;;  %v1503_v28 = vmul.f32 %v6255_v63, %v6262_v27 }
 0x2be   :  { %v1464_v37 = vmin.f32 %v1456_v61, 6.0  ;;  %v1465_v49 = vmin.f32 %v1457_v53, 6.0  ;;  %v1466_v13 = vmin.f32 %v1458_v41, 6.0  ;;  %v1467_v39 = vmin.f32 %v1459_v46, 6.0  ;;  %1840 = vrot.lane.b32.xlu2 %v6250_v23, %s2795_s11 }
 0x2bf   :  { %v1280_v7 = vmul.f32 %v6263_v62, %v1263_v50  ;;  %v6264_v61 = vperm.slane %v4305_v12, 3  ;;  %v1537_v41 = vperm.slane %v4844_v20, 3 }
 0x2c0   :  { %v1472_v43 = vpack.c.bf16 %v1465_v49, %v1464_v37  ;;  %v1473_v4 = vpack.c.bf16 %v1467_v39, %v1466_v13  ;;  %1786 = vrot.lane.b32.xlu1 %v4157_v14, %s2793_s9  ;;  %v4901_v48 = vpop.permute.xlu2 %1644  ;;  %v6265_v49 = vld [vmem:[#allocation58_spill] sm:$0xff] }
 0x2c1   :  { %v4903_v35 = vpop.permute.xlu1 %1514  ;;  %v4905_v19 = vpop.permute.xlu0 %1753  ;;  %v1283_v53 = vmul.f32 %v6264_v61, %v1265_v10  ;;  %v1592_v47 = vsel %vm384_vm4, %v6265_v49, %v4796_v5  ;;  %v1594_v39 = vsel %vm384_vm4, %v4805_v59, %v6265_v49 }
 0x2c2   :  { %1476 = vst [vmem:[#allocation3 + $0x20] sm:$0xff] %v1472_v43 }
 0x2c3   :  { %2037 = vperm.xlu0 %2740, %v6242_v29   ;;  %1477 = vst [vmem:[#allocation3 + $0x28] sm:$0xff] %v1473_v4  ;;  %v4923_v29 = vld [vmem:[%s5767_s1 + $0x1] ss:$8 sm:$0xf]  ;;  %v6266_v4 = vmov 2  }
 0x2c4   :  { %v1602_v46 = vperm.slane %v4923_v29, 2  ;;  %v5941_v13 = vperm.slane %v4923_v29, 1 }
 0x2c6   :  { %1850 = vrot.lane.b32.xlu2 %v6262_v27, %s2795_s11  ;;  %v1610_v60 = vmul.f32 %v1602_v46, %v1592_v47  ;;  %v6269_v47 = vld [vmem:[#allocation62_spill] sm:$0xff] }
 0x2c8   :  { %1640 = vrot.lane.b32.xlu1 %v4180_v51, %s2790_s2  ;;  %v4931_v57 = vpop.permute.xlu2 %1650 }
 0x2c9   :  { %v4939_v37 = vpop.permute.xlu1 %1520 }
 0x2ca   :  { %v1524_v12 = vsel %vm317_vm1, %v4682_v11, %v4939_v37  ;;  %v1290_v43 = vpop.permute.xlu0 %1289 }
 0x2cb   :  { %2747 = vset.pattern.permute.xlu0 %v6266_v4  ;;  %v1545_v34 = vmul.f32 %v1537_v41, %v1524_v12  ;;  %v1296_v58 = vmul.f32 %v1290_v43, %v1280_v7  ;;  %v1297_v56 = vmul.f32 %v1290_v43, %v1281_v16  ;;  %v1298_v50 = vmul.f32 %v1290_v43, %v6267_v3  ;;  %v6279_v4 = vld [vmem:[#allocation64_spill] sm:$0xff] }
 0x2cc   :  { %v1299_v10 = vmul.f32 %v1290_v43, %v1283_v53  ;;  %v1609_v16 = vmul.f32 %v5941_v13, %v1594_v39  ;;  %v6268_v53 = vld [vmem:[#allocation61_spill] sm:$0xff] }
 0x2cd   :  { %v1561_v62 = vmul.f32 %v4882_v24, %v1545_v34  ;;  %v1304_v61 = vadd.f32 %v1296_v58, %v4662_v54  ;;  %v1305_v11 = vadd.f32 %v1297_v56, %v4664_v32  ;;  %v1306_v49 = vadd.f32 %v1298_v50, %v4670_v21 }
 0x2ce   :  { %v1307_v7 = vadd.f32 %v1299_v10, %v4672_v38  ;;  %1819 = vperm.xlu2 %2734, %v4115_v22   ;;  %v6272_v56 = vmov 6  }
 0x2cf   :  { %v1569_v12 = vadd.f32 %v1561_v62, %v1503_v28  ;;  %v4971_v43 = vadd.f32 %v6268_v53, %v1304_v61  ;;  %v4974_v54 = vadd.f32 %v4649_v52, %v1305_v11  ;;  %v4977_v32 = vadd.f32 %v4652_v15, %v1306_v49 }
 0x2d0   :  { %1838 = vrot.lane.b32.xlu1 %v4180_v51, %s2795_s11  ;;  %v1618_v21 = vpop.permute.xlu2 %1617  ;;  %v4982_v39 = vadd.f32 %v6269_v47, %v1307_v7  ;;  %v5942_v15 = vperm.slane %v4923_v29, 0 }
 0x2d1   :  { %v4984_v38 = vmul.f32 %v1618_v21, %v1609_v16  ;;  %v1626_v22 = vmul.f32 %v1618_v21, %v1610_v60  ;;  %v4986_v34 = vpop.permute.xlu1 %1580  ;;  %v5943_v60 = vperm.slane %v4923_v29, 3 }
 0x2d2   :  { %6270 = vst [vmem:[#allocation37_spill] sm:$0xff] %v4986_v34  ;;  %v4988_v58 = vpop.permute.xlu0 %1846 }
 0x2d3   :  { %6271 = vst [vmem:[#allocation22_spill] sm:$0xff] %v4988_v58  ;;  %v4991_v52 = vadd.f32 %v1626_v22, %v4895_v30 }
 0x2d6   :  { %1904 = vrot.lane.b32.xlu2 %v4180_v51, %s2798_s12 }
 0x2d7   :  { %2735 = vset.pattern.permute.xlu2 %v6272_v56 }
 0x2d8   :  { %1848 = vrot.lane.b32.xlu1 %v3995_v17, %s2795_s11  ;;  %v1511_v3 = vpop.permute.xlu2 %1510 }
 0x2d9   :  { %v1529_v50 = vsel %vm317_vm1, %v1511_v3, %v4903_v35  ;;  %v1531_v30 = vsel %vm317_vm1, %v4724_v8, %v1511_v3  ;;  %v1587_v28 = vpop.permute.xlu1 %1586  ;;  %v6274_v3 = vld [vmem:[#allocation56_spill] sm:$0xff] }
 0x2da   :  { %v1590_v10 = vsel %vm384_vm4, %v4796_v5, %v1587_v28  ;;  %v1596_v62 = vsel %vm384_vm4, %v1587_v28, %v4805_v59  ;;  %v5012_v61 = vpop.permute.xlu0 %1852  ;;  %v5027_v5 = vld [vmem:[%s5766_s4 + $0x20] sm:$0xff] }
 0x2db   :  { %6273 = vst [vmem:[#allocation36_spill] sm:$0xff] %v5012_v61  ;;  %v1608_v11 = vmul.f32 %v5942_v15, %v1596_v62  ;;  %v1611_v49 = vmul.f32 %v5943_v60, %v1590_v10  ;;  %v5045_v28 = vld [vmem:[%s5767_s1 + $0x2] ss:$8 sm:$0xf]  ;;  %v5945_v10 = vperm.slane %v4844_v20, 0  ;;  %v5946_v62 = vperm.slane %v4844_v20, 1 }
 0x2dc   :  { %v1659_v61 = vsel %vm452_vm2, %v6279_v4, %v4931_v57 }
 0x2dd   :  { %v5018_v16 = vmul.f32 %v1618_v21, %v1608_v11  ;;  %v1627_v7 = vmul.f32 %v1618_v21, %v1611_v49  ;;  %v1525_v21 = vsel %vm317_vm1, %v6274_v3, %v4724_v8  ;;  %v6275_v11 = vld [vmem:[#allocation59_spill] sm:$0xff]  ;;  %v1546_v60 = vmul.f32 %v5945_v10, %v1531_v30 }
 0x2de   :  { %1914 = vrot.lane.b32.xlu2 %v3995_v17, %s2798_s12  ;;  %v1593_v49 = vsel %vm384_vm4, %v4986_v34, %v6275_v11  ;;  %v1549_v8 = vmul.f32 %v1537_v41, %v1525_v21  ;;  %v1547_v56 = vmul.f32 %v5946_v62, %v1529_v50  ;;  %v6277_v21 = vmov 7  }
 0x2df   :  { %v5022_v53 = vadd.f32 %v1627_v7, %v1569_v12  ;;  %v1527_v12 = vsel %vm317_vm1, %v4903_v35, %v6274_v3  ;;  %v6276_v35 = vperm.slane %v4844_v20, 2  ;;  %v1614_v15 = vmul.f32 %v1602_v46, %v1593_v49 }
 0x2e0   :  { %1815 = vperm.xlu1 %2733, %v5027_v5   ;;  %v5030_v59 = vpop.permute.xlu2 %1712 }
 0x2e1   :  { %v1498_v47 = vpop.permute.xlu1 %1497  ;;  %v1548_v7 = vmul.f32 %v6276_v35, %v1527_v12  ;;  %v6278_v35 = vld [vmem:[#allocation8_spill] sm:$0xff] }
 0x2e2   :  { %v5032_v22 = vpop.permute.xlu0 %1706  ;;  %v1504_v12 = vmul.f32 %v1498_v47, %v6250_v23  ;;  %v1505_v3 = vmul.f32 %v1498_v47, %v6278_v35  ;;  %v1506_v0 = vmul.f32 %v1498_v47, %v3995_v17  ;;  %v1507_v46 = vmul.f32 %v1498_v47, %v4157_v14 }
 0x2e3   :  { %v6280_v47 = vperm.slane %v5045_v28, 2 }
 0x2e6   :  { %1881 = vperm.xlu2 %2735, %v5027_v5  }
 0x2e8   :  { %1708 = vrot.lane.b32.xlu1 %v6250_v23, %s2794_s10  ;;  %v1719_v13 = vpop.permute.xlu2 %1718 }
 0x2e9   :  { %v5070_v41 = vsel %vm520_vm5, %v1719_v13, %v5032_v22  ;;  %2737 = vset.pattern.permute.xlu1 %v6277_v21 }
 0x2ea   :  { %v1556_v49 = vpop.permute.xlu1 %1555  ;;  %v5077_v30 = vpop.permute.xlu0 %1906 }
 0x2eb   :  { %v1562_v10 = vmul.f32 %v1556_v49, %v1546_v60  ;;  %v1563_v50 = vmul.f32 %v1556_v49, %v1547_v56  ;;  %v1564_v62 = vmul.f32 %v1556_v49, %v1548_v7  ;;  %v1565_v42 = vmul.f32 %v1556_v49, %v1549_v8  ;;  %v6281_v56 = vld [vmem:[#allocation50_spill] sm:$0xff] }
 0x2ec   :  { %v1680_v60 = vmul.f32 %v6280_v47, %v1659_v61  ;;  %v1630_v7 = vmul.f32 %v6281_v56, %v1614_v15  ;;  %v1591_v15 = vsel %vm384_vm4, %v6275_v11, %v4850_v2 }
 0x2ed   :  { %v5083_v45 = vadd.f32 %v1562_v10, %v1504_v12  ;;  %v5085_v58 = vadd.f32 %v1563_v50, %v1505_v3  ;;  %v1572_v40 = vadd.f32 %v1564_v62, %v1506_v0  ;;  %v1573_v34 = vadd.f32 %v1565_v42, %v1507_v46 }
 0x2ee   :  { %1778 = vrot.lane.b32.xlu2 %v6278_v35, %s2793_s9  ;;  %v5952_v12 = vperm.slane %v5045_v28, 3 }
 0x2ef   :  { %2738 = vset.pattern.permute.xlu2 %v6277_v21  ;;  %v1638_v10 = vadd.f32 %v1630_v7, %v1572_v40 }
 0x2f0   :  { %1912 = vrot.lane.b32.xlu1 %v4142_v18, %s2798_s12  ;;  %v5095_v8 = vpop.permute.xlu2 %1687  ;;  %v6282_v18 = vperm.slane %v4923_v29, 3 }
 0x2f1   :  { %v1696_v3 = vmul.f32 %v5095_v8, %v1680_v60  ;;  %v5134_v60 = vld [vmem:[%s5767_s1 + $0x3] ss:$8 sm:$0xf] }
 0x2f2   :  { %v5098_v0 = vpop.permute.xlu1 %1648  ;;  %v5100_v42 = vpop.permute.xlu0 %1916  ;;  %v1615_v61 = vmul.f32 %v6282_v18, %v1591_v15  ;;  %v1722_v18 = vsel %vm520_vm5, %v4691_v31, %v1719_v13  ;;  %v1500_v13 = vmul.f32 %v6255_v63, %v4180_v51 }
 0x2f3   :  { %v5102_v62 = vadd.f32 %v1696_v3, %v1638_v10 }
 0x2f6   :  { %1972 = vrot.lane.b32.xlu2 %v6250_v23, %s2799_s13  ;;  %v1631_v23 = vmul.f32 %v6281_v56, %v1615_v61 }
 0x2f8   :  { %1918 = vrot.lane.b32.xlu1 %v4157_v14, %s2798_s12  ;;  %v5114_v40 = vpop.permute.xlu2 %1772  ;;  %v1639_v47 = vadd.f32 %v1631_v23, %v1573_v34  ;;  %v6283_v34 = vperm.slane %v4505_v55, 3  ;;  %v6284_v55 = vperm.slane %v4844_v20, 0 }
 0x2fa   :  { %v5117_v46 = vpop.permute.xlu1 %1654  ;;  %v5119_v49 = vpop.permute.xlu0 %1885  ;;  %v1415_v10 = vmul.f32 %v6283_v34, %v4864_v1  ;;  %v6286_v34 = vld [vmem:[#allocation35_spill] sm:$0xff] }
 0x2fb   :  { %v1657_v11 = vsel %vm452_vm2, %v4931_v57, %v5117_v46 }
 0x2fc   :  { %v1681_v50 = vmul.f32 %v5952_v12, %v1657_v11 }
 0x2fe   :  { %v1697_v14 = vmul.f32 %v5095_v8, %v1681_v50  ;;  %1982 = vrot.lane.b32.xlu2 %v6262_v27, %s2799_s13  ;;  %v1735_v27 = vperm.slane %v5134_v60, 3  ;;  %v6285_v50 = vperm.slane %v4844_v20, 1  ;;  %v5172_v20 = vld [vmem:[%s5766_s4 + $0x28] sm:$0xff] }
 0x300   :  { %v5136_v7 = vadd.f32 %v1697_v14, %v1639_v47  ;;  %1776 = vrot.lane.b32.xlu1 %v4013_v9, %s2793_s9  ;;  %v5140_v57 = vpop.permute.xlu2 %1782 }
 0x302   :  { %v1509_v15 = vpop.permute.xlu1 %1508 }
 0x303   :  { %v1528_v61 = vsel %vm317_vm1, %v1509_v15, %v6254_v26  ;;  %v1530_v11 = vsel %vm317_vm1, %v4939_v37, %v1509_v15  ;;  %v1422_v23 = vpop.permute.xlu0 %1421  ;;  %v1501_v26 = vmul.f32 %v6255_v63, %v4013_v9 }
 0x304   :  { %v1542_v1 = vmul.f32 %v6284_v55, %v1530_v11  ;;  %v1543_v47 = vmul.f32 %v6285_v50, %v1528_v61  ;;  %v1428_v14 = vmul.f32 %v1422_v23, %v4755_v33  ;;  %v1429_v12 = vmul.f32 %v1422_v23, %v6286_v34 }
 0x305   :  { %v1430_v3 = vmul.f32 %v1422_v23, %v4867_v36  ;;  %v1431_v37 = vmul.f32 %v1422_v23, %v1415_v10  ;;  %v6287_v36 = vperm.slane %v5134_v60, 0  ;;  %v1743_v10 = vmul.f32 %v1735_v27, %v1722_v18 }
 0x306   :  { %v1558_v15 = vmul.f32 %v4882_v24, %v1542_v1  ;;  %v1559_v11 = vmul.f32 %v4882_v24, %v1543_v47  ;;  %1951 = vperm.xlu2 %2738, %v5172_v20   ;;  %v5176_v33 = vadd.f32 %v1428_v14, %v4971_v43  ;;  %v5179_v61 = vadd.f32 %v1429_v12, %v4974_v54 }
 0x307   :  { %v1740_v63 = vmul.f32 %v6287_v36, %v5070_v41  ;;  %v5185_v24 = vadd.f32 %v1430_v3, %v4977_v32  ;;  %v5188_v23 = vadd.f32 %v1431_v37, %v4982_v39  ;;  %v1733_v54 = vperm.slane %v5134_v60, 1 }
 0x308   :  { %v1566_v55 = vadd.f32 %v1558_v15, %v1500_v13  ;;  %v1567_v1 = vadd.f32 %v1559_v11, %v1501_v26  ;;  %1970 = vrot.lane.b32.xlu1 %v4180_v51, %s2799_s13  ;;  %v1750_v43 = vpop.permute.xlu2 %1749  ;;  %v1734_v12 = vperm.slane %v5134_v60, 2  ;;  %v6288_v26 = vmov 8  }
 0x309   :  { %v5194_v50 = vmul.f32 %v1750_v43, %v1740_v63  ;;  %v1759_v41 = vmul.f32 %v1750_v43, %v1743_v10  ;;  %v1667_v37 = vperm.slane %v5045_v28, 1 }
 0x30a   :  { %v1711_v18 = vpop.permute.xlu1 %1710  ;;  %v5197_v32 = vadd.f32 %v5018_v16, %v1566_v55  ;;  %v5200_v39 = vadd.f32 %v4984_v38, %v1567_v1  ;;  %v1666_v38 = vperm.slane %v5045_v28, 0 }
 0x30b   :  { %v1724_v3 = vsel %vm520_vm5, %v1711_v18, %v4691_v31  ;;  %v1726_v51 = vsel %vm520_vm5, %v5032_v22, %v1711_v18  ;;  %v5208_v47 = vpop.permute.xlu0 %1978  ;;  %v6289_v18 = vld [vmem:[#allocation23_spill] sm:$0xff] }
 0x30c   :  { %v1741_v14 = vmul.f32 %v1733_v54, %v1726_v51  ;;  %v1742_v34 = vmul.f32 %v1734_v12, %v1724_v3  ;;  %v1656_v3 = vsel %vm452_vm2, %v5098_v0, %v6289_v18  ;;  %v1658_v51 = vsel %vm452_vm2, %v4901_v48, %v5098_v0 }
 0x30d   :  { %v6290_v0 = vperm.slane %v5045_v28, 2 }
 0x30e   :  { %v5212_v13 = vmul.f32 %v1750_v43, %v1741_v14  ;;  %v1758_v16 = vmul.f32 %v1750_v43, %v1742_v34  ;;  %2739 = vset.pattern.permute.xlu2 %v6288_v26 }
 0x30f   :  { %2013 = vperm.xlu2 %2739, %v5027_v5  }
 0x310   :  { %1980 = vrot.lane.b32.xlu1 %v3995_v17, %s2799_s13  ;;  %v1643_v31 = vpop.permute.xlu2 %1642 }
 0x311   :  { %v1661_v22 = vsel %vm452_vm2, %v1643_v31, %v6279_v4  ;;  %v1663_v15 = vsel %vm452_vm2, %v5117_v46, %v1643_v31  ;;  %v1676_v31 = vmul.f32 %v6290_v0, %v1658_v51  ;;  %v2782_v0 = vld [vmem:[%s5766_s4 + $0x18] sm:$0xff] }
 0x312   :  { %v1678_v11 = vmul.f32 %v1666_v38, %v1663_v15  ;;  %v1679_v36 = vmul.f32 %v1667_v37, %v1661_v22  ;;  %v1717_v63 = vpop.permute.xlu1 %1716  ;;  %v6291_v22 = vperm.slane %v5045_v28, 3 }
 0x313   :  { %v1723_v17 = vsel %vm520_vm5, %v1717_v63, %v4742_v25  ;;  %v1725_v10 = vsel %vm520_vm5, %v5030_v59, %v1717_v63  ;;  %v5236_v4 = vpop.permute.xlu0 %1984 }
 0x314   :  { %v1694_v55 = vmul.f32 %v5095_v8, %v1678_v11  ;;  %v1695_v46 = vmul.f32 %v5095_v8, %v1679_v36  ;;  %v1746_v1 = vmul.f32 %v1734_v12, %v1725_v10  ;;  %v1747_v43 = vmul.f32 %v1735_v27, %v1723_v17 }
 0x315   :  { %v1677_v15 = vmul.f32 %v6291_v22, %v1656_v3  ;;  %v6292_v3 = vld [vmem:[#allocation37_spill] sm:$0xff] }
 0x316   :  { %v1762_v14 = vmul.f32 %v4905_v19, %v1746_v1  ;;  %v1763_v34 = vmul.f32 %v4905_v19, %v1747_v43 }
 0x317   :  { %1910 = vrot.lane.b32.xlu2 %v6278_v35, %s2798_s12 }
 0x318   :  { %v5253_v8 = vadd.f32 %v1762_v14, %v5102_v62  ;;  %v5256_v27 = vadd.f32 %v1763_v34, %v5136_v7  ;;  %1947 = vperm.xlu1 %2737, %v5027_v5   ;;  %v5259_v12 = vpop.permute.xlu2 %1840  ;;  %2742 = vset.pattern.permute.xlu2 %v6256_v44 }
 0x31a   :  { %v5266_v11 = vpop.permute.xlu1 %1683 }
 0x31b   :  { %v1692_v62 = vmul.f32 %v5266_v11, %v1676_v31  ;;  %v1693_v36 = vmul.f32 %v5266_v11, %v1677_v15  ;;  %v5270_v7 = vpop.permute.xlu0 %1842 }
 0x31d   :  { %v1700_v5 = vadd.f32 %v1692_v62, %v4991_v52  ;;  %v1701_v63 = vadd.f32 %v1693_v36, %v5022_v53  ;;  %v6295_v36 = vld [vmem:[#allocation4_spill] sm:$0xff] }
 0x31f   :  { %1976 = vrot.lane.b32.xlu2 %v6278_v35, %s2799_s13  ;;  %v5276_v17 = vadd.f32 %v1758_v16, %v1700_v5  ;;  %v5278_v10 = vadd.f32 %v1759_v41, %v1701_v63  ;;  %v6293_v41 = vperm.slane %v4923_v29, 0  ;;  %v6296_v63 = vld [vmem:[#allocation20_spill] sm:$0xff] }
 0x320   :  { %1844 = vrot.lane.b32.xlu1 %v6278_v35, %s2795_s11  ;;  %v5282_v1 = vpop.permute.xlu2 %1850  ;;  %v6294_v35 = vperm.slane %v4923_v29, 1 }
 0x321   :  { %2741 = vset.pattern.permute.xlu1 %v6256_v44 }
 0x322   :  { %v1577_v43 = vpop.permute.xlu1 %1576 }
 0x323   :  { %v1595_v52 = vsel %vm384_vm4, %v1577_v43, %v6292_v3  ;;  %v1597_v53 = vsel %vm384_vm4, %v4850_v2, %v1577_v43  ;;  %v5291_v16 = vpop.permute.xlu0 %2017  ;;  %v6297_v3 = vld [vmem:[#allocation19_spill] sm:$0xff] }
 0x324   :  { %v1612_v51 = vmul.f32 %v6293_v41, %v1597_v53  ;;  %v1613_v14 = vmul.f32 %v6294_v35, %v1595_v52  ;;  %v6298_v52 = vld [vmem:[#allocation31_spill] sm:$0xff] }
 0x326   :  { %v1628_v34 = vmul.f32 %v6281_v56, %v1612_v51  ;;  %v1629_v44 = vmul.f32 %v6281_v56, %v1613_v14  ;;  %v6299_v14 = vmov 0  }
 0x327   :  { %1445 = vperm.xlu2 %2742, %v2782_v0  }
 0x328   :  { %v1636_v31 = vadd.f32 %v1628_v34, %v5083_v45  ;;  %v1637_v2 = vadd.f32 %v1629_v44, %v5085_v58  ;;  %1908 = vrot.lane.b32.xlu1 %v4013_v9, %s2798_s12  ;;  %v5306_v22 = vpop.permute.xlu2 %1819 }
 0x32a   :  { %v5308_v29 = vpop.permute.xlu1 %1780  ;;  %v5310_v15 = vadd.f32 %v1694_v55, %v1636_v31  ;;  %v5312_v62 = vadd.f32 %v1695_v46, %v1637_v2  ;;  %v5322_v55 = vld [vmem:[%s5767_s1 + $0x5] ss:$8 sm:$0xf] }
 0x32b   :  { %v1800_v2 = vperm.slane %v5322_v55, 2 }
 0x32d   :  { %v846_v56 = vpop.permute.xlu0 %845 }
 0x32e   :  { %v852_v5 = vadd.f32 %v846_v56, %v6295_v36  ;;  %v853_v43 = vadd.f32 %v846_v56, %v6296_v63  ;;  %v854_v45 = vadd.f32 %v846_v56, %v6297_v3  ;;  %v855_v58 = vadd.f32 %v846_v56, %v6298_v52  ;;  %v6300_v3 = vld [vmem:[#allocation9_spill] sm:$0xff] }
 0x32f   :  { %2744 = vset.pattern.permute.xlu2 %v6299_v14  ;;  %v1801_v36 = vperm.slane %v5322_v55, 3 }
 0x330   :  { %v860_v53 = vmax.f32 %v852_v5, 0.0  ;;  %v861_v41 = vmax.f32 %v853_v43, 0.0  ;;  %v862_v51 = vmax.f32 %v854_v45, 0.0  ;;  %v863_v35 = vmax.f32 %v855_v58, 0.0  ;;  %1974 = vrot.lane.b32.xlu1 %v4013_v9, %s2799_s13  ;;  %v5326_v46 = vpop.permute.xlu2 %1904 }
 0x332   :  { %v868_v34 = vmin.f32 %v860_v53, 6.0  ;;  %v869_v44 = vmin.f32 %v861_v41, 6.0  ;;  %v870_v0 = vmin.f32 %v862_v51, 6.0  ;;  %v871_v31 = vmin.f32 %v863_v35, 6.0  ;;  %v1787_v56 = vpop.permute.xlu1 %1786 }
 0x333   :  { %v1789_v43 = vsel %vm588_vm3, %v5140_v57, %v1787_v56  ;;  %v1795_v9 = vsel %vm588_vm3, %v1787_v56, %v6300_v3 }
 0x334   :  { %v876_v5 = vpack.c.bf16 %v869_v44, %v868_v34  ;;  %v877_v63 = vpack.c.bf16 %v871_v31, %v870_v0  ;;  %v1812_v45 = vmul.f32 %v1800_v2, %v1789_v43  ;;  %v1813_v52 = vmul.f32 %v1801_v36, %v1795_v9  ;;  %v5350_v34 = vld [vmem:[%s5767_s1 + $0x6] ss:$8 sm:$0xf] }
 0x335   :  { %v5953_v0 = vperm.slane %v5350_v34, 1  ;;  %v1866_v31 = vperm.slane %v5350_v34, 2 }
 0x336   :  { %880 = vst [vmem:[#allocation3] sm:$0xff] %v876_v5  ;;  %v1828_v58 = vmul.f32 %v5306_v22, %v1812_v45  ;;  %v1829_v53 = vmul.f32 %v5306_v22, %v1813_v52 }
 0x337   :  { %881 = vst [vmem:[#allocation3 + $0x8] sm:$0xff] %v877_v63 }
 0x338   :  { %v5339_v41 = vadd.f32 %v1828_v58, %v5253_v8  ;;  %2041 = vperm.xlu1 %2741, %v5172_v20   ;;  %v5342_v51 = vpop.permute.xlu2 %1914  ;;  %v5345_v35 = vadd.f32 %v1829_v53, %v5256_v27  ;;  %v6301_v27 = vld [vmem:[#allocation22_spill] sm:$0xff] }
 0x339   :  { %v1856_v56 = vsel %vm656_vm6, %v5270_v7, %v6301_v27  ;;  %v1854_v5 = vsel %vm656_vm6, %v6301_v27, %v5282_v1 }
 0x33a   :  { %v1641_v44 = vpop.permute.xlu1 %1640  ;;  %v1873_v9 = vmul.f32 %v5953_v0, %v1856_v56  ;;  %v1874_v45 = vmul.f32 %v1866_v31, %v1854_v5 }
 0x33b   :  { %v1660_v8 = vsel %vm452_vm2, %v1641_v44, %v4901_v48  ;;  %v1662_v20 = vsel %vm452_vm2, %v6289_v18, %v1641_v44 }
 0x33c   :  { %v1674_v63 = vmul.f32 %v1666_v38, %v1662_v20  ;;  %v1675_v48 = vmul.f32 %v1667_v37, %v1660_v8  ;;  %v1864_v38 = vperm.slane %v5350_v34, 0 }
 0x33e   :  { %v1690_v43 = vmul.f32 %v5266_v11, %v1674_v63  ;;  %v1691_v18 = vmul.f32 %v5266_v11, %v1675_v48  ;;  %v1867_v11 = vperm.slane %v5350_v34, 3 }
 0x340   :  { %v1698_v52 = vadd.f32 %v1690_v43, %v5197_v32  ;;  %v1699_v58 = vadd.f32 %v1691_v18, %v5200_v39  ;;  %v1882_v53 = vpop.permute.xlu2 %1881  ;;  %2743 = vset.pattern.permute.xlu1 %v6299_v14 }
 0x341   :  { %v5382_v28 = vmul.f32 %v1882_v53, %v1873_v9  ;;  %v1890_v37 = vmul.f32 %v1882_v53, %v1874_v45 }
 0x342   :  { %v1839_v44 = vpop.permute.xlu1 %1838  ;;  %v5386_v8 = vadd.f32 %v5194_v50, %v1698_v52  ;;  %v5389_v20 = vadd.f32 %v5212_v13, %v1699_v58  ;;  %v1798_v50 = vperm.slane %v5322_v55, 0  ;;  %v1799_v13 = vperm.slane %v5322_v55, 1  ;;  %v6302_v58 = vld [vmem:[#allocation6_spill] sm:$0xff] }
 0x343   :  { %v1858_v32 = vsel %vm656_vm6, %v1839_v44, %v5270_v7  ;;  %v1860_v39 = vsel %vm656_vm6, %v5282_v1, %v1839_v44 }
 0x344   :  { %v1872_v27 = vmul.f32 %v1864_v38, %v1858_v32  ;;  %v1875_v56 = vmul.f32 %v1867_v11, %v1860_v39 }
 0x346   :  { %v5399_v5 = vmul.f32 %v1882_v53, %v1872_v27  ;;  %v1891_v63 = vmul.f32 %v1882_v53, %v1875_v56 }
 0x348   :  { %v1779_v48 = vpop.permute.xlu2 %1778 }
 0x349   :  { %v1791_v7 = vsel %vm588_vm3, %v1779_v48, %v5140_v57  ;;  %v1793_v1 = vsel %vm588_vm3, %v6300_v3, %v1779_v48  ;;  %v1794_v57 = vsel %vm588_vm3, %v6302_v58, %v5114_v40  ;;  %v1788_v3 = vsel %vm588_vm3, %v5308_v29, %v6302_v58 }
 0x34a   :  { %v1810_v43 = vmul.f32 %v1798_v50, %v1793_v1  ;;  %v1811_v18 = vmul.f32 %v1799_v13, %v1791_v7  ;;  %v5413_v9 = vpop.permute.xlu1 %1848  ;;  %v1809_v44 = vmul.f32 %v1801_v36, %v1794_v57  ;;  %v1808_v32 = vmul.f32 %v1800_v2, %v1788_v3 }
 0x34b   :  { %v6303_v36 = vperm.slane %v5134_v60, 0 }
 0x34c   :  { %v1826_v45 = vmul.f32 %v5306_v22, %v1810_v43  ;;  %v1827_v52 = vmul.f32 %v5306_v22, %v1811_v18 }
 0x350   :  { %v5425_v53 = vpop.permute.xlu2 %1972 }
 0x352   :  { %v1816_v39 = vpop.permute.xlu1 %1815 }
 0x353   :  { %v1824_v27 = vmul.f32 %v1816_v39, %v1808_v32  ;;  %v1825_v56 = vmul.f32 %v1816_v39, %v1809_v44 }
 0x355   :  { %v1832_v48 = vadd.f32 %v1824_v27, %v5276_v17  ;;  %v1833_v22 = vadd.f32 %v1825_v56, %v5278_v10  ;;  %v6304_v27 = vld [vmem:[#allocation36_spill] sm:$0xff]  ;;  %v1993_v56 = vsel %vm792_vm8, %v5236_v4, %v5425_v53 }
 0x356   :  { %v1855_v60 = vsel %vm656_vm6, %v5413_v9, %v6304_v27 }
 0x357   :  { %v5429_v7 = vadd.f32 %v1890_v37, %v1832_v48  ;;  %v5431_v1 = vadd.f32 %v1891_v63, %v1833_v22 }
 0x358   :  { %v5433_v43 = vpop.permute.xlu2 %1982 }
 0x35a   :  { %v1709_v18 = vpop.permute.xlu1 %1708 }
 0x35b   :  { %v1727_v58 = vsel %vm520_vm5, %v1709_v18, %v5030_v59  ;;  %v1729_v2 = vsel %vm520_vm5, %v4742_v25, %v1709_v18 }
 0x35c   :  { %v1744_v17 = vmul.f32 %v6303_v36, %v1729_v2  ;;  %v1745_v10 = vmul.f32 %v1733_v54, %v1727_v58  ;;  %v5468_v54 = vld [vmem:[%s5767_s1 + $0x20] ss:$8 sm:$0xf] }
 0x35e   :  { %v1760_v37 = vmul.f32 %v4905_v19, %v1744_v17  ;;  %v1761_v63 = vmul.f32 %v4905_v19, %v1745_v10  ;;  %v1861_v19 = vsel %vm656_vm6, %v6304_v27, %v5259_v12 }
 0x360   :  { %v1768_v57 = vadd.f32 %v1760_v37, %v5310_v15  ;;  %v1769_v3 = vadd.f32 %v1761_v63, %v5312_v62  ;;  %v5449_v44 = vpop.permute.xlu2 %1951  ;;  %v1878_v15 = vmul.f32 %v1866_v31, %v1855_v60  ;;  %v5475_v62 = vld [vmem:[%s5767_s1 + $0x7] ss:$8 sm:$0xf] }
 0x361   :  { %v1933_v22 = vperm.slane %v5475_v62, 3  ;;  %v1932_v31 = vperm.slane %v5475_v62, 2  ;;  %v1931_v60 = vperm.slane %v5475_v62, 1 }
 0x362   :  { %v5451_v59 = vpop.permute.xlu1 %1912  ;;  %v5453_v32 = vadd.f32 %v1826_v45, %v1768_v57  ;;  %v5455_v25 = vadd.f32 %v1827_v52, %v1769_v3  ;;  %v1879_v45 = vmul.f32 %v1867_v11, %v1861_v19  ;;  %v1999_v52 = vperm.slane %v5468_v54, 3 }
 0x363   :  { %v1894_v18 = vmul.f32 %v5119_v49, %v1878_v15 }
 0x364   :  { %v1895_v36 = vmul.f32 %v5119_v49, %v1879_v45  ;;  %v2011_v17 = vmul.f32 %v1999_v52, %v1993_v56 }
 0x365   :  { %v1902_v63 = vadd.f32 %v1894_v18, %v5339_v41 }
 0x366   :  { %v1903_v57 = vadd.f32 %v1895_v36, %v5345_v35  ;;  %v2027_v19 = vmul.f32 %v5291_v16, %v2011_v17 }
 0x369   :  { %v5482_v48 = vpop.permute.xlu2 %2013 }
 0x36a   :  { %v1919_v58 = vpop.permute.xlu1 %1918 }
 0x36b   :  { %v1921_v11 = vsel %vm724_vm7, %v5342_v51, %v1919_v58  ;;  %v1927_v2 = vsel %vm724_vm7, %v1919_v58, %v5077_v30 }
 0x36c   :  { %v1944_v10 = vmul.f32 %v1932_v31, %v1921_v11  ;;  %v1945_v37 = vmul.f32 %v1933_v22, %v1927_v2 }
 0x36e   :  { %v1960_v3 = vmul.f32 %v5449_v44, %v1944_v10  ;;  %v1961_v27 = vmul.f32 %v5449_v44, %v1945_v37 }
 0x370   :  { %v5500_v15 = vadd.f32 %v1960_v3, %v1902_v63  ;;  %v1969_v58 = vadd.f32 %v1961_v27, %v1903_v57 }
 0x371   :  { %v1911_v0 = vpop.permute.xlu2 %1910 }
 0x372   :  { %v1923_v45 = vsel %vm724_vm7, %v1911_v0, %v5342_v51  ;;  %v1777_v56 = vpop.permute.xlu1 %1776  ;;  %v5505_v41 = vadd.f32 %v2027_v19, %v1969_v58 }
 0x373   :  { %v1943_v35 = vmul.f32 %v1931_v60, %v1923_v45  ;;  %v1790_v18 = vsel %vm588_vm3, %v1777_v56, %v5308_v29  ;;  %v1792_v11 = vsel %vm588_vm3, %v5114_v40, %v1777_v56 }
 0x374   :  { %v1806_v2 = vmul.f32 %v1798_v50, %v1792_v11  ;;  %v1807_v51 = vmul.f32 %v1799_v13, %v1790_v18  ;;  %v1986_v18 = vsel %vm792_vm8, %v5208_v47, %v5433_v43 }
 0x375   :  { %v5520_v36 = vmul.f32 %v5449_v44, %v1943_v35  ;;  %v1998_v35 = vperm.slane %v5468_v54, 2 }
 0x376   :  { %v1822_v17 = vmul.f32 %v1816_v39, %v1806_v2  ;;  %v1823_v10 = vmul.f32 %v1816_v39, %v1807_v51 }
 0x378   :  { %v1830_v37 = vadd.f32 %v1822_v17, %v5386_v8  ;;  %v1831_v63 = vadd.f32 %v1823_v10, %v5389_v20 }
 0x379   :  { %v5524_v29 = vpop.permute.xlu2 %1976 }
 0x37a   :  { %v5526_v57 = vpop.permute.xlu1 %1970  ;;  %v5529_v40 = vadd.f32 %v5399_v5, %v1830_v37  ;;  %v5532_v50 = vadd.f32 %v5382_v28, %v1831_v63  ;;  %v1926_v28 = vsel %vm724_vm7, %v5100_v42, %v5326_v46  ;;  %v2006_v37 = vmul.f32 %v1998_v35, %v1986_v18 }
 0x37b   :  { %v1941_v51 = vmul.f32 %v1933_v22, %v1926_v28  ;;  %v1930_v22 = vperm.slane %v5475_v62, 0 }
 0x381   :  { %v1446_v55 = vpop.permute.xlu2 %1445 }
 0x382   :  { %v1452_v13 = vadd.f32 %v1446_v55, %v5176_v33  ;;  %v1453_v3 = vadd.f32 %v1446_v55, %v5179_v61  ;;  %v1454_v39 = vadd.f32 %v1446_v55, %v5185_v24  ;;  %v1455_v8 = vadd.f32 %v1446_v55, %v5188_v23  ;;  %v5538_v20 = vpop.permute.xlu1 %1980 }
 0x383   :  { %v1920_v33 = vsel %vm724_vm7, %v5451_v59, %v5100_v42  ;;  %v1992_v61 = vsel %vm792_vm8, %v5433_v43, %v5526_v57  ;;  %v2038_v43 = vpop.permute.xlu0 %2037 }
 0x384   :  { %v1460_v27 = vmax.f32 %v1452_v13, 0.0  ;;  %v1461_v19 = vmax.f32 %v1453_v3, 0.0  ;;  %v1462_v58 = vmax.f32 %v1454_v39, 0.0  ;;  %v1463_v45 = vmax.f32 %v1455_v8, 0.0 }
 0x385   :  { %v1940_v42 = vmul.f32 %v1932_v31, %v1920_v33  ;;  %v2007_v17 = vmul.f32 %v1999_v52, %v1992_v61  ;;  %v2022_v13 = vmul.f32 %v5482_v48, %v2006_v37  ;;  %v1925_v52 = vsel %vm724_vm7, %v5077_v30, %v1911_v0 }
 0x386   :  { %v1468_v24 = vmin.f32 %v1460_v27, 6.0  ;;  %v1469_v23 = vmin.f32 %v1461_v19, 6.0  ;;  %v1470_v5 = vmin.f32 %v1462_v58, 6.0  ;;  %v1471_v56 = vmin.f32 %v1463_v45, 6.0 }
 0x387   :  { %v2023_v3 = vmul.f32 %v5482_v48, %v2007_v17  ;;  %v1996_v45 = vperm.slane %v5468_v54, 0  ;;  %v1942_v0 = vmul.f32 %v1930_v22, %v1925_v52 }
 0x388   :  { %v1474_v11 = vpack.c.bf16 %v1469_v23, %v1468_v24  ;;  %v1475_v2 = vpack.c.bf16 %v1471_v56, %v1470_v5  ;;  %v6305_v23 = vperm.slane %v5350_v34, 1 }
 0x38a   :  { %1478 = vst [vmem:[#allocation3 + $0x30] sm:$0xff] %v1474_v11  ;;  %v1948_v10 = vpop.permute.xlu1 %1947 }
 0x38b   :  { %1479 = vst [vmem:[#allocation3 + $0x38] sm:$0xff] %v1475_v2  ;;  %v1956_v63 = vmul.f32 %v1948_v10, %v1940_v42  ;;  %v1957_v55 = vmul.f32 %v1948_v10, %v1941_v51 }
 0x38d   :  { %v1964_v39 = vadd.f32 %v1956_v63, %v5429_v7  ;;  %v1965_v8 = vadd.f32 %v1957_v55, %v5431_v1  ;;  %v1991_v7 = vsel %vm792_vm8, %v5425_v53, %v5524_v29 }
 0x38e   :  { %v2008_v18 = vmul.f32 %v1996_v45, %v1991_v7 }
 0x38f   :  { %v2030_v27 = vadd.f32 %v2022_v13, %v1964_v39  ;;  %v2031_v19 = vadd.f32 %v2023_v3, %v1965_v8 }
 0x391   :  { %v2046_v31 = vadd.f32 %v2038_v43, %v2030_v27  ;;  %v2047_v58 = vadd.f32 %v2038_v43, %v2031_v19 }
 0x392   :  { %v1845_v28 = vpop.permute.xlu1 %1844 }
 0x393   :  { %v2054_v1 = vmax.f32 %v2046_v31, 0.0  ;;  %v2055_v33 = vmax.f32 %v2047_v58, 0.0  ;;  %v1857_v61 = vsel %vm656_vm6, %v1845_v28, %v5413_v9  ;;  %v1859_v30 = vsel %vm656_vm6, %v5259_v12, %v1845_v28 }
 0x394   :  { %v1876_v24 = vmul.f32 %v1864_v38, %v1859_v30  ;;  %v1877_v5 = vmul.f32 %v6305_v23, %v1857_v61  ;;  %v1958_v9 = vmul.f32 %v5449_v44, %v1942_v0  ;;  %v2024_v38 = vmul.f32 %v5291_v16, %v2008_v18 }
 0x395   :  { %v2062_v56 = vmin.f32 %v2054_v1, 6.0  ;;  %v2063_v53 = vmin.f32 %v2055_v33, 6.0 }
 0x396   :  { %v1892_v11 = vmul.f32 %v5119_v49, %v1876_v24  ;;  %v1893_v2 = vmul.f32 %v5119_v49, %v1877_v5 }
 0x397   :  { %v2069_v51 = vpack.c.bf16 %v2063_v53, %v2062_v56 }
 0x398   :  { %v1900_v42 = vadd.f32 %v1892_v11, %v5453_v32  ;;  %v1901_v12 = vadd.f32 %v1893_v2, %v5455_v25  ;;  %v1987_v32 = vsel %vm792_vm8, %v5538_v20, %v5236_v4  ;;  %v6306_v2 = vmov 1  }
 0x399   :  { %2073 = vst [vmem:[#allocation3 + $0x48] sm:$0xff] %v2069_v51  ;;  %v2010_v13 = vmul.f32 %v1998_v35, %v1987_v32  ;;  %v2658_v32 = vld [vmem:[#allocation3 + $0x2c] sm:$0xf0] }
 0x39a   :  { %v1966_v17 = vadd.f32 %v1958_v9, %v1900_v42  ;;  %v1967_v34 = vadd.f32 %v5520_v36, %v1901_v12  ;;  %v1909_v37 = vpop.permute.xlu1 %1908  ;;  %v1997_v36 = vperm.slane %v5468_v54, 1 }
 0x39b   :  { %v1922_v63 = vsel %vm724_vm7, %v1909_v37, %v5451_v59  ;;  %v1924_v49 = vsel %vm724_vm7, %v5326_v46, %v1909_v37  ;;  %v1989_v59 = vsel %vm792_vm8, %v5524_v29, %v5538_v20  ;;  %v2026_v27 = vmul.f32 %v5291_v16, %v2010_v13  ;;  %v2656_v13 = vld [vmem:[#allocation3 + $0x24] sm:$0xf] }
 0x39c   :  { %v2032_v44 = vadd.f32 %v2024_v38, %v1966_v17  ;;  %v1938_v25 = vmul.f32 %v1930_v22, %v1924_v49  ;;  %v1939_v55 = vmul.f32 %v1931_v60, %v1922_v63  ;;  %v2009_v8 = vmul.f32 %v1997_v36, %v1989_v59  ;;  %v2609_v59 = vld [vmem:[#allocation3 + $0x20] sm:$0xf] }
 0x39d   :  { %v2034_v52 = vadd.f32 %v2026_v27, %v5500_v15  ;;  %v2601_v27 = vld [vmem:[#allocation3 + $0x8] sm:$0xf] }
 0x39e   :  { %v1954_v3 = vmul.f32 %v1948_v10, %v1938_v25  ;;  %v1955_v46 = vmul.f32 %v1948_v10, %v1939_v55  ;;  %v2025_v10 = vmul.f32 %v5291_v16, %v2009_v8  ;;  %v2611_v25 = vld [vmem:[#allocation3 + $0x30] sm:$0xf0]  ;;  %v2659_v55 = vld [vmem:[#allocation3 + $0x34] sm:$0xf0]  ;;  %v2657_v8 = vld [vmem:[#allocation3 + $0x2c] sm:$0xf] }
 0x3a0   :  { %v1962_v19 = vadd.f32 %v1954_v3, %v5529_v40  ;;  %v1963_v29 = vadd.f32 %v1955_v46, %v5532_v50  ;;  %v2033_v6 = vadd.f32 %v2025_v10, %v1967_v34  ;;  %v5625_v40 = vld [vmem:[%s5768_s5 + $0x8] sm:$0xff]  ;;  %v2610_v3 = vor.u32 %v2658_v32, %v2609_v59 }
 0x3a1   :  { %2099 = vperm.xlu2 %2744, %v5625_v40   ;;  %v2633_v12 = vld [vmem:[#allocation3 + $0x48] sm:$0xf]  ;;  %v2661_v37 = vld [vmem:[#allocation3 + $0x4c] sm:$0xf]  ;;  %v2614_v46 = vor.u32 %v2656_v13, %v2611_v25 }
 0x3a2   :  { %v1975_v39 = vpop.permute.xlu1 %1974 }
 0x3a3   :  { %v1988_v4 = vsel %vm792_vm8, %v1975_v39, %v5208_v47  ;;  %v1990_v62 = vsel %vm792_vm8, %v5526_v57, %v1975_v39  ;;  %v5620_v57 = vld [vmem:[%s5768_s5] sm:$0xff]  ;;  %v2617_v39 = vld [vmem:[#allocation3 + $0x28] sm:$0xf] }
 0x3a4   :  { %v2004_v60 = vmul.f32 %v1996_v45, %v1990_v62  ;;  %v2005_v54 = vmul.f32 %v1997_v36, %v1988_v4  ;;  %2094 = vperm.xlu1 %2743, %v5620_v57   ;;  %v2619_v36 = vld [vmem:[#allocation3 + $0x38] sm:$0xf0]  ;;  %v2618_v4 = vor.u32 %v2659_v55, %v2617_v39 }
 0x3a5   :  { %v2622_v62 = vor.u32 %v2657_v8, %v2619_v36 }
 0x3a6   :  { %v2020_v20 = vmul.f32 %v5482_v48, %v2004_v60  ;;  %v2021_v35 = vmul.f32 %v5482_v48, %v2005_v54  ;;  %v2593_v60 = vld [vmem:[#allocation3] sm:$0xf]  ;;  %v2652_v54 = vld [vmem:[#allocation3 + $0x4] sm:$0xf] }
 0x3a8   :  { %v2028_v22 = vadd.f32 %v2020_v20, %v1962_v19  ;;  %v2029_v47 = vadd.f32 %v2021_v35, %v1963_v29  ;;  %v2653_v19 = vld [vmem:[#allocation3 + $0xc] sm:$0xf]  ;;  %v2654_v29 = vld [vmem:[#allocation3 + $0xc] sm:$0xf0]  ;;  %v2595_v20 = vld [vmem:[#allocation3 + $0x10] sm:$0xf0] }
 0x3a9   :  { %2746 = vset.pattern.permute.xlu2 %v6306_v2  ;;  %v2594_v35 = vor.u32 %v2654_v29, %v2593_v60  ;;  %v2598_v10 = vor.u32 %v2652_v54, %v2595_v20 }
 0x3aa   :  { %v2044_v50 = vadd.f32 %v2038_v43, %v2028_v22  ;;  %v2045_v31 = vadd.f32 %v2038_v43, %v2029_v47  ;;  %v2042_v48 = vpop.permute.xlu1 %2041  ;;  %v2655_v22 = vld [vmem:[#allocation3 + $0x14] sm:$0xf0]  ;;  %v2603_v47 = vld [vmem:[#allocation3 + $0x18] sm:$0xf0] }
 0x3ab   :  { %v2048_v16 = vadd.f32 %v2042_v48, %v2032_v44  ;;  %v2049_v15 = vadd.f32 %v2042_v48, %v2033_v6  ;;  %v2050_v58 = vadd.f32 %v2042_v48, %v2034_v52  ;;  %v2051_v45 = vadd.f32 %v2042_v48, %v5505_v41 }
 0x3ac   :  { %v2052_v7 = vmax.f32 %v2044_v50, 0.0  ;;  %v2053_v28 = vmax.f32 %v2045_v31, 0.0  ;;  %2745 = vset.pattern.permute.xlu1 %v6306_v2  ;;  %v2602_v52 = vor.u32 %v2655_v22, %v2601_v27  ;;  %v2606_v6 = vor.u32 %v2653_v19, %v2603_v47  ;;  %v2651_v50 = vld [vmem:[%s5769_s3] sm:$0xff] }
 0x3ad   :  { %v2056_v1 = vmax.f32 %v2048_v16, 0.0  ;;  %v2057_v33 = vmax.f32 %v2049_v15, 0.0  ;;  %v2058_v61 = vmax.f32 %v2050_v58, 0.0  ;;  %v2059_v30 = vmax.f32 %v2051_v45, 0.0 }
 0x3ae   :  { %v2060_v0 = vmin.f32 %v2052_v7, 6.0  ;;  %v2061_v24 = vmin.f32 %v2053_v28, 6.0 }
 0x3af   :  { %v2064_v23 = vmin.f32 %v2056_v1, 6.0  ;;  %v2065_v43 = vmin.f32 %v2057_v33, 6.0  ;;  %v2066_v5 = vmin.f32 %v2058_v61, 6.0  ;;  %v2067_v56 = vmin.f32 %v2059_v30, 6.0 }
 0x3b0   :  { %v2068_v53 = vpack.c.bf16 %v2061_v24, %v2060_v0 }
 0x3b1   :  { %v2070_v18 = vpack.c.bf16 %v2065_v43, %v2064_v23  ;;  %v2071_v11 = vpack.c.bf16 %v2067_v56, %v2066_v5 }
 0x3b2   :  { %2072 = vst [vmem:[#allocation3 + $0x40] sm:$0xff] %v2068_v53 }
 0x3b3   :  { %2074 = vst [vmem:[#allocation3 + $0x50] sm:$0xff] %v2070_v18 }
 0x3b4   :  { %2075 = vst [vmem:[#allocation3 + $0x58] sm:$0xff] %v2071_v11 }
 0x3b9   :  { %v2625_v41 = vld [vmem:[#allocation3 + $0x40] sm:$0xf]  ;;  %v2660_v51 = vld [vmem:[#allocation3 + $0x44] sm:$0xf] }
 0x3ba   :  { %v2662_v9 = vld [vmem:[#allocation3 + $0x4c] sm:$0xf0]  ;;  %v2627_v42 = vld [vmem:[#allocation3 + $0x50] sm:$0xf0] }
 0x3bb   :  { %v2626_v38 = vor.u32 %v2662_v9, %v2625_v41  ;;  %v2630_v17 = vor.u32 %v2660_v51, %v2627_v42  ;;  %v2663_v34 = vld [vmem:[#allocation3 + $0x54] sm:$0xf0]  ;;  %v2635_v63 = vld [vmem:[#allocation3 + $0x58] sm:$0xf0] }
 0x3bc   :  { %v2634_v49 = vor.u32 %v2663_v34, %v2633_v12  ;;  %v2638_v44 = vor.u32 %v2661_v37, %v2635_v63  ;;  %v2311_v34 = vld [vmem:[%s5768_s5] sm:$0x1]  ;;  %v6309_v37 = vmov 4   ;;  %v6310_v63 = vmov 5  }
 0x3bd   :  { %2176 = vmatpush.bf16.msrb.mxu0 %v2626_v38  ;;  %2190 = vmatpush.bf16.msrb.mxu1 %v2630_v17  ;;  %v6307_v38 = vmov 2   ;;  %v6308_v17 = vmov 3  }
 0x3be   :  { %2204 = vmatpush.bf16.msrb.mxu2 %v2634_v49  ;;  %2218 = vmatpush.bf16.msrb.mxu3 %v2638_v44  ;;  %v6311_v49 = vmov 6   ;;  %v2802_v44 = vmov 256.0  }
 0x3bf   :  { %2761 = vrcp.f32 %v2802_v44 }
 0x3c1   :  { %2177 = vmatpush.bf16.msrb.mxu0 %v2610_v3  ;;  %2191 = vmatpush.bf16.msrb.mxu1 %v2614_v46 }
 0x3c2   :  { %2205 = vmatpush.bf16.msrb.mxu2 %v2618_v4  ;;  %2219 = vmatpush.bf16.msrb.mxu3 %v2622_v62 }
 0x3c5   :  { %2178 = vmatpush.bf16.msrb.mxu0 %v2594_v35  ;;  %2192 = vmatpush.bf16.msrb.mxu1 %v2598_v10  ;;  %v2762_v25 = vpop.eup %2761 }
 0x3c6   :  { %2206 = vmatpush.bf16.msrb.mxu2 %v2602_v52  ;;  %2220 = vmatpush.bf16.msrb.mxu3 %v2606_v6  ;;  %v2234_v36 = vmul.f32 256.0, %v2762_v25  ;;  %vm2238_vm10 = vweird.f32 %v2762_v25 }
 0x3c8   :  { %2639 = vmatmul.msk.bf16.vlgmr.msrb.gmra.mxu0 %vm2167_vm9, %v2651_v50  ;;  %2640 = vmatmul.msk.bf16.vlgmr.msrb.gmra.mxu1 %vm2167_vm9, %v2651_v50  ;;  %v2235_v13 = vsub.f32 1.0, %v2234_v36 }
 0x3c9   :  { %2641 = vmatmul.msk.bf16.vlgmr.msrb.gmra.mxu2 %vm2167_vm9, %v2651_v50  ;;  %2642 = vmatmul.msk.bf16.vlgmr.msrb.gmra.mxu3 %vm2167_vm9, %v2651_v50 }
 0x3ca   :  { %v2236_v3 = vmul.f32 %v2762_v25, %v2235_v13 }
 0x3cc   :  { %v2237_v39 = vadd.f32 %v2762_v25, %v2236_v3 }
 0x3fb   :  { %v2100_v7 = vpop.permute.xlu2 %2099 }
 0x416   :  { %v2095_v31 = vpop.permute.xlu1 %2094 }
 0x445   :  { %v2180_v48 = vpop.f32.mrf.mxu0  ;;  %v2194_v16 = vpop.f32.mrf.mxu1 }
 0x446   :  { %v5635_v15 = vadd.f32 %v2180_v48, %v2095_v31  ;;  %v5637_v58 = vadd.f32 %v2194_v16, %v2095_v31 }
 0x448   :  { %v2227_v45 = vadd.f32 %v5637_v58, %v5635_v15  ;;  %v2242_v56 = vmax.f32 %v5635_v15, %v5637_v58 }
 0x44a   :  { %2228 = vadd.xlane.f32.xlu0 %v2227_v45 }
 0x44c   :  { %v2208_v28 = vpop.f32.mrf.mxu2  ;;  %v2222_v1 = vpop.f32.mrf.mxu3 }
 0x44d   :  { %v2182_v33 = vpop.f32.mrf.mxu0  ;;  %v2196_v61 = vpop.f32.mrf.mxu1  ;;  %v5641_v30 = vadd.f32 %v2208_v28, %v2095_v31  ;;  %v5643_v0 = vadd.f32 %v2222_v1, %v2095_v31  ;;  %v2398_v28 = vld [vmem:[%s5768_s5] sm:$0xf]  ;;  %s2803_s5 = smov 126  }
 0x44e   :  { %v5645_v24 = vadd.f32 %v2182_v33, %v2100_v7  ;;  %v5647_v23 = vadd.f32 %v2196_v61, %v2100_v7  ;;  %v2400_v33 = vrot.slane %v2398_v28, 2 }
 0x44f   :  { %v2248_v43 = vadd.f32 %v5643_v0, %v5641_v30  ;;  %v2256_v12 = vmax.f32 %v5641_v30, %v5643_v0 }
 0x450   :  { %v2230_v5 = vadd.f32 %v5647_v23, %v5645_v24  ;;  %v2245_v9 = vmax.f32 %v5645_v24, %v5647_v23 }
 0x451   :  { %2249 = vadd.xlane.f32.xlu2 %v2248_v43 }
 0x452   :  { %2231 = vadd.xlane.f32.xlu1 %v2230_v5  ;;  %2243 = vmax.xlane.f32.xlu0 %v2242_v56  ;;  %v2402_v5 = vmul.f32 %v2400_v33, %v2398_v28 }
 0x454   :  { %v2210_v53 = vpop.f32.mrf.mxu2  ;;  %v2224_v18 = vpop.f32.mrf.mxu3 }
 0x455   :  { %v5655_v11 = vadd.f32 %v2210_v53, %v2100_v7  ;;  %v5657_v41 = vadd.f32 %v2224_v18, %v2100_v7 }
 0x457   :  { %v2251_v51 = vadd.f32 %v5657_v41, %v5655_v11  ;;  %v2259_v42 = vmax.f32 %v5655_v11, %v5657_v41 }
 0x459   :  { %2252 = vadd.xlane.f32.xlu2 %v2251_v51 }
 0x45a   :  { %2246 = vmax.xlane.f32.xlu1 %v2245_v9  ;;  %2260 = vmax.xlane.f32.xlu0 %v2259_v42 }
 0x461   :  { %2257 = vmax.xlane.f32.xlu2 %v2256_v12 }
 0x46e   :  { %2282 = vperm.xlu0 %2747, %v5620_v57  }
 0x473   :  { %2272 = vperm.xlu1 %2745, %v5620_v57  }
 0x476   :  { %2754 = vset.pattern.permute.xlu0 %v6277_v21 }
 0x477   :  { %2330 = vperm.xlu0 %2754, %v5620_v57  }
 0x479   :  { %2276 = vperm.xlu2 %2746, %v5625_v40  }
 0x47b   :  { %2748 = vset.pattern.permute.xlu1 %v6307_v38 }
 0x47c   :  { %2286 = vperm.xlu1 %2748, %v5625_v40  }
 0x47f   :  { %2760 = vset.pattern.permute.xlu0 %v6306_v2  ;;  %v6312_v2 = vmov 9  }
 0x481   :  { %2749 = vset.pattern.permute.xlu2 %v6308_v17 }
 0x482   :  { %2292 = vperm.xlu2 %2749, %v5620_v57  }
 0x484   :  { %2750 = vset.pattern.permute.xlu1 %v6308_v17 }
 0x485   :  { %2296 = vperm.xlu1 %2750, %v5625_v40  }
 0x48a   :  { %2751 = vset.pattern.permute.xlu2 %v6309_v37 }
 0x48b   :  { %2314 = vperm.xlu2 %2751, %v2311_v34  }
 0x48d   :  { %2752 = vset.pattern.permute.xlu1 %v6310_v63 }
 0x48e   :  { %2320 = vperm.xlu1 %2752, %v2311_v34  }
 0x493   :  { %2753 = vset.pattern.permute.xlu2 %v6311_v49 }
 0x494   :  { %2325 = vperm.xlu2 %2753, %v2311_v34  }
 0x496   :  { %2755 = vset.pattern.permute.xlu1 %v6277_v21 }
 0x497   :  { %2334 = vperm.xlu1 %2755, %v5625_v40  }
 0x49c   :  { %2756 = vset.pattern.permute.xlu2 %v6288_v26 }
 0x49d   :  { %2341 = vperm.xlu2 %2756, %v5620_v57  }
 0x49f   :  { %2757 = vset.pattern.permute.xlu1 %v6288_v26 }
 0x4a0   :  { %2345 = vperm.xlu1 %2757, %v5625_v40   ;;  %v2239_v40 = vsel %vm2238_vm10, %v2762_v25, %v2237_v39 }
 0x4a5   :  { %2759 = vset.pattern.permute.xlu2 %v6299_v14 }
 0x4a8   :  { %2758 = vset.pattern.permute.xlu1 %v6312_v2 }
 0x4a9   :  { %2422 = vperm.xlu1 %2758, %v2402_v5  }
 0x4bd   :  { %v2229_v55 = vpop.xlane.xlu0 %2228 }
 0x4be   :  { %v2240_v4 = vmul.f32 %v2239_v40, %v2229_v55 }
 0x4c4   :  { %v2250_v32 = vpop.xlane.xlu2 %2249 }
 0x4c5   :  { %v2232_v21 = vpop.xlane.xlu1 %2231  ;;  %v2244_v46 = vpop.xlane.xlu0 %2243  ;;  %v2254_v8 = vmul.f32 %v2250_v32, %v2239_v40 }
 0x4c6   :  { %v2241_v27 = vmul.f32 %v2239_v40, %v2232_v21 }
 0x4c7   :  { %v2263_v54 = vsel %vm2262_vm11, %v2240_v4, %v2254_v8 }
 0x4c8   :  { %v2266_v29 = vsel %vm2265_vm12, %v2263_v54, %v2244_v46 }
 0x4cc   :  { %v2253_v59 = vpop.xlane.xlu2 %2252 }
 0x4cd   :  { %v2247_v57 = vpop.xlane.xlu1 %2246  ;;  %v2261_v62 = vpop.xlane.xlu0 %2260  ;;  %v2255_v60 = vmul.f32 %v2253_v59, %v2239_v40 }
 0x4cf   :  { %v2264_v20 = vsel %vm2262_vm11, %v2241_v27, %v2255_v60 }
 0x4d0   :  { %v2267_v52 = vsel %vm2265_vm12, %v2264_v20, %v2247_v57  ;;  %v2804_v20 = vmov 16.0  }
 0x4d1   :  { %v2270_v50 = vsel %vm2268_vm13, %v2267_v52, %v2261_v62 }
 0x4d4   :  { %v2258_v26 = vpop.xlane.xlu2 %2257 }
 0x4d5   :  { %v2269_v35 = vsel %vm2268_vm13, %v2266_v29, %v2258_v26 }
 0x4dc   :  { %v2277_v19 = vpop.permute.xlu2 %2276 }
 0x4dd   :  { %v2280_v48 = vmul.f32 %v2277_v19, %v2270_v50 }
 0x4e0   :  { %v2283_v47 = vpop.permute.xlu0 %2282 }
 0x4e4   :  { %v2293_v31 = vpop.permute.xlu2 %2292 }
 0x4e5   :  { %v2273_v14 = vpop.permute.xlu1 %2272 }
 0x4e6   :  { %v2279_v10 = vmul.f32 %v2273_v14, %v2269_v35 }
 0x4e8   :  { %v2289_v6 = vadd.f32 %v2283_v47, %v2279_v10 }
 0x4e9   :  { %v2331_v32 = vpop.permute.xlu0 %2330 }
 0x4ea   :  { %v2299_v16 = vmul.f32 %v2293_v31, %v2289_v6 }
 0x4ec   :  { %v2302_v61 = vsel %vm2301_vm14, %v2299_v16, 0.0  ;;  %v2315_v18 = vpop.permute.xlu2 %2314 }
 0x4ee   :  { %v2287_v22 = vpop.permute.xlu1 %2286 }
 0x4ef   :  { %v2290_v45 = vadd.f32 %v2287_v22, %v2280_v48 }
 0x4f4   :  { %v2326_v34 = vpop.permute.xlu2 %2325 }
 0x4f7   :  { %v2297_v7 = vpop.permute.xlu1 %2296 }
 0x4f8   :  { %v2300_v1 = vmul.f32 %v2297_v7, %v2290_v45 }
 0x4fa   :  { %v2303_v43 = vsel %vm2301_vm14, %v2300_v1, 0.0 }
 0x4fb   :  { %v2304_v56 = vadd.f32 %v2303_v43, %v2302_v61 }
 0x4fc   :  { %v2342_v21 = vpop.permute.xlu2 %2341 }
 0x4fd   :  { %v2305_v53 = vrot.slane %v2304_v56, 4 }
 0x4ff   :  { %v2306_v51 = vadd.f32 %v2305_v53, %v2304_v56 }
 0x500   :  { %v2321_v9 = vpop.permute.xlu1 %2320 }
 0x501   :  { %v2307_v42 = vrot.slane %v2306_v51, 2 }
 0x503   :  { %v2308_v12 = vadd.f32 %v2307_v42, %v2306_v51 }
 0x505   :  { %v2309_v38 = vrot.slane %v2308_v12, 1 }
 0x507   :  { %v2310_v17 = vadd.f32 %v2309_v38, %v2308_v12 }
 0x509   :  { %v2317_v37 = vadd.f32 %v2315_v18, %v2310_v17  ;;  %v2335_v63 = vpop.permute.xlu1 %2334 }
 0x50b   :  { %v2318_v49 = vmax.f32 %v2317_v37, 0.0 }
 0x50d   :  { %v2323_v2 = vmul.f32 %v2321_v9, %v2318_v49 }
 0x50f   :  { %v2328_v44 = vadd.f32 %v2326_v34, %v2323_v2 }
 0x511   :  { %v2337_v25 = vperm.slane %v2328_v44, 0 }
 0x512   :  { %v2346_v55 = vpop.permute.xlu1 %2345 }
 0x513   :  { %v2338_v36 = vmul.f32 %v2337_v25, %v2331_v32  ;;  %v2339_v59 = vmul.f32 %v2337_v25, %v2335_v63 }
 0x515   :  { %v2349_v13 = vadd.f32 %v2346_v55, %v2339_v59  ;;  %v2348_v3 = vadd.f32 %v2342_v21, %v2338_v36 }
 0x517   :  { %2354 = vrot.lane.b32.xlu0 %v2349_v13, %s2803_s5  ;;  %2352 = vrot.lane.b32.xlu2 %v2348_v3, %s2803_s5 }
 0x51b   :  { %v2423_v59 = vpop.permute.xlu1 %2422 }
 0x571   :  { %v2353_v46 = vpop.permute.xlu2 %2352 }
 0x572   :  { %v2358_v57 = vadd.f32 %v2353_v46, %v2348_v3 }
 0x574   :  { %v2643_v39 = vmul.f32 -1.442695, %v2358_v57 }
 0x576   :  { %2763 = vpow2.f32 %v2643_v39 }
 0x57c   :  { %v2764_v26 = vpop.eup %2763 }
 0x57d   :  { %v2366_v40 = vadd.f32 1.0, %v2764_v26 }
 0x57f   :  { %2765 = vrcp.f32 %v2366_v40  ;;  %v2379_v47 = vand.u32 2147483648, %v2366_v40  ;;  %vm2373_vm0 = vweird.f32 %v2366_v40  ;;  %v2377_v50 = vand.u32 2147483647, %v2366_v40 }
 0x581   :  { %v2380_v28 = vor.u32 1.1754944e-38, %v2379_v47  ;;  %vm2378_vm4 = vcmp.eq.f32.partialorder %v2377_v50, 8.507059e+37  ;;  %v2646_v47 = vld [vmem:[%s5767_s1 + $0x21] ss:$8 sm:$0xf] }
 0x582   :  { %v2468_v50 = vperm.slane %v2646_v47, 1 }
 0x585   :  { %v2766_v62 = vpop.eup %2765 }
 0x586   :  { %v2369_v60 = vmul.f32 %v2766_v62, %v2366_v40  ;;  %vm2374_vm15 = vweird.f32 %v2766_v62 }
 0x587   :  { %vm2375_vm1 = vmor %vm2373_vm0, %vm2374_vm15 }
 0x588   :  { %v2370_v19 = vsub.f32 1.0, %v2369_v60 }
 0x589   :  { %v2355_v8 = vpop.permute.xlu0 %2354 }
 0x58a   :  { %v2359_v14 = vadd.f32 %v2355_v8, %v2349_v13  ;;  %v2371_v29 = vmul.f32 %v2766_v62, %v2370_v19 }
 0x58c   :  { %v2644_v4 = vmul.f32 -1.442695, %v2359_v14  ;;  %v2372_v22 = vadd.f32 %v2766_v62, %v2371_v29 }
 0x58e   :  { %2767 = vpow2.f32 %v2644_v4  ;;  %v2376_v16 = vsel %vm2375_vm1, %v2766_v62, %v2372_v22 }
 0x58f   :  { %v2381_v33 = vsel %vm2378_vm4, %v2380_v28, %v2376_v16 }
 0x590   :  { %v2403_v53 = vsel %vm2265_vm12, %v2381_v33, 0.0  ;;  %v2426_v51 = vsel %vm2265_vm12, %v2381_v33, -inf }
 0x594   :  { %v2768_v54 = vpop.eup %2767 }
 0x595   :  { %v2367_v27 = vadd.f32 1.0, %v2768_v54 }
 0x597   :  { %2769 = vrcp.f32 %v2367_v27  ;;  %v2394_v31 = vand.u32 2147483648, %v2367_v27  ;;  %v2392_v45 = vand.u32 2147483647, %v2367_v27  ;;  %vm2388_vm3 = vweird.f32 %v2367_v27 }
 0x598   :  { %2771 = vrcp.f32 %v2804_v20 }
 0x599   :  { %v2395_v61 = vor.u32 1.1754944e-38, %v2394_v31  ;;  %vm2393_vm6 = vcmp.eq.f32.partialorder %v2392_v45, 8.507059e+37  ;;  %v2469_v31 = vperm.slane %v2646_v47, 2 }
 0x59d   :  { %v2770_v35 = vpop.eup %2769 }
 0x59e   :  { %v2384_v10 = vmul.f32 %v2770_v35, %v2367_v27  ;;  %v2772_v52 = vpop.eup %2771  ;;  %vm2389_vm2 = vweird.f32 %v2770_v35 }
 0x59f   :  { %v2413_v7 = vmul.f32 16.0, %v2772_v52  ;;  %vm2390_vm5 = vmor %vm2388_vm3, %vm2389_vm2  ;;  %vm2417_vm7 = vweird.f32 %v2772_v52 }
 0x5a0   :  { %v2385_v6 = vsub.f32 1.0, %v2384_v10 }
 0x5a1   :  { %v2414_v5 = vsub.f32 1.0, %v2413_v7 }
 0x5a2   :  { %v2386_v48 = vmul.f32 %v2770_v35, %v2385_v6  ;;  %v2467_v6 = vperm.slane %v2646_v47, 0 }
 0x5a3   :  { %v2415_v34 = vmul.f32 %v2772_v52, %v2414_v5 }
 0x5a4   :  { %v2387_v1 = vadd.f32 %v2770_v35, %v2386_v48  ;;  %v2470_v48 = vperm.slane %v2646_v47, 3 }
 0x5a5   :  { %v2416_v44 = vadd.f32 %v2772_v52, %v2415_v34 }
 0x5a6   :  { %v2391_v43 = vsel %vm2390_vm5, %v2770_v35, %v2387_v1 }
 0x5a7   :  { %v2396_v56 = vsel %vm2393_vm6, %v2395_v61, %v2391_v43  ;;  %v2418_v36 = vsel %vm2417_vm7, %v2772_v52, %v2416_v44  ;;  %v2647_v52 = vld [vmem:[%s5767_s1 + $0x22] ss:$8 sm:$0xf] }
 0x5a8   :  { %v2404_v18 = vsel %vm2265_vm12, %v2396_v56, 0.0  ;;  %v2427_v9 = vsel %vm2265_vm12, %v2396_v56, -inf  ;;  %v2486_v45 = vperm.slane %v2647_v52, 0  ;;  %v2487_v7 = vperm.slane %v2647_v52, 1  ;;  %v2515_v44 = vld [vmem:[%s5764_s0 + $0x8] sm:$0xff] }
 0x5a9   :  { %v2405_v42 = vadd.f32 %v2404_v18, %v2403_v53  ;;  %v2428_v12 = vmax.f32 %v2426_v51, %v2427_v9  ;;  %v2488_v28 = vperm.slane %v2647_v52, 2  ;;  %v2489_v1 = vperm.slane %v2647_v52, 3 }
 0x5ab   :  { %v2406_v38 = vrot.slane %v2405_v42, 4  ;;  %v2429_v17 = vrot.slane %v2428_v12, 4 }
 0x5ad   :  { %v2407_v37 = vadd.f32 %v2406_v38, %v2405_v42  ;;  %v2430_v63 = vmax.f32 %v2428_v12, %v2429_v17 }
 0x5af   :  { %v2408_v49 = vrot.slane %v2407_v37, 2  ;;  %v2431_v2 = vrot.slane %v2430_v63, 2 }
 0x5b1   :  { %v2409_v32 = vadd.f32 %v2408_v49, %v2407_v37  ;;  %v2432_v25 = vmax.f32 %v2430_v63, %v2431_v2  ;;  %v2514_v2 = vld [vmem:[%s5764_s0] sm:$0xff] }
 0x5b3   :  { %v2410_v55 = vrot.slane %v2409_v32, 1  ;;  %v2433_v21 = vrot.slane %v2432_v25, 1 }
 0x5b5   :  { %v2411_v13 = vadd.f32 %v2410_v55, %v2409_v32  ;;  %v2434_v3 = vmax.f32 %v2432_v25, %v2433_v21  ;;  %v2516_v32 = vld [vmem:[%s5764_s0 + $0x10] sm:$0xff]  ;;  %v2517_v25 = vld [vmem:[%s5764_s0 + $0x18] sm:$0xff] }
 0x5b7   :  { %v2419_v46 = vmul.f32 %v2418_v36, %v2411_v13  ;;  %v2435_v57 = vmul.f32 %v2434_v3, %v2423_v59  ;;  %v2518_v13 = vld [vmem:[%s5764_s0 + $0x20] sm:$0xff] }
 0x5b9   :  { %v2425_v39 = vmul.f32 %v2423_v59, %v2419_v46  ;;  %v2437_v26 = vrot.slane %v2435_v57, 1  ;;  %v2519_v57 = vld [vmem:[%s5764_s0 + $0x28] sm:$0xff] }
 0x5bb   :  { %v2439_v40 = vadd.f32 %v2437_v26, %v2425_v39 }
 0x5bd   :  { %v2645_v8 = vmul.f32 -1.442695, %v2439_v40 }
 0x5bf   :  { %2773 = vpow2.f32 %v2645_v8 }
 0x5c5   :  { %v2774_v14 = vpop.eup %2773 }
 0x5c6   :  { %v2443_v4 = vadd.f32 1.0, %v2774_v14 }
 0x5c8   :  { %2775 = vrcp.f32 %v2443_v4  ;;  %v2455_v27 = vand.u32 2147483648, %v2443_v4  ;;  %v2453_v29 = vand.u32 2147483647, %v2443_v4  ;;  %vm2449_vm9 = vweird.f32 %v2443_v4 }
 0x5ca   :  { %v2456_v35 = vor.u32 1.1754944e-38, %v2455_v27  ;;  %vm2454_vm11 = vcmp.eq.f32.partialorder %v2453_v29, 8.507059e+37 }
 0x5ce   :  { %v2776_v62 = vpop.eup %2775 }
 0x5cf   :  { %v2445_v60 = vmul.f32 %v2776_v62, %v2443_v4  ;;  %vm2450_vm8 = vweird.f32 %v2776_v62 }
 0x5d0   :  { %vm2451_vm10 = vmor %vm2449_vm9, %vm2450_vm8 }
 0x5d1   :  { %v2446_v54 = vsub.f32 1.0, %v2445_v60 }
 0x5d3   :  { %v2447_v19 = vmul.f32 %v2776_v62, %v2446_v54 }
 0x5d5   :  { %v2448_v20 = vadd.f32 %v2776_v62, %v2447_v19 }
 0x5d7   :  { %v2452_v10 = vsel %vm2451_vm10, %v2776_v62, %v2448_v20 }
 0x5d8   :  { %v2457_v22 = vsel %vm2454_vm11, %v2456_v35, %v2452_v10 }
 0x5d9   :  { %2482 = vperm.xlu0 %2760, %v2457_v22   ;;  %2463 = vperm.xlu2 %2759, %v2457_v22  }
 0x633   :  { %v2464_v16 = vpop.permute.xlu2 %2463 }
 0x634   :  { %v2475_v33 = vmul.f32 %v2467_v6, %v2464_v16  ;;  %v2476_v61 = vmul.f32 %v2468_v50, %v2464_v16  ;;  %v2477_v43 = vmul.f32 %v2469_v31, %v2464_v16  ;;  %v2478_v5 = vmul.f32 %v2470_v48, %v2464_v16 }
 0x64b   :  { %v2483_v56 = vpop.permute.xlu0 %2482 }
 0x64c   :  { %v2494_v53 = vmul.f32 %v2486_v45, %v2483_v56  ;;  %v2495_v18 = vmul.f32 %v2487_v7, %v2483_v56  ;;  %v2496_v51 = vmul.f32 %v2488_v28, %v2483_v56  ;;  %v2497_v9 = vmul.f32 %v2489_v1, %v2483_v56 }
 0x64e   :  { %v2498_v42 = vadd.f32 %v2494_v53, %v2475_v33  ;;  %v2499_v12 = vadd.f32 %v2495_v18, %v2476_v61  ;;  %v2500_v38 = vadd.f32 %v2496_v51, %v2477_v43  ;;  %v2501_v17 = vadd.f32 %v2497_v9, %v2478_v5 }
 0x650   :  { %v2502_v34 = vperm.slane %v2498_v42, 0  ;;  %v2503_v37 = vperm.slane %v2499_v12, 0  ;;  %v2504_v63 = vperm.slane %v2500_v38, 0  ;;  %v2505_v49 = vperm.slane %v2501_v17, 0 }
 0x652   :  { %v2506_v55 = vmul.f32 %v2502_v34, %v5635_v15  ;;  %v2507_v21 = vmul.f32 %v2503_v37, %v5637_v58  ;;  %v2508_v36 = vmul.f32 %v2504_v63, %v5641_v30  ;;  %v2509_v59 = vmul.f32 %v2505_v49, %v5643_v0  ;;  %v2520_v30 = vld [vmem:[%s5764_s0 + $0x30] sm:$0xff] }
 0x653   :  { %v2510_v3 = vmul.f32 %v2502_v34, %v5645_v24  ;;  %v2511_v46 = vmul.f32 %v2503_v37, %v5647_v23  ;;  %v2512_v15 = vmul.f32 %v2504_v63, %v5655_v11  ;;  %v2513_v0 = vmul.f32 %v2505_v49, %v5657_v41  ;;  %v2521_v24 = vld [vmem:[%s5764_s0 + $0x38] sm:$0xff] }
 0x654   :  { %v2522_v39 = vadd.f32 %v2514_v2, %v2506_v55  ;;  %v2523_v58 = vadd.f32 %v2515_v44, %v2507_v21  ;;  %v2524_v26 = vadd.f32 %v2516_v32, %v2508_v36  ;;  %v2525_v40 = vadd.f32 %v2517_v25, %v2509_v59 }
 0x655   :  { %v2526_v23 = vadd.f32 %v2518_v13, %v2510_v3  ;;  %v2527_v11 = vadd.f32 %v2519_v57, %v2511_v46  ;;  %v2528_v8 = vadd.f32 %v2520_v30, %v2512_v15  ;;  %v2529_v41 = vadd.f32 %v2521_v24, %v2513_v0 }
 0x656   :  { %2530 = vst [vmem:[%s5770_s6] sm:$0xff] %v2522_v39 }
 0x657   :  { %2531 = vst [vmem:[%s5770_s6 + $0x8] sm:$0xff] %v2523_v58 }
 0x658   :  { %2532 = vst [vmem:[%s5770_s6 + $0x10] sm:$0xff] %v2524_v26 }
 0x659   :  { %2533 = vst [vmem:[%s5770_s6 + $0x18] sm:$0xff] %v2525_v40 }
 0x65a   :  { %2534 = vst [vmem:[%s5770_s6 + $0x20] sm:$0xff] %v2526_v23 }
 0x65b   :  { %2535 = vst [vmem:[%s5770_s6 + $0x28] sm:$0xff] %v2527_v11 }
 0x65c   :  { %2536 = vst [vmem:[%s5770_s6 + $0x30] sm:$0xff] %v2528_v8 }
 0x65d   :  { %2537 = vst [vmem:[%s5770_s6 + $0x38] sm:$0xff] %v2529_v41 }

</bundles_post_ra>
